<compile_context>
chip_gen: v7x
topology: tpu7x:2x2x1
jax: 0.10.0
libtpu: 0.0.40
codegen_flags: <defaults>
</compile_context>

<pallas_src>
import jax
import jax.numpy as jnp
from jax.experimental import pallas as pl
from jax.experimental.pallas import tpu as pltpu


def _attn_pool_kernel(x_ref, posr_ref, dk_ref, dv_ref, wq_ref, bq_ref,
                      wk_ref, bk_ref, wv_ref, bv_ref, wc_ref, bc_ref,
                      heh_ref, hhe_ref, o_ref):
    # x_ref  : (NB, HW, E)   spatial tokens for NB batch elements (compute dtype)
    # posr   : (HW, E)       positional embedding rows 1.. (f32)
    # dk/dv  : (1, E)        (pos0 - mean(pos[1:])) @ Wk / Wv   (f32)
    # wq     : (E, E) scaled; bq : (1, E) = (pos0 @ Wq + bq) * scale  (f32)
    # wk/wv  : (E, E), bk/bv : (1, E)
    # wc     : (E, O), bc : (1, O)
    # heh    : (E, HP) 0/1 head-segment map (HP = heads padded to 128 lanes)
    # hhe    : (HP, E) its transpose
    # o_ref  : (NB, O)
    f32 = jnp.float32
    cdt = wq_ref.dtype                         # MXU operand dtype (bf16 or f32)

    x = x_ref[...]
    NB, HW, E = x.shape
    xf = x.astype(f32)
    posr = posr_ref[...]                       # (HW, E) f32
    heh = heh_ref[...]                         # (E, HP) f32
    HP = heh.shape[1]

    # query projection: pos0 and 1/sqrt(Dh) are folded into wq/bq (wrapper)
    mean_x = jnp.mean(xf, axis=1)              # (NB, E) f32
    q = jnp.dot(mean_x.astype(cdt), wq_ref[...],
                preferred_element_type=f32) + bq_ref[...]           # (NB, E) f32

    # spatial tokens with positional embedding, cast once for the MXU
    tokr = (xf + posr[None, :, :]).astype(cdt)                      # (NB, HW, E)
    tokr2 = tokr.reshape(NB * HW, E)

    # ---- K path (consumed before V materializes -> lower peak live f32) ----
    kr = jnp.dot(tokr2, wk_ref[...], preferred_element_type=f32) + bk_ref[...]
    kr = kr.reshape(NB, HW, E)                                       # (NB, HW, E) f32
    k0 = jnp.mean(kr, axis=1) + dk_ref[...]                          # (NB, E) mean-token key

    # head-batched scores: elementwise q*k (VPU) then segmented lane reduction
    # via a matmul against the 0/1 (E, HP) map -> lane-dense, no sub-128 slices
    s0 = jnp.dot(q * k0, heh, preferred_element_type=f32)            # (NB, HP)
    sr = jnp.dot((q[:, None, :] * kr).reshape(NB * HW, E), heh,
                 preferred_element_type=f32).reshape(NB, HW, HP)     # (NB, HW, HP)

    # softmax over the (1 + HW) tokens, per batch & head (f32)
    m = jnp.maximum(s0, jnp.max(sr, axis=1))                         # (NB, HP)
    e0 = jnp.exp(s0 - m)                                             # (NB, HP)
    er = jnp.exp(sr - m[:, None, :])                                 # (NB, HW, HP)
    denom = e0 + jnp.sum(er, axis=1)                                 # (NB, HP)

    # ---- V path ----
    vr = jnp.dot(tokr2, wv_ref[...], preferred_element_type=f32) + bv_ref[...]
    vr = vr.reshape(NB, HW, E)
    v0 = jnp.mean(vr, axis=1) + dv_ref[...]                          # (NB, E)

    hhe = hhe_ref[...]                                               # (HP, E)
    # broadcast per-head weights / inverse denominators across each head's lanes
    w0 = jnp.dot(e0, hhe, preferred_element_type=f32)                # (NB, E)
    wr = jnp.dot(er.reshape(NB * HW, HP), hhe,
                 preferred_element_type=f32).reshape(NB, HW, E)      # (NB, HW, E)
    inv_b = jnp.dot(1.0 / denom, hhe, preferred_element_type=f32)    # (NB, E), exact
    ctx = (w0 * v0 + jnp.sum(wr * vr, axis=1)) * inv_b               # (NB, E)

    # single output projection for all heads / all NB rows, lane-dense store
    out = jnp.dot(ctx.astype(cdt), wc_ref[...],
                  preferred_element_type=f32) + bc_ref[...]
    o_ref[...] = out.astype(o_ref.dtype)                             # (NB, O)


def _default_vmem_limit():
    try:
        cap = int(pltpu.get_tpu_info().vmem_capacity_bytes)
        return min(100 * 1024 * 1024, int(cap * 0.9))
    except Exception:
        return 64 * 1024 * 1024


def attention_pool_2d(x_nchw, params, num_heads, *, block_n=16,
                      compute_dtype=jnp.bfloat16, vmem_limit_bytes=None):
    """x_nchw: (N, C, H, W) float32. Returns (N, output_dim) float32."""
    f32 = jnp.float32
    N, C, H, W = x_nchw.shape
    HW, E = H * W, C
    Dh = E // num_heads
    scale = float(Dh) ** -0.5
    O = params['wc'].shape[1]

    NB = int(block_n)
    N_pad = NB * pl.cdiv(N, NB)
    grid_n = N_pad // NB

    if vmem_limit_bytes is None:
        vmem_limit_bytes = _default_vmem_limit()

    # glue: NCHW -> (N, HW, E), pad batch to a multiple of NB
    x_seq = jnp.transpose(x_nchw.reshape(N, C, HW), (0, 2, 1)).astype(compute_dtype)
    if N_pad != N:
        x_seq = jnp.concatenate(
            [x_seq, jnp.zeros((N_pad - N, HW, E), compute_dtype)], axis=0)

    pos = params['pos'].astype(f32)                    # (HW+1, E)
    pos0 = pos[0:1]                                    # (1, E)
    posr = pos[1:]                                     # (HW, E)

    wq_f, wk_f, wv_f = (params['wq'].astype(f32), params['wk'].astype(f32),
                        params['wv'].astype(f32))
    # fold 1/sqrt(Dh) and the pos0 row into the q projection (exact rewrite)
    wq = (wq_f * scale).astype(compute_dtype)
    bq = (pos0 @ wq_f + params['bq'].astype(f32)) * scale            # (1, E) f32
    wk = wk_f.astype(compute_dtype)
    bk = params['bk'].astype(f32)
    wv = wv_f.astype(compute_dtype)
    bv = params['bv'].astype(f32)
    wc = params['wc'].astype(compute_dtype)
    bc = params['bc'].astype(f32)

    # linearity: mean-token key/value correction vectors (pos0 never enters kernel)
    mean_posr = jnp.mean(posr, axis=0, keepdims=True)                # (1, E)
    dk = (pos0 - mean_posr) @ wk_f                                   # (1, E) f32
    dv = (pos0 - mean_posr) @ wv_f                                   # (1, E) f32

    # 0/1 head-segment matrices padded to 128 lanes (fake heads are exact no-ops)
    HP = max(128, ((num_heads + 127) // 128) * 128)
    head_of_lane = jnp.arange(E) // Dh
    heh = (head_of_lane[:, None] == jnp.arange(HP)[None, :]).astype(f32)   # (E, HP)
    hhe = heh.T                                                             # (HP, E)

    # advisory cost estimate for the XLA scheduler
    itemsize = jnp.dtype(compute_dtype).itemsize
    flops_per_step = (
        2 * NB * HW * E * E * 2            # K and V projections
        + 2 * NB * E * E                   # q projection
        + 2 * NB * (HW + 1) * E * HP * 2   # score reduce + weight broadcast matmuls
        + 2 * NB * E * O                   # c_proj
    )
    cost = pl.CostEstimate(
        flops=int(grid_n * flops_per_step),
        transcendentals=int(grid_n * NB * (HW + 1) * HP),
        bytes_accessed=int(N_pad * HW * E * itemsize                 # x
                           + (3 * E * E + E * O) * itemsize          # weights
                           + (HW + 2 * E + HW * E + O) * 4           # pos/bias/maps
                           + N_pad * O * 4),                         # output
    )

    def vmem_full():
        # full-array, single-buffered VMEM resident operand (grid-constant)
        return pl.BlockSpec(memory_space=pltpu.MemorySpace.VMEM)

    out = pl.pallas_call(
        _attn_pool_kernel,
        out_shape=jax.ShapeDtypeStruct((N_pad, O), f32),
        grid=(grid_n,),
        in_specs=[
            pl.BlockSpec((NB, HW, E), lambda n: (n, 0, 0)),   # x tokens (NB per step)
            vmem_full(),   # posr
            vmem_full(),   # dk
            vmem_full(),   # dv
            vmem_full(),   # wq (scaled)
            vmem_full(),   # bq (scaled, pos0 folded)
            vmem_full(),   # wk
            vmem_full(),   # bk
            vmem_full(),   # wv
            vmem_full(),   # bv
            vmem_full(),   # wc
            vmem_full(),   # bc
            vmem_full(),   # heh (E, HP)
            vmem_full(),   # hhe (HP, E)
        ],
        out_specs=pl.BlockSpec((NB, O), lambda n: (n, 0)),    # lane-dense (NB, O) store
        compiler_params=pltpu.CompilerParams(
            dimension_semantics=("parallel",),                # shard batch across TCs
            vmem_limit_bytes=int(vmem_limit_bytes),
        ),
        cost_estimate=cost,
    )(x_seq, posr, dk, dv, wq, bq, wk, bk, wv, bv, wc, bc, heh, hhe)
    return out[:N]


def ref_forward(x_nchw, params, num_heads):
    """Pure-JAX reference mirroring F.multi_head_attention_forward semantics."""
    N, C, H, W = x_nchw.shape
    HW, E = H * W, C
    t = jnp.transpose(x_nchw.reshape(N, C, HW), (2, 0, 1))           # (HW, N, C)
    t = jnp.concatenate([t.mean(axis=0, keepdims=True), t], axis=0)  # (S, N, C)
    t = t + params['pos'][:, None, :]
    Dh = E // num_heads
    scale = float(Dh) ** -0.5
    q = (t[:1] @ params['wq'] + params['bq']) * scale                # (1, N, E)
    k = t @ params['wk'] + params['bk']                              # (S, N, E)
    v = t @ params['wv'] + params['bv']
    q = q.reshape(1, N, num_heads, Dh)
    k = k.reshape(-1, N, num_heads, Dh)
    v = v.reshape(-1, N, num_heads, Dh)
    scores = jnp.einsum('qnhd,snhd->nhqs', q, k)
    attn = jax.nn.softmax(scores, axis=-1)
    out = jnp.einsum('nhqs,snhd->qnhd', attn, v).reshape(1, N, E)
    out = out @ params['wc'] + params['bc']                          # (1, N, O)
    return out[0]


if __name__ == "__main__":
    N, embed_dim, spacial_dim, num_heads, output_dim = 12, 32, 4, 4, 16
    HW = spacial_dim * spacial_dim

    key = jax.random.PRNGKey(0)
    ks = jax.random.split(key, 12)
    f32 = jnp.float32
    params = {
        'pos': jax.random.normal(ks[0], (HW + 1, embed_dim), f32) / (embed_dim ** 0.5),
        'wq': jax.random.normal(ks[1], (embed_dim, embed_dim), f32) * 0.1,
        'bq': jax.random.normal(ks[2], (1, embed_dim), f32) * 0.1,
        'wk': jax.random.normal(ks[3], (embed_dim, embed_dim), f32) * 0.1,
        'bk': jax.random.normal(ks[4], (1, embed_dim), f32) * 0.1,
        'wv': jax.random.normal(ks[5], (embed_dim, embed_dim), f32) * 0.1,
        'bv': jax.random.normal(ks[6], (1, embed_dim), f32) * 0.1,
        'wc': jax.random.normal(ks[7], (embed_dim, output_dim), f32) * 0.1,
        'bc': jax.random.normal(ks[8], (1, output_dim), f32) * 0.1,
    }
    x = jax.random.normal(ks[9], (N, embed_dim, spacial_dim, spacial_dim), f32)

    ref = ref_forward(x, params, num_heads)

    # f32 MXU-operand path: exact semantics, tight tolerance
    out_f32 = attention_pool_2d(x, params, num_heads, compute_dtype=jnp.float32)
    out_f32 = jax.block_until_ready(out_f32)
    assert out_f32.shape == (N, output_dim)
    assert jnp.allclose(out_f32, ref, atol=2e-4, rtol=2e-4), "f32 mismatch vs reference"

    # default production path: bf16 MXU operands, f32 accumulation & softmax
    out_bf16 = attention_pool_2d(x, params, num_heads)
    out_bf16 = jax.block_until_ready(out_bf16)
    assert out_bf16.shape == (N, output_dim)
    assert jnp.allclose(out_bf16, ref, atol=1e-1, rtol=1e-1), "bf16 mismatch vs reference"

    print("KERNEL_OK")
</pallas_src>

<mosaic_0001>
module attributes {stable_mosaic.version = 11 : i64} {
  func.func @_attn_pool_kernel(%arg0: i32, %arg1: memref<16x16x32xf32, #tpu.memory_space<vmem>>, %arg2: memref<16x32xf32, #tpu.memory_space<vmem>>, %arg3: memref<1x32xf32, #tpu.memory_space<vmem>>, %arg4: memref<1x32xf32, #tpu.memory_space<vmem>>, %arg5: memref<32x32xf32, #tpu.memory_space<vmem>>, %arg6: memref<1x32xf32, #tpu.memory_space<vmem>>, %arg7: memref<32x32xf32, #tpu.memory_space<vmem>>, %arg8: memref<1x32xf32, #tpu.memory_space<vmem>>, %arg9: memref<32x32xf32, #tpu.memory_space<vmem>>, %arg10: memref<1x32xf32, #tpu.memory_space<vmem>>, %arg11: memref<32x16xf32, #tpu.memory_space<vmem>>, %arg12: memref<1x16xf32, #tpu.memory_space<vmem>>, %arg13: memref<32x128xf32, #tpu.memory_space<vmem>>, %arg14: memref<128x32xf32, #tpu.memory_space<vmem>>, %arg15: memref<16x16xf32, #tpu.memory_space<vmem>>) attributes {dimension_semantics = [#tpu.dimension_semantics<parallel>], iteration_bounds = array<i64: 1>, scalar_prefetch = 0 : i64, scratch_operands = 0 : i64, tpu.core_type = #tpu.core_type<tc>, window_params = [{transform_indices = @transform_0, window_bounds = array<i64: 16, 16, 32>}, {pipeline_mode = #tpu.pipeline_mode<synchronous>, transform_indices = @transform_1, window_bounds = array<i64: 16, 32>}, {pipeline_mode = #tpu.pipeline_mode<synchronous>, transform_indices = @transform_2, window_bounds = array<i64: 1, 32>}, {pipeline_mode = #tpu.pipeline_mode<synchronous>, transform_indices = @transform_3, window_bounds = array<i64: 1, 32>}, {pipeline_mode = #tpu.pipeline_mode<synchronous>, transform_indices = @transform_4, window_bounds = array<i64: 32, 32>}, {pipeline_mode = #tpu.pipeline_mode<synchronous>, transform_indices = @transform_5, window_bounds = array<i64: 1, 32>}, {pipeline_mode = #tpu.pipeline_mode<synchronous>, transform_indices = @transform_6, window_bounds = array<i64: 32, 32>}, {pipeline_mode = #tpu.pipeline_mode<synchronous>, transform_indices = @transform_7, window_bounds = array<i64: 1, 32>}, {pipeline_mode = #tpu.pipeline_mode<synchronous>, transform_indices = @transform_8, window_bounds = array<i64: 32, 32>}, {pipeline_mode = #tpu.pipeline_mode<synchronous>, transform_indices = @transform_9, window_bounds = array<i64: 1, 32>}, {pipeline_mode = #tpu.pipeline_mode<synchronous>, transform_indices = @transform_10, window_bounds = array<i64: 32, 16>}, {pipeline_mode = #tpu.pipeline_mode<synchronous>, transform_indices = @transform_11, window_bounds = array<i64: 1, 16>}, {pipeline_mode = #tpu.pipeline_mode<synchronous>, transform_indices = @transform_12, window_bounds = array<i64: 32, 128>}, {pipeline_mode = #tpu.pipeline_mode<synchronous>, transform_indices = @transform_13, window_bounds = array<i64: 128, 32>}, {transform_indices = @transform_14, window_bounds = array<i64: 16, 16>}]} {
    %c0 = arith.constant 0 : index
    %c0_0 = arith.constant 0 : index
    %c0_1 = arith.constant 0 : index
    %0 = vector.load %arg1[%c0, %c0_0, %c0_1] : memref<16x16x32xf32, #tpu.memory_space<vmem>>, vector<16x16x32xf32>
    %c0_2 = arith.constant 0 : index
    %c0_3 = arith.constant 0 : index
    %1 = vector.load %arg2[%c0_2, %c0_3] : memref<16x32xf32, #tpu.memory_space<vmem>>, vector<16x32xf32>
    %c0_4 = arith.constant 0 : index
    %c0_5 = arith.constant 0 : index
    %2 = vector.load %arg13[%c0_4, %c0_5] : memref<32x128xf32, #tpu.memory_space<vmem>>, vector<32x128xf32>
    %cst = arith.constant dense<0.000000e+00> : vector<16x32xf32>
    %3 = vector.multi_reduction <add>, %0, %cst [1] : vector<16x16x32xf32> to vector<16x32xf32>
    %cst_6 = arith.constant 1.600000e+01 : f32
    %4 = vector.broadcast %cst_6 : f32 to vector<16x32xf32>
    %5 = arith.divf %3, %4 : vector<16x32xf32>
    %c0_7 = arith.constant 0 : index
    %c0_8 = arith.constant 0 : index
    %6 = vector.load %arg5[%c0_7, %c0_8] : memref<32x32xf32, #tpu.memory_space<vmem>>, vector<32x32xf32>
    %cst_9 = arith.constant dense<0.000000e+00> : vector<16x32xf32>
    %7 = tpu.matmul %5, %6, %cst_9 {dimension_numbers = #tpu.dot_dimension_numbers<[1], [0], [0], [1], [0, 0, 1, 1], [], []>} : vector<16x32xf32>, vector<32x32xf32>, vector<16x32xf32> -> vector<16x32xf32>
    %c0_10 = arith.constant 0 : index
    %c0_11 = arith.constant 0 : index
    %8 = vector.load %arg6[%c0_10, %c0_11] : memref<1x32xf32, #tpu.memory_space<vmem>>, vector<1x32xf32>
    %9 = vector.broadcast %8 : vector<1x32xf32> to vector<16x32xf32>
    %10 = arith.addf %7, %9 : vector<16x32xf32>
    %11 = vector.shape_cast %1 : vector<16x32xf32> to vector<1x16x32xf32>
    %12 = vector.broadcast %11 : vector<1x16x32xf32> to vector<16x16x32xf32>
    %13 = arith.addf %0, %12 : vector<16x16x32xf32>
    %14 = vector.shape_cast %13 : vector<16x16x32xf32> to vector<256x32xf32>
    %c0_12 = arith.constant 0 : index
    %c0_13 = arith.constant 0 : index
    %15 = vector.load %arg7[%c0_12, %c0_13] : memref<32x32xf32, #tpu.memory_space<vmem>>, vector<32x32xf32>
    %cst_14 = arith.constant dense<0.000000e+00> : vector<256x32xf32>
    %16 = tpu.matmul %14, %15, %cst_14 {dimension_numbers = #tpu.dot_dimension_numbers<[1], [0], [0], [1], [0, 0, 1, 1], [], []>} : vector<256x32xf32>, vector<32x32xf32>, vector<256x32xf32> -> vector<256x32xf32>
    %c0_15 = arith.constant 0 : index
    %c0_16 = arith.constant 0 : index
    %17 = vector.load %arg8[%c0_15, %c0_16] : memref<1x32xf32, #tpu.memory_space<vmem>>, vector<1x32xf32>
    %18 = vector.broadcast %17 : vector<1x32xf32> to vector<256x32xf32>
    %19 = arith.addf %16, %18 : vector<256x32xf32>
    %20 = vector.shape_cast %19 : vector<256x32xf32> to vector<16x16x32xf32>
    %cst_17 = arith.constant dense<0.000000e+00> : vector<16x32xf32>
    %21 = vector.multi_reduction <add>, %20, %cst_17 [1] : vector<16x16x32xf32> to vector<16x32xf32>
    %cst_18 = arith.constant 1.600000e+01 : f32
    %22 = vector.broadcast %cst_18 : f32 to vector<16x32xf32>
    %23 = arith.divf %21, %22 : vector<16x32xf32>
    %c0_19 = arith.constant 0 : index
    %c0_20 = arith.constant 0 : index
    %24 = vector.load %arg3[%c0_19, %c0_20] : memref<1x32xf32, #tpu.memory_space<vmem>>, vector<1x32xf32>
    %25 = vector.broadcast %24 : vector<1x32xf32> to vector<16x32xf32>
    %26 = arith.addf %23, %25 : vector<16x32xf32>
    %27 = arith.mulf %10, %26 : vector<16x32xf32>
    %cst_21 = arith.constant dense<0.000000e+00> : vector<16x128xf32>
    %28 = tpu.matmul %27, %2, %cst_21 {dimension_numbers = #tpu.dot_dimension_numbers<[1], [0], [0], [1], [0, 0, 1, 1], [], []>} : vector<16x32xf32>, vector<32x128xf32>, vector<16x128xf32> -> vector<16x128xf32>
    %29 = vector.shape_cast %10 : vector<16x32xf32> to vector<16x1x32xf32>
    %30 = vector.broadcast %29 : vector<16x1x32xf32> to vector<16x16x32xf32>
    %31 = arith.mulf %30, %20 : vector<16x16x32xf32>
    %32 = vector.shape_cast %31 : vector<16x16x32xf32> to vector<256x32xf32>
    %cst_22 = arith.constant dense<0.000000e+00> : vector<256x128xf32>
    %33 = tpu.matmul %32, %2, %cst_22 {dimension_numbers = #tpu.dot_dimension_numbers<[1], [0], [0], [1], [0, 0, 1, 1], [], []>} : vector<256x32xf32>, vector<32x128xf32>, vector<256x128xf32> -> vector<256x128xf32>
    %34 = vector.shape_cast %33 : vector<256x128xf32> to vector<16x16x128xf32>
    %cst_23 = arith.constant dense<0xFF800000> : vector<16x128xf32>
    %35 = vector.multi_reduction <maximumf>, %34, %cst_23 [1] : vector<16x16x128xf32> to vector<16x128xf32>
    %36 = arith.maximumf %28, %35 : vector<16x128xf32>
    %37 = arith.subf %28, %36 : vector<16x128xf32>
    %38 = math.exp %37 : vector<16x128xf32>
    %39 = vector.shape_cast %36 : vector<16x128xf32> to vector<16x1x128xf32>
    %40 = vector.broadcast %39 : vector<16x1x128xf32> to vector<16x16x128xf32>
    %41 = arith.subf %34, %40 : vector<16x16x128xf32>
    %42 = math.exp %41 : vector<16x16x128xf32>
    %cst_24 = arith.constant dense<0.000000e+00> : vector<16x128xf32>
    %43 = vector.multi_reduction <add>, %42, %cst_24 [1] : vector<16x16x128xf32> to vector<16x128xf32>
    %44 = arith.addf %38, %43 : vector<16x128xf32>
    %c0_25 = arith.constant 0 : index
    %c0_26 = arith.constant 0 : index
    %45 = vector.load %arg9[%c0_25, %c0_26] : memref<32x32xf32, #tpu.memory_space<vmem>>, vector<32x32xf32>
    %cst_27 = arith.constant dense<0.000000e+00> : vector<256x32xf32>
    %46 = tpu.matmul %14, %45, %cst_27 {dimension_numbers = #tpu.dot_dimension_numbers<[1], [0], [0], [1], [0, 0, 1, 1], [], []>} : vector<256x32xf32>, vector<32x32xf32>, vector<256x32xf32> -> vector<256x32xf32>
    %c0_28 = arith.constant 0 : index
    %c0_29 = arith.constant 0 : index
    %47 = vector.load %arg10[%c0_28, %c0_29] : memref<1x32xf32, #tpu.memory_space<vmem>>, vector<1x32xf32>
    %48 = vector.broadcast %47 : vector<1x32xf32> to vector<256x32xf32>
    %49 = arith.addf %46, %48 : vector<256x32xf32>
    %50 = vector.shape_cast %49 : vector<256x32xf32> to vector<16x16x32xf32>
    %cst_30 = arith.constant dense<0.000000e+00> : vector<16x32xf32>
    %51 = vector.multi_reduction <add>, %50, %cst_30 [1] : vector<16x16x32xf32> to vector<16x32xf32>
    %cst_31 = arith.constant 1.600000e+01 : f32
    %52 = vector.broadcast %cst_31 : f32 to vector<16x32xf32>
    %53 = arith.divf %51, %52 : vector<16x32xf32>
    %c0_32 = arith.constant 0 : index
    %c0_33 = arith.constant 0 : index
    %54 = vector.load %arg4[%c0_32, %c0_33] : memref<1x32xf32, #tpu.memory_space<vmem>>, vector<1x32xf32>
    %55 = vector.broadcast %54 : vector<1x32xf32> to vector<16x32xf32>
    %56 = arith.addf %53, %55 : vector<16x32xf32>
    %c0_34 = arith.constant 0 : index
    %c0_35 = arith.constant 0 : index
    %57 = vector.load %arg14[%c0_34, %c0_35] : memref<128x32xf32, #tpu.memory_space<vmem>>, vector<128x32xf32>
    %cst_36 = arith.constant dense<0.000000e+00> : vector<16x32xf32>
    %58 = tpu.matmul %38, %57, %cst_36 {dimension_numbers = #tpu.dot_dimension_numbers<[1], [0], [0], [1], [0, 0, 1, 1], [], []>} : vector<16x128xf32>, vector<128x32xf32>, vector<16x32xf32> -> vector<16x32xf32>
    %59 = vector.shape_cast %42 : vector<16x16x128xf32> to vector<256x128xf32>
    %cst_37 = arith.constant dense<0.000000e+00> : vector<256x32xf32>
    %60 = tpu.matmul %59, %57, %cst_37 {dimension_numbers = #tpu.dot_dimension_numbers<[1], [0], [0], [1], [0, 0, 1, 1], [], []>} : vector<256x128xf32>, vector<128x32xf32>, vector<256x32xf32> -> vector<256x32xf32>
    %61 = vector.shape_cast %60 : vector<256x32xf32> to vector<16x16x32xf32>
    %cst_38 = arith.constant 1.000000e+00 : f32
    %62 = vector.broadcast %cst_38 : f32 to vector<16x128xf32>
    %63 = arith.divf %62, %44 : vector<16x128xf32>
    %cst_39 = arith.constant dense<0.000000e+00> : vector<16x32xf32>
    %64 = tpu.matmul %63, %57, %cst_39 {dimension_numbers = #tpu.dot_dimension_numbers<[1], [0], [0], [1], [0, 0, 1, 1], [], []>} : vector<16x128xf32>, vector<128x32xf32>, vector<16x32xf32> -> vector<16x32xf32>
    %65 = arith.mulf %58, %56 : vector<16x32xf32>
    %66 = arith.mulf %61, %50 : vector<16x16x32xf32>
    %cst_40 = arith.constant dense<0.000000e+00> : vector<16x32xf32>
    %67 = vector.multi_reduction <add>, %66, %cst_40 [1] : vector<16x16x32xf32> to vector<16x32xf32>
    %68 = arith.addf %65, %67 : vector<16x32xf32>
    %69 = arith.mulf %68, %64 : vector<16x32xf32>
    %c0_41 = arith.constant 0 : index
    %c0_42 = arith.constant 0 : index
    %70 = vector.load %arg11[%c0_41, %c0_42] : memref<32x16xf32, #tpu.memory_space<vmem>>, vector<32x16xf32>
    %cst_43 = arith.constant dense<0.000000e+00> : vector<16x16xf32>
    %71 = tpu.matmul %69, %70, %cst_43 {dimension_numbers = #tpu.dot_dimension_numbers<[1], [0], [0], [1], [0, 0, 1, 1], [], []>} : vector<16x32xf32>, vector<32x16xf32>, vector<16x16xf32> -> vector<16x16xf32>
    %c0_44 = arith.constant 0 : index
    %c0_45 = arith.constant 0 : index
    %72 = vector.load %arg12[%c0_44, %c0_45] : memref<1x16xf32, #tpu.memory_space<vmem>>, vector<1x16xf32>
    %73 = vector.broadcast %72 : vector<1x16xf32> to vector<16x16xf32>
    %74 = arith.addf %71, %73 : vector<16x16xf32>
    %c0_46 = arith.constant 0 : index
    %c0_47 = arith.constant 0 : index
    %75 = vector.load %arg15[%c0_46, %c0_47] : memref<16x16xf32, #tpu.memory_space<vmem>>, vector<16x16xf32>
    tpu.vector_store %arg15[%c0_46, %c0_47], %74 {strides = array<i32>} : memref<16x16xf32, #tpu.memory_space<vmem>>, vector<16x16xf32>,
    return
  }
  func.func @transform_0(%arg0: i32) -> (i32, i32, i32) {
    %c0_i32 = arith.constant 0 : i32
    %c0_i32_0 = arith.constant 0 : i32
    %c0_i32_1 = arith.constant 0 : i32
    return %arg0, %c0_i32, %c0_i32_0 : i32, i32, i32
  }
  func.func @transform_1(%arg0: i32) -> (i32, i32) {
    %c0_i32 = arith.constant 0 : i32
    %c0_i32_0 = arith.constant 0 : i32
    %c0_i32_1 = arith.constant 0 : i32
    return %c0_i32, %c0_i32_0 : i32, i32
  }
  func.func @transform_2(%arg0: i32) -> (i32, i32) {
    %c0_i32 = arith.constant 0 : i32
    %c0_i32_0 = arith.constant 0 : i32
    %c0_i32_1 = arith.constant 0 : i32
    return %c0_i32, %c0_i32_0 : i32, i32
  }
  func.func @transform_3(%arg0: i32) -> (i32, i32) {
    %c0_i32 = arith.constant 0 : i32
    %c0_i32_0 = arith.constant 0 : i32
    %c0_i32_1 = arith.constant 0 : i32
    return %c0_i32, %c0_i32_0 : i32, i32
  }
  func.func @transform_4(%arg0: i32) -> (i32, i32) {
    %c0_i32 = arith.constant 0 : i32
    %c0_i32_0 = arith.constant 0 : i32
    %c0_i32_1 = arith.constant 0 : i32
    return %c0_i32, %c0_i32_0 : i32, i32
  }
  func.func @transform_5(%arg0: i32) -> (i32, i32) {
    %c0_i32 = arith.constant 0 : i32
    %c0_i32_0 = arith.constant 0 : i32
    %c0_i32_1 = arith.constant 0 : i32
    return %c0_i32, %c0_i32_0 : i32, i32
  }
  func.func @transform_6(%arg0: i32) -> (i32, i32) {
    %c0_i32 = arith.constant 0 : i32
    %c0_i32_0 = arith.constant 0 : i32
    %c0_i32_1 = arith.constant 0 : i32
    return %c0_i32, %c0_i32_0 : i32, i32
  }
  func.func @transform_7(%arg0: i32) -> (i32, i32) {
    %c0_i32 = arith.constant 0 : i32
    %c0_i32_0 = arith.constant 0 : i32
    %c0_i32_1 = arith.constant 0 : i32
    return %c0_i32, %c0_i32_0 : i32, i32
  }
  func.func @transform_8(%arg0: i32) -> (i32, i32) {
    %c0_i32 = arith.constant 0 : i32
    %c0_i32_0 = arith.constant 0 : i32
    %c0_i32_1 = arith.constant 0 : i32
    return %c0_i32, %c0_i32_0 : i32, i32
  }
  func.func @transform_9(%arg0: i32) -> (i32, i32) {
    %c0_i32 = arith.constant 0 : i32
    %c0_i32_0 = arith.constant 0 : i32
    %c0_i32_1 = arith.constant 0 : i32
    return %c0_i32, %c0_i32_0 : i32, i32
  }
  func.func @transform_10(%arg0: i32) -> (i32, i32) {
    %c0_i32 = arith.constant 0 : i32
    %c0_i32_0 = arith.constant 0 : i32
    %c0_i32_1 = arith.constant 0 : i32
    return %c0_i32, %c0_i32_0 : i32, i32
  }
  func.func @transform_11(%arg0: i32) -> (i32, i32) {
    %c0_i32 = arith.constant 0 : i32
    %c0_i32_0 = arith.constant 0 : i32
    %c0_i32_1 = arith.constant 0 : i32
    return %c0_i32, %c0_i32_0 : i32, i32
  }
  func.func @transform_12(%arg0: i32) -> (i32, i32) {
    %c0_i32 = arith.constant 0 : i32
    %c0_i32_0 = arith.constant 0 : i32
    %c0_i32_1 = arith.constant 0 : i32
    return %c0_i32, %c0_i32_0 : i32, i32
  }
  func.func @transform_13(%arg0: i32) -> (i32, i32) {
    %c0_i32 = arith.constant 0 : i32
    %c0_i32_0 = arith.constant 0 : i32
    %c0_i32_1 = arith.constant 0 : i32
    return %c0_i32, %c0_i32_0 : i32, i32
  }
  func.func @transform_14(%arg0: i32) -> (i32, i32) {
    %c0_i32 = arith.constant 0 : i32
    %c0_i32_0 = arith.constant 0 : i32
    return %arg0, %c0_i32 : i32, i32
  }
}

</mosaic_0001>

<bundles_post_ra>
// kernel: tpu_custom_call.1
= control target key start
LH: loop header
LB: loop body
LE: loop exit
PB: predicated region body
PF: predicated region fallthrough
CT: control target
= control target key end

     0   :  { %19 = vsyncpa [#allocation3], 0  ;;  %s6718_s0 = inlined_call_operand.hbm [shape: f32[16,16,32], index: 0, kind: input, shape index: {}]   ;;  %s6719_s1 = inlined_call_operand.hbm [shape: f32[16,32], index: 1, kind: input, shape index: {}]   ;;  %s6720_s2 = inlined_call_operand.hbm [shape: f32[1,32], index: 2, kind: input, shape index: {}]   ;;  %s6721_s3 = inlined_call_operand.hbm [shape: f32[1,32], index: 3, kind: input, shape index: {}]   ;;  %s6722_s4 = inlined_call_operand.hbm [shape: f32[32,32], index: 4, kind: input, shape index: {}]   ;;  %s6723_s5 = inlined_call_operand.hbm [shape: f32[1,32], index: 5, kind: input, shape index: {}]   ;;  %s6724_s6 = inlined_call_operand.hbm [shape: f32[32,32], index: 6, kind: input, shape index: {}]   ;;  %s6725_s7 = inlined_call_operand.hbm [shape: f32[1,32], index: 7, kind: input, shape index: {}]   ;;  %s6726_s8 = inlined_call_operand.hbm [shape: f32[32,32], index: 8, kind: input, shape index: {}]   ;;  %s6727_s9 = inlined_call_operand.hbm [shape: f32[1,32], index: 9, kind: input, shape index: {}]   ;;  %s6728_s10 = inlined_call_operand.hbm [shape: f32[32,16], index: 10, kind: input, shape index: {}]   ;;  %s6729_s11 = inlined_call_operand.hbm [shape: f32[1,16], index: 11, kind: input, shape index: {}]   ;;  %s6730_s12 = inlined_call_operand.hbm [shape: f32[32,128], index: 12, kind: input, shape index: {}]   ;;  %s6731_s13 = inlined_call_operand.hbm [shape: f32[128,32], index: 13, kind: input, shape index: {}]   ;;  %s6732_s14 = inlined_call_operand.hbm [shape: f32[16,16], index: 14, kind: output, shape index: {}]  }
   0x1   :  { %20 = vsyncpa [#allocation6], 0 }
   0x2   :  { %21 = vsyncpa [#allocation9], 0 }
   0x3   :  { %22 = vsyncpa [#allocation12], 0 }
   0x4   :  { %23 = vsyncpa [#allocation15], 0 }
   0x5   :  { %24 = vsyncpa [#allocation18], 0 }
   0x6   :  { %25 = vsyncpa [#allocation21], 0 }
   0x7   :  { %26 = vsyncpa [#allocation24], 0 }
   0x8   :  { %27 = vsyncpa [#allocation4], 0  ;;  %s4784_s29 = smov [#allocation5]   ;;  %s4785_s15 = smov [#allocation8]  }
   0x9   :  { %s45_s30 = sshll.u32 %s4784_s29, 4  ;;  %s68_s16 = sshll.u32 %s4785_s15, 4  ;;  %s46_s30 = int_to_ptr.vmem [resolvable:$true] %s45_s30  ;;  %s4877_s16 = int_to_ptr.vmem [resolvable:$true] %s68_s16 }
   0xa   :  { %s4436_s19 = scalar_lea.hbm %s6719_s1, 256 }
   0xb   :  { %p4437_p0 = scmp.ne.s32.totalorder %s6719_s1, %s4436_s19  ;;  %p4440_p1 = scmp.lt.u32.totalorder %s4436_s19, %s6719_s1 }
   0xd   :  { %p4442_p2 = pnand %p4440_p1, %p4437_p0 }
   0xf   :  { %4445 = shalt.err (!%p4442_p2)
}
  0x10   :  { %s4446_s24 = scalar_lea.vmem %s46_s30, 256  ;;  %p4451_p4 = scmp.lt.s32.totalorder %s46_s30, %s46_s30 }
  0x11   :  { %p4447_p3 = scmp.ne.s32.totalorder %s46_s30, %s4446_s24  ;;  %p4452_p5 = scmp.lt.s32.totalorder %s4446_s24, %s4446_s24 }
  0x13   :  { %p4453_p6 = por %p4452_p5, %p4451_p4 }
  0x15   :  { %p4454_p7 = pnand %p4453_p6, %p4447_p3 }
  0x17   :  { %4457 = shalt.err (!%p4454_p7)
}
  0x18   :  { %s4786_s25 = smov 128   ;;  %s4787_s26 = smov 8  }
  0x19   :  { %51 = dma.hbm_to_vmem [thread:$0]  %s6719_s1, 256, %s46_s30, [#allocation6], %s4786_s25, %s4786_s25, %s4787_s26  }
  0x1a   :  { %s4458_s17 = scalar_lea.hbm %s6721_s3, 16 }
  0x1b   :  { %p4459_p8 = scmp.ne.s32.totalorder %s6721_s3, %s4458_s17  ;;  %p4462_p9 = scmp.lt.u32.totalorder %s4458_s17, %s6721_s3 }
  0x1d   :  { %p4464_p10 = pnand %p4462_p9, %p4459_p8 }
  0x1f   :  { %4467 = shalt.err (!%p4464_p10)
}
  0x20   :  { %s4468_s22 = scalar_lea.vmem %s4877_s16, 16  ;;  %s4472_s1 = scalar_lea.vmem %s4877_s16, 32 }
  0x21   :  { %p4469_p11 = scmp.ne.s32.totalorder %s4877_s16, %s4468_s22  ;;  %p4473_p12 = scmp.lt.s32.totalorder %s4877_s16, %s4877_s16 }
  0x22   :  { %p4474_p13 = scmp.lt.s32.totalorder %s4472_s1, %s4468_s22 }
  0x24   :  { %p4475_p0 = por %p4474_p13, %p4473_p12 }
  0x26   :  { %p4476_p1 = pnand %p4475_p0, %p4469_p11 }
  0x28   :  { %4479 = shalt.err (!%p4476_p1)
}
  0x29   :  { %71 = dma.hbm_to_vmem [thread:$0]  %s6721_s3, 16, %s4877_s16, [#allocation9]  }
  0x2a   :  { %s4788_s24 = smov [#allocation11]   ;;  %s4789_s28 = smov [#allocation14]  }
  0x2b   :  { %s90_s27 = sshll.u32 %s4788_s24, 4  ;;  %s112_s29 = sshll.u32 %s4789_s28, 4  ;;  %s91_s27 = int_to_ptr.vmem [resolvable:$true] %s90_s27  ;;  %s113_s29 = int_to_ptr.vmem [resolvable:$true] %s112_s29 }
  0x2c   :  { %s4480_s18 = scalar_lea.hbm %s6723_s5, 16 }
  0x2d   :  { %p4481_p2 = scmp.ne.s32.totalorder %s6723_s5, %s4480_s18  ;;  %p4484_p3 = scmp.lt.u32.totalorder %s4480_s18, %s6723_s5 }
  0x2f   :  { %p4486_p4 = pnand %p4484_p3, %p4481_p2 }
  0x31   :  { %4489 = shalt.err (!%p4486_p4)
}
  0x32   :  { %s4490_s3 = scalar_lea.vmem %s91_s27, 16  ;;  %s4494_s16 = scalar_lea.vmem %s91_s27, 32 }
  0x33   :  { %p4491_p5 = scmp.ne.s32.totalorder %s91_s27, %s4490_s3  ;;  %p4495_p6 = scmp.lt.s32.totalorder %s91_s27, %s91_s27 }
  0x34   :  { %p4496_p7 = scmp.lt.s32.totalorder %s4494_s16, %s4490_s3 }
  0x36   :  { %p4497_p8 = por %p4496_p7, %p4495_p6 }
  0x38   :  { %p4498_p9 = pnand %p4497_p8, %p4491_p5 }
  0x3a   :  { %4501 = shalt.err (!%p4498_p9)
}
  0x3b   :  { %93 = dma.hbm_to_vmem [thread:$0]  %s6723_s5, 16, %s91_s27, [#allocation12]  }
  0x3c   :  { %s4502_s28 = scalar_lea.hbm %s6725_s7, 16 }
  0x3d   :  { %p4503_p10 = scmp.ne.s32.totalorder %s6725_s7, %s4502_s28  ;;  %p4506_p11 = scmp.lt.u32.totalorder %s4502_s28, %s6725_s7 }
  0x3f   :  { %p4508_p12 = pnand %p4506_p11, %p4503_p10 }
  0x41   :  { %4511 = shalt.err (!%p4508_p12)
}
  0x42   :  { %s4512_s20 = scalar_lea.vmem %s113_s29, 16  ;;  %s4516_s21 = scalar_lea.vmem %s113_s29, 32 }
  0x43   :  { %p4513_p13 = scmp.ne.s32.totalorder %s113_s29, %s4512_s20  ;;  %p4517_p0 = scmp.lt.s32.totalorder %s113_s29, %s113_s29 }
  0x44   :  { %p4518_p1 = scmp.lt.s32.totalorder %s4516_s21, %s4512_s20 }
  0x46   :  { %p4519_p2 = por %p4518_p1, %p4517_p0 }
  0x48   :  { %p4520_p3 = pnand %p4519_p2, %p4513_p13 }
  0x4a   :  { %4523 = shalt.err (!%p4520_p3)
}
  0x4b   :  { %115 = dma.hbm_to_vmem [thread:$0]  %s6725_s7, 16, %s113_s29, [#allocation15]  }
  0x4c   :  { %s4790_s22 = smov [#allocation17]   ;;  %s4791_s16 = smov [#allocation20]  }
  0x4d   :  { %s134_s3 = sshll.u32 %s4790_s22, 4  ;;  %s156_s1 = sshll.u32 %s4791_s16, 4  ;;  %s135_s3 = int_to_ptr.vmem [resolvable:$true] %s134_s3  ;;  %s157_s1 = int_to_ptr.vmem [resolvable:$true] %s156_s1 }
  0x4e   :  { %s4524_s24 = scalar_lea.hbm %s6727_s9, 16 }
  0x4f   :  { %p4525_p4 = scmp.ne.s32.totalorder %s6727_s9, %s4524_s24  ;;  %p4528_p5 = scmp.lt.u32.totalorder %s4524_s24, %s6727_s9 }
  0x51   :  { %p4530_p6 = pnand %p4528_p5, %p4525_p4 }
  0x53   :  { %4533 = shalt.err (!%p4530_p6)
}
  0x54   :  { %s4534_s7 = scalar_lea.vmem %s135_s3, 16  ;;  %s4538_s29 = scalar_lea.vmem %s135_s3, 32 }
  0x55   :  { %p4535_p7 = scmp.ne.s32.totalorder %s135_s3, %s4534_s7  ;;  %p4539_p8 = scmp.lt.s32.totalorder %s135_s3, %s135_s3 }
  0x56   :  { %p4540_p9 = scmp.lt.s32.totalorder %s4538_s29, %s4534_s7 }
  0x58   :  { %p4541_p10 = por %p4540_p9, %p4539_p8 }
  0x5a   :  { %p4542_p11 = pnand %p4541_p10, %p4535_p7 }
  0x5c   :  { %4545 = shalt.err (!%p4542_p11)
}
  0x5d   :  { %137 = dma.hbm_to_vmem [thread:$0]  %s6727_s9, 16, %s135_s3, [#allocation18]  }
  0x5e   :  { %s4546_s27 = scalar_lea.hbm %s6729_s11, 16 }
  0x5f   :  { %p4547_p12 = scmp.ne.s32.totalorder %s6729_s11, %s4546_s27  ;;  %p4550_p13 = scmp.lt.u32.totalorder %s4546_s27, %s6729_s11 }
  0x61   :  { %p4552_p0 = pnand %p4550_p13, %p4547_p12 }
  0x63   :  { %4555 = shalt.err (!%p4552_p0)
}
  0x64   :  { %s4556_s24 = scalar_lea.vmem %s157_s1, 16  ;;  %s4560_s28 = scalar_lea.vmem %s157_s1, 32 }
  0x65   :  { %p4557_p1 = scmp.ne.s32.totalorder %s157_s1, %s4556_s24  ;;  %p4561_p2 = scmp.lt.s32.totalorder %s157_s1, %s157_s1 }
  0x66   :  { %p4562_p3 = scmp.lt.s32.totalorder %s4560_s28, %s4556_s24 }
  0x68   :  { %p4563_p4 = por %p4562_p3, %p4561_p2 }
  0x6a   :  { %p4564_p5 = pnand %p4563_p4, %p4557_p1 }
  0x6c   :  { %4567 = shalt.err (!%p4564_p5)
}
  0x6d   :  { %159 = dma.hbm_to_vmem [thread:$0]  %s6729_s11, 16, %s157_s1, [#allocation21]  }
  0x6e   :  { %s4792_s15 = smov [#allocation2]   ;;  %s4793_s18 = smov [#allocation7]  }
  0x6f   :  { %s33_s17 = sshll.u32 %s4792_s15, 4  ;;  %s58_s7 = sshll.u32 %s4793_s18, 4  ;;  %s34_s17 = int_to_ptr.vmem [resolvable:$true] %s33_s17  ;;  %s59_s7 = int_to_ptr.vmem [resolvable:$true] %s58_s7 }
  0x70   :  { %s4568_s20 = scalar_lea.hbm %s6718_s0, 4096 }
  0x71   :  { %p4569_p6 = scmp.ne.s32.totalorder %s6718_s0, %s4568_s20  ;;  %p4572_p7 = scmp.lt.u32.totalorder %s4568_s20, %s6718_s0 }
  0x73   :  { %p4574_p8 = pnand %p4572_p7, %p4569_p6 }
  0x75   :  { %4577 = shalt.err (!%p4574_p8)
}
  0x76   :  { %s4578_s11 = scalar_lea.vmem %s34_s17, 4096  ;;  %p4583_p10 = scmp.lt.s32.totalorder %s34_s17, %s34_s17 }
  0x77   :  { %p4579_p9 = scmp.ne.s32.totalorder %s34_s17, %s4578_s11  ;;  %p4584_p11 = scmp.lt.s32.totalorder %s4578_s11, %s4578_s11 }
  0x79   :  { %p4585_p12 = por %p4584_p11, %p4583_p10 }
  0x7b   :  { %p4586_p13 = pnand %p4585_p12, %p4579_p9 }
  0x7d   :  { %4589 = shalt.err (!%p4586_p13)
}
  0x7e   :  { %39 = dma.hbm_to_vmem [thread:$0]  %s6718_s0, 4096, %s34_s17, [#allocation3], %s4786_s25, %s4786_s25, %s4787_s26  }
  0x7f   :  { %s4590_s24 = scalar_lea.hbm %s6720_s2, 16 }
  0x80   :  { %p4591_p0 = scmp.ne.s32.totalorder %s6720_s2, %s4590_s24  ;;  %p4594_p1 = scmp.lt.u32.totalorder %s4590_s24, %s6720_s2 }
  0x82   :  { %p4596_p2 = pnand %p4594_p1, %p4591_p0 }
  0x84   :  { %4599 = shalt.err (!%p4596_p2)
}
  0x85   :  { %s4600_s18 = scalar_lea.vmem %s59_s7, 16  ;;  %s4604_s29 = scalar_lea.vmem %s59_s7, 32 }
  0x86   :  { %p4601_p3 = scmp.ne.s32.totalorder %s59_s7, %s4600_s18  ;;  %p4605_p4 = scmp.lt.s32.totalorder %s59_s7, %s59_s7 }
  0x87   :  { %p4606_p5 = scmp.lt.s32.totalorder %s4604_s29, %s4600_s18 }
  0x89   :  { %p4607_p6 = por %p4606_p5, %p4605_p4 }
  0x8b   :  { %p4608_p7 = pnand %p4607_p6, %p4601_p3 }
  0x8d   :  { %4611 = shalt.err (!%p4608_p7)
}
  0x8e   :  { %61 = dma.hbm_to_vmem [thread:$0]  %s6720_s2, 16, %s59_s7, [#allocation6]  }
  0x8f   :  { %s4794_s19 = smov [#allocation10]   ;;  %s4795_s21 = smov [#allocation13]  }
  0x90   :  { %s77_s20 = sshll.u32 %s4794_s19, 4  ;;  %s99_s5 = sshll.u32 %s4795_s21, 4  ;;  %s78_s20 = int_to_ptr.vmem [resolvable:$true] %s77_s20  ;;  %s4987_s5 = int_to_ptr.vmem [resolvable:$true] %s99_s5 }
  0x91   :  { %s4612_s11 = scalar_lea.hbm %s6722_s4, 512 }
  0x92   :  { %p4613_p8 = scmp.ne.s32.totalorder %s6722_s4, %s4612_s11  ;;  %p4616_p9 = scmp.lt.u32.totalorder %s4612_s11, %s6722_s4 }
  0x94   :  { %p4618_p10 = pnand %p4616_p9, %p4613_p8 }
  0x96   :  { %4621 = shalt.err (!%p4618_p10)
}
  0x97   :  { %s4622_s2 = scalar_lea.vmem %s78_s20, 512  ;;  %p4627_p12 = scmp.lt.s32.totalorder %s78_s20, %s78_s20 }
  0x98   :  { %p4623_p11 = scmp.ne.s32.totalorder %s78_s20, %s4622_s2  ;;  %p4628_p13 = scmp.lt.s32.totalorder %s4622_s2, %s4622_s2 }
  0x9a   :  { %p4629_p0 = por %p4628_p13, %p4627_p12 }
  0x9c   :  { %p4630_p1 = pnand %p4629_p0, %p4623_p11 }
  0x9e   :  { %4633 = shalt.err (!%p4630_p1)
}
  0x9f   :  { %83 = dma.hbm_to_vmem [thread:$0]  %s6722_s4, 512, %s78_s20, [#allocation9], %s4786_s25, %s4786_s25, %s4787_s26  }
  0xa0   :  { %s4634_s3 = scalar_lea.hbm %s6724_s6, 512 }
  0xa1   :  { %p4635_p2 = scmp.ne.s32.totalorder %s6724_s6, %s4634_s3  ;;  %p4638_p3 = scmp.lt.u32.totalorder %s4634_s3, %s6724_s6 }
  0xa3   :  { %p4640_p4 = pnand %p4638_p3, %p4635_p2 }
  0xa5   :  { %4643 = shalt.err (!%p4640_p4)
}
  0xa6   :  { %s4644_s17 = scalar_lea.vmem %s4987_s5, 512  ;;  %p4649_p6 = scmp.lt.s32.totalorder %s4987_s5, %s4987_s5 }
  0xa7   :  { %p4645_p5 = scmp.ne.s32.totalorder %s4987_s5, %s4644_s17  ;;  %p4650_p7 = scmp.lt.s32.totalorder %s4644_s17, %s4644_s17 }
  0xa9   :  { %p4651_p8 = por %p4650_p7, %p4649_p6 }
  0xab   :  { %p4652_p9 = pnand %p4651_p8, %p4645_p5 }
  0xad   :  { %4655 = shalt.err (!%p4652_p9)
}
  0xae   :  { %105 = dma.hbm_to_vmem [thread:$0]  %s6724_s6, 512, %s4987_s5, [#allocation12], %s4786_s25, %s4786_s25, %s4787_s26  }
  0xaf   :  { %s4796_s20 = smov [#allocation16]   ;;  %s4797_s27 = smov [#allocation19]  }
  0xb0   :  { %s121_s21 = sshll.u32 %s4796_s20, 4  ;;  %s143_s22 = sshll.u32 %s4797_s27, 4  ;;  %s122_s21 = int_to_ptr.vmem [resolvable:$true] %s121_s21  ;;  %s5024_s22 = int_to_ptr.vmem [resolvable:$true] %s143_s22 }
  0xb1   :  { %s4656_s16 = scalar_lea.hbm %s6726_s8, 512 }
  0xb2   :  { %p4657_p10 = scmp.ne.s32.totalorder %s6726_s8, %s4656_s16  ;;  %p4660_p11 = scmp.lt.u32.totalorder %s4656_s16, %s6726_s8 }
  0xb4   :  { %p4662_p12 = pnand %p4660_p11, %p4657_p10 }
  0xb6   :  { %4665 = shalt.err (!%p4662_p12)
}
  0xb7   :  { %s4666_s6 = scalar_lea.vmem %s122_s21, 512  ;;  %p4671_p0 = scmp.lt.s32.totalorder %s122_s21, %s122_s21 }
  0xb8   :  { %p4667_p13 = scmp.ne.s32.totalorder %s122_s21, %s4666_s6  ;;  %p4672_p1 = scmp.lt.s32.totalorder %s4666_s6, %s4666_s6 }
  0xba   :  { %p4673_p2 = por %p4672_p1, %p4671_p0 }
  0xbc   :  { %p4674_p3 = pnand %p4673_p2, %p4667_p13 }
  0xbe   :  { %4677 = shalt.err (!%p4674_p3)
}
  0xbf   :  { %127 = dma.hbm_to_vmem [thread:$0]  %s6726_s8, 512, %s122_s21, [#allocation15], %s4786_s25, %s4786_s25, %s4787_s26  }
  0xc0   :  { %s4678_s3 = scalar_lea.hbm %s6728_s10, 512 }
  0xc1   :  { %p4679_p4 = scmp.ne.s32.totalorder %s6728_s10, %s4678_s3  ;;  %p4682_p5 = scmp.lt.u32.totalorder %s4678_s3, %s6728_s10 }
  0xc3   :  { %p4684_p6 = pnand %p4682_p5, %p4679_p4 }
  0xc5   :  { %4687 = shalt.err (!%p4684_p6)
}
  0xc6   :  { %s4688_s17 = scalar_lea.vmem %s5024_s22, 512  ;;  %p4693_p8 = scmp.lt.s32.totalorder %s5024_s22, %s5024_s22 }
  0xc7   :  { %p4689_p7 = scmp.ne.s32.totalorder %s5024_s22, %s4688_s17  ;;  %p4694_p9 = scmp.lt.s32.totalorder %s4688_s17, %s4688_s17 }
  0xc9   :  { %p4695_p10 = por %p4694_p9, %p4693_p8 }
  0xcb   :  { %p4696_p11 = pnand %p4695_p10, %p4689_p7 }
  0xcd   :  { %4699 = shalt.err (!%p4696_p11)
}
  0xce   :  { %149 = dma.hbm_to_vmem [thread:$0]  %s6728_s10, 512, %s5024_s22, [#allocation18], %s4786_s25, %s4786_s25, %s4787_s26  }
  0xcf   :  { %s4798_s19 = smov [#allocation22]   ;;  %s4799_s21 = smov [#allocation23]  }
  0xd0   :  { %s165_s20 = sshll.u32 %s4798_s19, 4  ;;  %s177_s27 = sshll.u32 %s4799_s21, 4  ;;  %s166_s20 = int_to_ptr.vmem [resolvable:$true] %s165_s20  ;;  %s5061_s27 = int_to_ptr.vmem [resolvable:$true] %s177_s27 }
  0xd1   :  { %s4700_s16 = scalar_lea.hbm %s6730_s12, 512 }
  0xd2   :  { %p4701_p12 = scmp.ne.s32.totalorder %s6730_s12, %s4700_s16  ;;  %p4704_p13 = scmp.lt.u32.totalorder %s4700_s16, %s6730_s12 }
  0xd4   :  { %p4706_p0 = pnand %p4704_p13, %p4701_p12 }
  0xd6   :  { %4709 = shalt.err (!%p4706_p0)
}
  0xd7   :  { %s4710_s10 = scalar_lea.vmem %s166_s20, 512  ;;  %p4715_p2 = scmp.lt.s32.totalorder %s166_s20, %s166_s20 }
  0xd8   :  { %p4711_p1 = scmp.ne.s32.totalorder %s166_s20, %s4710_s10  ;;  %p4716_p3 = scmp.lt.s32.totalorder %s4710_s10, %s4710_s10 }
  0xda   :  { %p4717_p4 = por %p4716_p3, %p4715_p2 }
  0xdc   :  { %p4718_p5 = pnand %p4717_p4, %p4711_p1 }
  0xde   :  { %4721 = shalt.err (!%p4718_p5)
}
  0xdf   :  { %171 = dma.hbm_to_vmem [thread:$0]  %s6730_s12, 512, %s166_s20, [#allocation21], %s4786_s25, %s4786_s25, %s4787_s26  }
  0xe0   :  { %s4722_s28 = scalar_lea.hbm %s6731_s13, 2048 }
  0xe1   :  { %p4723_p6 = scmp.ne.s32.totalorder %s6731_s13, %s4722_s28  ;;  %p4726_p7 = scmp.lt.u32.totalorder %s4722_s28, %s6731_s13 }
  0xe3   :  { %p4728_p8 = pnand %p4726_p7, %p4723_p6 }
  0xe5   :  { %4731 = shalt.err (!%p4728_p8)
}
  0xe6   :  { %s4732_s29 = scalar_lea.vmem %s5061_s27, 2048  ;;  %p4737_p10 = scmp.lt.s32.totalorder %s5061_s27, %s5061_s27 }
  0xe7   :  { %p4733_p9 = scmp.ne.s32.totalorder %s5061_s27, %s4732_s29  ;;  %p4738_p11 = scmp.lt.s32.totalorder %s4732_s29, %s4732_s29 }
  0xe9   :  { %p4739_p12 = por %p4738_p11, %p4737_p10 }
  0xeb   :  { %p4740_p13 = pnand %p4739_p12, %p4733_p9 }
  0xed   :  { %4743 = shalt.err (!%p4740_p13)
}
  0xee   :  { %183 = dma.hbm_to_vmem [thread:$0]  %s6731_s13, 2048, %s5061_s27, [#allocation24], %s4786_s25, %s4786_s25, %s4787_s26  }
  0xef   :  { %4766 = dma.done.wait [#allocation3], 4096  }
  0xf0   :  { %4767 = vsyncadd [#allocation3], 4294963200 }
  0xf1   :  { %4768 = dma.done.wait [#allocation6], 272  }
  0xf2   :  { %4769 = vsyncadd [#allocation6], 4294967024 }
  0xf3   :  { %4770 = dma.done.wait [#allocation9], 528  }
  0xf4   :  { %4771 = vsyncadd [#allocation9], 4294966768 }
  0xf5   :  { %4772 = dma.done.wait [#allocation12], 528  }
  0xf6   :  { %4773 = vsyncadd [#allocation12], 4294966768 }
  0xf7   :  { %4774 = dma.done.wait [#allocation15], 528  }
  0xf8   :  { %4775 = vsyncadd [#allocation15], 4294966768 }
  0xf9   :  { %4776 = dma.done.wait [#allocation18], 528  }
  0xfa   :  { %4777 = vsyncadd [#allocation18], 4294966768 }
  0xfb   :  { %4778 = dma.done.wait [#allocation21], 528  }
  0xfc   :  { %4779 = vsyncadd [#allocation21], 4294966768 }
  0xfd   :  { %4780 = dma.done.wait [#allocation24], 2048  }
  0xfe   :  { %4781 = vsyncadd [#allocation24], 4294965248  ;;  %vm264_vm0 = vcmask 261120   ;;  %v585_v0 = vld [vmem:[#allocation13] sm:$0xff]  ;;  %v586_v1 = vld [vmem:[#allocation13 + $0x8] sm:$0xff]  ;;  %vm453_vm1 = vcmask 1041409  }
  0xff   :  { %v587_v2 = vld [vmem:[#allocation13 + $0x10] sm:$0xff]  ;;  %v4206_v3 = vpack.c.bf16 %v586_v1, %v585_v0  ;;  %v588_v4 = vld [vmem:[#allocation13 + $0x18] sm:$0xff]  ;;  %v229_v17 = vld [vmem:[#allocation2 + $0x18] sm:$0xff]  ;;  %vm455_vm2 = vcmask 1042434   ;;  %vm457_vm3 = vcmask 1043459   ;;  %vm459_vm4 = vcmask 1044484  }
 0x100   :  { %v226_v5 = vld [vmem:[#allocation2] sm:$0xff]  ;;  %v227_v6 = vld [vmem:[#allocation2 + $0x8] sm:$0xff]  ;;  %v4210_v7 = vpack.c.bf16 %v588_v4, %v587_v2  ;;  %v228_v12 = vld [vmem:[#allocation2 + $0x10] sm:$0xff]  ;;  %v275_v21 = vsel %vm264_vm0, %v229_v17, 0.0  ;;  %vm461_vm5 = vcmask 1045509   ;;  %vm463_vm6 = vcmask 1046534  }
 0x101   :  { %v5098_v8 = vld [vmem:[#allocation5] sm:$0xff]  ;;  %v265_v9 = vsel %vm264_vm0, %v226_v5, 0.0  ;;  %v266_v10 = vsel %vm264_vm0, %v227_v6, 0.0  ;;  %v5102_v11 = vld [vmem:[#allocation5 + $0x8] sm:$0xff]  ;;  %4207 = vmatprep.subr.bf16.mxu1 %v4206_v3  ;;  %v274_v16 = vsel %vm264_vm0, %v228_v12, 0.0  ;;  %v426_v18 = vld [vmem:[#allocation10] sm:$0xff] }
 0x102   :  { %v267_v13 = vadd.f32 %v266_v10, %v265_v9  ;;  %v5105_v14 = vadd.f32 %v5098_v8, %v226_v5  ;;  %v5108_v15 = vadd.f32 %v5102_v11, %v227_v6  ;;  %v427_v19 = vld [vmem:[#allocation10 + $0x8] sm:$0xff]  ;;  %4209 = vmatpush3.bf16.msra.mxu1 %v4206_v3  ;;  %v5112_v20 = vadd.f32 %v5098_v8, %v228_v12  ;;  %v231_v25 = vld [vmem:[#allocation2 + $0x28] sm:$0xff]  ;;  %v232_v32 = vld [vmem:[#allocation2 + $0x30] sm:$0xff]  ;;  %s4801_s13 = smov [#allocation25]  }
 0x103   :  { %v5116_v22 = vadd.f32 %v5102_v11, %v229_v17  ;;  %v4198_v23 = vpack.c.bf16 %v427_v19, %v426_v18  ;;  %v230_v24 = vld [vmem:[#allocation2 + $0x20] sm:$0xff]  ;;  %4211 = vmatprep.subr.bf16.mxu1 %v4210_v7  ;;  %v276_v28 = vadd.f32 %v275_v21, %v274_v16  ;;  %v429_v31 = vld [vmem:[#allocation10 + $0x18] sm:$0xff]  ;;  %v233_v33 = vld [vmem:[#allocation2 + $0x38] sm:$0xff]  ;;  %v284_v34 = vsel %vm264_vm0, %v231_v25, 0.0  ;;  %s3510_s17 = sshll.u32 %s4801_s13, 4  ;;  %s3511_s17 = int_to_ptr.vmem [resolvable:$true] %s3510_s17 }
 0x104   :  { %6810 = vst [vmem:[#allocation35_spill] sm:$0xff] %v5108_v15  ;;  %6811 = vst [vmem:[#allocation36_spill] sm:$0xff] %v5112_v20  ;;  %v428_v26 = vld [vmem:[#allocation10 + $0x10] sm:$0xff]  ;;  %v268_v27 = vrot.slane %v267_v13, 4  ;;  %3866 = vmatprep.mubr.msk.f32.mxu1 %vm264_vm0, %v5105_v14  ;;  %v283_v29 = vsel %vm264_vm0, %v230_v24, 0.0  ;;  %v5122_v30 = vadd.f32 %v5098_v8, %v230_v24  ;;  %v5126_v35 = vadd.f32 %v5102_v11, %v231_v25  ;;  %v5136_v44 = vld [vmem:[#allocation2 + $0x50] sm:$0xff]  ;;  %p4749_p1 = scmp.lt.s32.totalorder %s3511_s17, %s3511_s17 }
 0x105   :  { %6812 = vst [vmem:[#allocation37_spill] sm:$0xff] %v5116_v22  ;;  %4199 = vmatprep.subr.bf16.mxu0 %v4198_v23  ;;  %v4202_v36 = vpack.c.bf16 %v429_v31, %v428_v26  ;;  %v292_v37 = vsel %vm264_vm0, %v232_v32, 0.0  ;;  %v5129_v38 = vld [vmem:[#allocation2 + $0x40] sm:$0xff]  ;;  %v5131_v39 = vld [vmem:[#allocation2 + $0x48] sm:$0xff]  ;;  %v277_v41 = vrot.slane %v276_v28, 4  ;;  %v285_v42 = vadd.f32 %v284_v34, %v283_v29  ;;  %v5138_v45 = vld [vmem:[#allocation2 + $0x58] sm:$0xff] }
 0x106   :  { %6813 = vst [vmem:[#allocation38_spill] sm:$0xff] %v5122_v30  ;;  %6814 = vst [vmem:[#allocation39_spill] sm:$0xff] %v5126_v35  ;;  %v269_v40 = vadd.f32 %v268_v27, %v267_v13  ;;  %4201 = vmatpush3.bf16.msra.mxu0 %v4198_v23  ;;  %v5134_v43 = vadd.f32 %v5098_v8, %v232_v32  ;;  %v5140_v46 = vld [vmem:[#allocation2 + $0x60] sm:$0xff]  ;;  %4213 = vmatpush3.bf16.msra.mxu1 %v4210_v7  ;;  %v293_v47 = vsel %vm264_vm0, %v233_v33, 0.0  ;;  %v5150_v55 = vld [vmem:[#allocation2 + $0x68] sm:$0xff]  ;;  %vm465_vm7 = vcmask 1047559  }
 0x107   :  { %4203 = vmatprep.subr.bf16.mxu0 %v4202_v36  ;;  %v5144_v48 = vadd.f32 %v5102_v11, %v233_v33  ;;  %v301_v49 = vsel %vm264_vm0, %v5129_v38, 0.0  ;;  %v302_v50 = vsel %vm264_vm0, %v5131_v39, 0.0  ;;  %v278_v52 = vadd.f32 %v277_v41, %v276_v28  ;;  %v5152_v56 = vld [vmem:[#allocation2 + $0x70] sm:$0xff]  ;;  %v5162_v1 = vld [vmem:[#allocation2 + $0x78] sm:$0xff]  ;;  %v5176_v28 = vld [vmem:[#allocation2 + $0x80] sm:$0xff]  ;;  %s4744_s8 = scalar_lea.vmem %s3511_s17, 256 }
 0x108   :  { %6815 = vst [vmem:[#allocation40_spill] sm:$0xff] %v5134_v43  ;;  %v270_v51 = vrot.slane %v269_v40, 2  ;;  %v286_v53 = vrot.slane %v285_v42, 4  ;;  %v294_v54 = vadd.f32 %v293_v47, %v292_v37  ;;  %v303_v57 = vadd.f32 %v302_v50, %v301_v49  ;;  %v5178_v41 = vld [vmem:[#allocation2 + $0x88] sm:$0xff]  ;;  %p4745_p0 = scmp.ne.s32.totalorder %s3511_s17, %s4744_s8  ;;  %p4750_p2 = scmp.lt.s32.totalorder %s4744_s8, %s4744_s8 }
 0x109   :  { %6816 = vst [vmem:[#allocation41_spill] sm:$0xff] %v5144_v48  ;;  %v310_v58 = vsel %vm264_vm0, %v5136_v44, 0.0  ;;  %v311_v59 = vsel %vm264_vm0, %v5138_v45, 0.0  ;;  %v319_v60 = vsel %vm264_vm0, %v5140_v46, 0.0  ;;  %3867 = vmatmul.mubr.msk.f32.vlgmr.msra.gmra.mrb[0].mxu1 %vm264_vm0, %v5108_v15  ;;  %v279_v62 = vrot.slane %v278_v52, 2 }
 0x10a   :  { %v271_v61 = vadd.f32 %v270_v51, %v269_v40  ;;  %v287_v63 = vadd.f32 %v286_v53, %v285_v42  ;;  %4205 = vmatpush3.bf16.msra.mxu0 %v4202_v36  ;;  %v295_v0 = vrot.slane %v294_v54, 4  ;;  %3869 = vmatprep.mubr.msk.f32.mxu1 %vm264_vm0, %v5112_v20  ;;  %v304_v2 = vrot.slane %v303_v57, 4  ;;  %p4751_p3 = por %p4750_p2, %p4749_p1 }
 0x10b   :  { %v312_v3 = vadd.f32 %v311_v59, %v310_v58  ;;  %v320_v4 = vsel %vm264_vm0, %v5150_v55, 0.0  ;;  %v328_v5 = vsel %vm264_vm0, %v5152_v56, 0.0  ;;  %v280_v7 = vadd.f32 %v279_v62, %v278_v52 }
 0x10c   :  { %v272_v6 = vrot.slane %v271_v61, 1  ;;  %v288_v9 = vrot.slane %v287_v63, 2  ;;  %v296_v10 = vadd.f32 %v295_v0, %v294_v54  ;;  %v305_v12 = vadd.f32 %v304_v2, %v303_v57  ;;  %v5186_v57 = vld [vmem:[#allocation2 + $0x90] sm:$0xff]  ;;  %p4752_p4 = pnand %p4751_p3, %p4745_p0 }
 0x10d   :  { %v313_v13 = vrot.slane %v312_v3, 4  ;;  %v321_v16 = vadd.f32 %v320_v4, %v319_v60  ;;  %v329_v17 = vsel %vm264_vm0, %v5162_v1, 0.0  ;;  %v281_v19 = vrot.slane %v280_v7, 1  ;;  %3870 = vmatmul.mubr.msk.f32.gmra.mrb[2].mxu1 %vm264_vm0, %v5116_v22  ;;  %v5193_v4 = vld [vmem:[#allocation2 + $0xa0] sm:$0xff] }
 0x10e   :  { %v273_v18 = vadd.f32 %v272_v6, %v271_v61  ;;  %v289_v21 = vadd.f32 %v288_v9, %v287_v63  ;;  %v297_v23 = vrot.slane %v296_v10, 2  ;;  %3872 = vmatprep.mubr.msk.f32.mxu1 %vm264_vm0, %v5122_v30  ;;  %v306_v24 = vrot.slane %v305_v12, 2 }
 0x10f   :  { %v314_v25 = vadd.f32 %v313_v13, %v312_v3  ;;  %v322_v26 = vrot.slane %v321_v16, 4  ;;  %v330_v27 = vadd.f32 %v329_v17, %v328_v5  ;;  %v282_v31 = vadd.f32 %v281_v19, %v280_v7  ;;  %v5191_v3 = vld [vmem:[#allocation2 + $0x98] sm:$0xff]  ;;  %v5200_v17 = vld [vmem:[#allocation2 + $0xa8] sm:$0xff] }
 0x110   :  { %v410_v29 = vmul.f32 0.0625, %v273_v18  ;;  %v290_v32 = vrot.slane %v289_v21, 1  ;;  %v298_v33 = vadd.f32 %v297_v23, %v296_v10  ;;  %v307_v34 = vadd.f32 %v306_v24, %v305_v12  ;;  %v5202_v18 = vld [vmem:[#allocation2 + $0xb0] sm:$0xff] }
 0x111   :  { %v315_v36 = vrot.slane %v314_v25, 2  ;;  %v323_v37 = vadd.f32 %v322_v26, %v321_v16  ;;  %v331_v40 = vrot.slane %v330_v27, 4  ;;  %v411_v42 = vmul.f32 0.0625, %v282_v31  ;;  %3873 = vmatmul.mubr.msk.f32.gmra.mrb[4].mxu1 %vm264_vm0, %v5126_v35  ;;  %v5210_v31 = vld [vmem:[#allocation2 + $0xb8] sm:$0xff] }
 0x112   :  { %v291_v47 = vadd.f32 %v290_v32, %v289_v21  ;;  %v299_v49 = vrot.slane %v298_v33, 1  ;;  %v337_v50 = vsel %vm264_vm0, %v5176_v28, 0.0  ;;  %3875 = vmatprep.mubr.msk.f32.mxu1 %vm264_vm0, %v5134_v43  ;;  %v308_v51 = vrot.slane %v307_v34, 1  ;;  %v5212_v32 = vld [vmem:[#allocation2 + $0xc0] sm:$0xff] }
 0x113   :  { %v316_v52 = vadd.f32 %v315_v36, %v314_v25  ;;  %v324_v53 = vrot.slane %v323_v37, 2  ;;  %v332_v54 = vadd.f32 %v331_v40, %v330_v27  ;;  %v454_v60 = vsel %vm453_vm1, %v411_v42, %v410_v29 }
 0x114   :  { %v300_v58 = vadd.f32 %v299_v49, %v298_v33  ;;  %v412_v59 = vmul.f32 0.0625, %v291_v47  ;;  %v338_v61 = vsel %vm264_vm0, %v5178_v41, 0.0  ;;  %v309_v62 = vadd.f32 %v308_v51, %v307_v34  ;;  %v5219_v49 = vld [vmem:[#allocation2 + $0xc8] sm:$0xff] }
 0x115   :  { %v317_v63 = vrot.slane %v316_v52, 1  ;;  %v325_v0 = vadd.f32 %v324_v53, %v323_v37  ;;  %v333_v2 = vrot.slane %v332_v54, 2  ;;  %3876 = vmatmul.mubr.msk.f32.gmra.mrb[6].mxu1 %vm264_vm0, %v5144_v48  ;;  %v339_v7 = vadd.f32 %v338_v61, %v337_v50  ;;  %v5221_v50 = vld [vmem:[#allocation2 + $0xd0] sm:$0xff]  ;;  %v5228_v61 = vld [vmem:[#allocation2 + $0xd8] sm:$0xff] }
 0x116   :  { %v413_v5 = vmul.f32 0.0625, %v300_v58  ;;  %v456_v6 = vsel %vm455_vm2, %v412_v59, %v454_v60  ;;  %v346_v9 = vsel %vm264_vm0, %v5186_v57, 0.0  ;;  %v414_v16 = vmul.f32 0.0625, %v309_v62  ;;  %v5230_v62 = vld [vmem:[#allocation2 + $0xe0] sm:$0xff] }
 0x117   :  { %v318_v10 = vadd.f32 %v317_v63, %v316_v52  ;;  %v326_v12 = vrot.slane %v325_v0, 1  ;;  %v334_v13 = vadd.f32 %v333_v2, %v332_v54  ;;  %v340_v21 = vrot.slane %v339_v7, 4 }
 0x118   :  { %v458_v19 = vsel %vm457_vm3, %v413_v5, %v456_v6  ;;  %v347_v23 = vsel %vm264_vm0, %v5191_v3, 0.0  ;;  %v355_v24 = vsel %vm264_vm0, %v5193_v4, 0.0  ;;  %v356_v36 = vsel %vm264_vm0, %v5200_v17, 0.0 }
 0x119   :  { %v327_v25 = vadd.f32 %v326_v12, %v325_v0  ;;  %v335_v26 = vrot.slane %v334_v13, 1  ;;  %v415_v27 = vmul.f32 0.0625, %v318_v10  ;;  %v460_v29 = vsel %vm459_vm4, %v414_v16, %v458_v19  ;;  %v5237_v10 = vld [vmem:[#allocation2 + $0xe8] sm:$0xff]  ;;  %v5239_v12 = vld [vmem:[#allocation2 + $0xf0] sm:$0xff] }
 0x11a   :  { %v341_v33 = vadd.f32 %v340_v21, %v339_v7  ;;  %v348_v34 = vadd.f32 %v347_v23, %v346_v9  ;;  %v364_v37 = vsel %vm264_vm0, %v5202_v18, 0.0  ;;  %v357_v51 = vadd.f32 %v356_v36, %v355_v24 }
 0x11b   :  { %v336_v40 = vadd.f32 %v335_v26, %v334_v13  ;;  %v416_v42 = vmul.f32 0.0625, %v327_v25  ;;  %v462_v47 = vsel %vm461_vm5, %v415_v27, %v460_v29  ;;  %v365_v54 = vsel %vm264_vm0, %v5210_v31, 0.0  ;;  %v5246_v26 = vld [vmem:[#allocation2 + $0xf8] sm:$0xff] }
 0x11c   :  { %v342_v52 = vrot.slane %v341_v33, 2  ;;  %v349_v53 = vrot.slane %v348_v34, 4  ;;  %v373_v58 = vsel %vm264_vm0, %v5212_v32, 0.0  ;;  %v358_v63 = vrot.slane %v357_v51, 4 }
 0x11d   :  { %v417_v59 = vmul.f32 0.0625, %v336_v40  ;;  %v464_v60 = vsel %vm463_vm6, %v416_v42, %v462_v47  ;;  %v366_v0 = vadd.f32 %v365_v54, %v364_v37  ;;  %v374_v6 = vsel %vm264_vm0, %v5219_v49, 0.0 }
 0x11e   :  { %v343_v2 = vadd.f32 %v342_v52, %v341_v33  ;;  %v350_v5 = vadd.f32 %v349_v53, %v348_v34  ;;  %v382_v7 = vsel %vm264_vm0, %v5221_v50, 0.0  ;;  %v359_v13 = vadd.f32 %v358_v63, %v357_v51 }
 0x11f   :  { %v466_v9 = vsel %vm465_vm7, %v417_v59, %v464_v60  ;;  %v367_v16 = vrot.slane %v366_v0, 4  ;;  %v375_v19 = vadd.f32 %v374_v6, %v373_v58  ;;  %v383_v24 = vsel %vm264_vm0, %v5228_v61, 0.0 }
 0x120   :  { %3855 = vmatprep.mubr.msk.f32.mxu0 %vm264_vm0, %v466_v9  ;;  %v344_v21 = vrot.slane %v343_v2, 1  ;;  %v351_v23 = vrot.slane %v350_v5, 2  ;;  %v391_v25 = vsel %vm264_vm0, %v5230_v62, 0.0  ;;  %v360_v27 = vrot.slane %v359_v13, 2 }
 0x121   :  { %v368_v29 = vadd.f32 %v367_v16, %v366_v0  ;;  %v376_v33 = vrot.slane %v375_v19, 4  ;;  %v384_v34 = vadd.f32 %v383_v24, %v382_v7  ;;  %v392_v40 = vsel %vm264_vm0, %v5237_v10, 0.0 }
 0x122   :  { %v345_v36 = vadd.f32 %v344_v21, %v343_v2  ;;  %v352_v37 = vadd.f32 %v351_v23, %v350_v5  ;;  %v400_v42 = vsel %vm264_vm0, %v5239_v12, 0.0  ;;  %v361_v47 = vadd.f32 %v360_v27, %v359_v13 }
 0x123   :  { %v369_v51 = vrot.slane %v368_v29, 2  ;;  %v377_v52 = vadd.f32 %v376_v33, %v375_v19  ;;  %v385_v53 = vrot.slane %v384_v34, 4  ;;  %v393_v58 = vadd.f32 %v392_v40, %v391_v25 }
 0x124   :  { %v353_v54 = vrot.slane %v352_v37, 1  ;;  %v401_v59 = vsel %vm264_vm0, %v5246_v26, 0.0  ;;  %v418_v60 = vmul.f32 0.0625, %v345_v36  ;;  %v362_v63 = vrot.slane %v361_v47, 1 }
 0x125   :  { %v370_v0 = vadd.f32 %v369_v51, %v368_v29  ;;  %v378_v2 = vrot.slane %v377_v52, 2  ;;  %v386_v5 = vadd.f32 %v385_v53, %v384_v34  ;;  %v394_v7 = vrot.slane %v393_v58, 4 }
 0x126   :  { %v354_v6 = vadd.f32 %v353_v54, %v352_v37  ;;  %v402_v9 = vadd.f32 %v401_v59, %v400_v42  ;;  %v5256_v16 = vadd.f32 %v5098_v8, %v5129_v38  ;;  %v363_v13 = vadd.f32 %v362_v63, %v361_v47 }
 0x127   :  { %v371_v19 = vrot.slane %v370_v0, 1  ;;  %v379_v21 = vadd.f32 %v378_v2, %v377_v52  ;;  %v387_v23 = vrot.slane %v386_v5, 2  ;;  %v395_v24 = vadd.f32 %v394_v7, %v393_v58 }
 0x128   :  { %6817 = vst [vmem:[#allocation42_spill] sm:$0xff] %v5256_v16  ;;  %v403_v25 = vrot.slane %v402_v9, 4  ;;  %v419_v27 = vmul.f32 0.0625, %v354_v6  ;;  %3878 = vmatprep.mubr.msk.f32.mxu1 %vm264_vm0, %v5256_v16  ;;  %v5262_v29 = vadd.f32 %v5102_v11, %v5131_v39  ;;  %v420_v37 = vmul.f32 0.0625, %v363_v13 }
 0x129   :  { %v372_v33 = vadd.f32 %v371_v19, %v370_v0  ;;  %v380_v34 = vrot.slane %v379_v21, 1  ;;  %v388_v36 = vadd.f32 %v387_v23, %v386_v5  ;;  %v396_v38 = vrot.slane %v395_v24, 2 }
 0x12a   :  { %6818 = vst [vmem:[#allocation43_spill] sm:$0xff] %v5262_v29  ;;  %v404_v40 = vadd.f32 %v403_v25, %v402_v9  ;;  %v467_v42 = vsel %vm453_vm1, %v419_v27, %v418_v60  ;;  %3879 = vmatmul.mubr.msk.f32.gmra.mrb[8].mxu1 %vm264_vm0, %v5262_v29  ;;  %v5269_v47 = vadd.f32 %v5098_v8, %v5136_v44  ;;  %vm3502_vm8 = vcmask 130048  }
 0x12b   :  { %v381_v51 = vadd.f32 %v380_v34, %v379_v21  ;;  %v389_v52 = vrot.slane %v388_v36, 1  ;;  %v421_v53 = vmul.f32 0.0625, %v372_v33  ;;  %v468_v39 = vsel %vm455_vm2, %v420_v37, %v467_v42  ;;  %v261_v34 = vld [vmem:[#allocation22 + $0x8] sm:$0xff] }
 0x12c   :  { %6819 = vst [vmem:[#allocation44_spill] sm:$0xff] %v5269_v47  ;;  %v397_v54 = vadd.f32 %v396_v38, %v395_v24  ;;  %v405_v58 = vrot.slane %v404_v40, 2  ;;  %3881 = vmatprep.mubr.msk.f32.mxu1 %vm264_vm0, %v5269_v47  ;;  %v5276_v59 = vadd.f32 %v5102_v11, %v5138_v45  ;;  %v5280_v60 = vadd.f32 %v5098_v8, %v5140_v46 }
 0x12d   :  { %v390_v44 = vadd.f32 %v389_v52, %v388_v36  ;;  %v422_v63 = vmul.f32 0.0625, %v381_v51  ;;  %v469_v0 = vsel %vm457_vm3, %v421_v53, %v468_v39  ;;  %v5287_v6 = vadd.f32 %v5102_v11, %v5150_v55 }
 0x12e   :  { %6820 = vst [vmem:[#allocation45_spill] sm:$0xff] %v5276_v59  ;;  %6821 = vst [vmem:[#allocation46_spill] sm:$0xff] %v5280_v60  ;;  %v398_v2 = vrot.slane %v397_v54, 1  ;;  %v406_v5 = vadd.f32 %v405_v58, %v404_v40  ;;  %3882 = vmatmul.mubr.msk.f32.gmra.mrb[10].mxu1 %vm264_vm0, %v5276_v59  ;;  %v5294_v46 = vadd.f32 %v5098_v8, %v5152_v56 }
 0x12f   :  { %6822 = vst [vmem:[#allocation47_spill] sm:$0xff] %v5287_v6  ;;  %v423_v7 = vmul.f32 0.0625, %v390_v44  ;;  %v470_v45 = vsel %vm459_vm4, %v422_v63, %v469_v0  ;;  %3884 = vmatprep.mubr.msk.f32.mxu1 %vm264_vm0, %v5280_v60  ;;  %v5301_v55 = vadd.f32 %v5102_v11, %v5162_v1  ;;  %v5307_v56 = vadd.f32 %v5098_v8, %v5176_v28 }
 0x130   :  { %6823 = vst [vmem:[#allocation48_spill] sm:$0xff] %v5294_v46  ;;  %v399_v9 = vadd.f32 %v398_v2, %v397_v54  ;;  %v407_v13 = vrot.slane %v406_v5, 1  ;;  %v5315_v33 = vadd.f32 %v5102_v11, %v5178_v41  ;;  %v5322_v1 = vadd.f32 %v5098_v8, %v5186_v57 }
 0x131   :  { %v471_v19 = vsel %vm461_vm5, %v423_v7, %v470_v45  ;;  %6824 = vst [vmem:[#allocation49_spill] sm:$0xff] %v5301_v55  ;;  %6825 = vst [vmem:[#allocation50_spill] sm:$0xff] %v5307_v56  ;;  %v5328_v28 = vadd.f32 %v5102_v11, %v5191_v3  ;;  %v5334_v41 = vadd.f32 %v5098_v8, %v5193_v4 }
 0x132   :  { %v408_v21 = vadd.f32 %v407_v13, %v406_v5  ;;  %v424_v23 = vmul.f32 0.0625, %v399_v9  ;;  %3885 = vmatmul.mubr.msk.f32.gmra.mrb[12].mxu1 %vm264_vm0, %v5287_v6  ;;  %6826 = vst [vmem:[#allocation51_spill] sm:$0xff] %v5315_v33  ;;  %6827 = vst [vmem:[#allocation52_spill] sm:$0xff] %v5322_v1  ;;  %v5340_v57 = vadd.f32 %v5102_v11, %v5200_v17 }
 0x133   :  { %3887 = vmatprep.mubr.msk.f32.mxu1 %vm264_vm0, %v5294_v46  ;;  %6828 = vst [vmem:[#allocation53_spill] sm:$0xff] %v5328_v28  ;;  %6829 = vst [vmem:[#allocation54_spill] sm:$0xff] %v5334_v41  ;;  %v5346_v3 = vadd.f32 %v5098_v8, %v5202_v18  ;;  %v5352_v4 = vadd.f32 %v5102_v11, %v5210_v31  ;;  %v5358_v17 = vadd.f32 %v5098_v8, %v5212_v32 }
 0x134   :  { %v425_v24 = vmul.f32 0.0625, %v408_v21  ;;  %v472_v25 = vsel %vm463_vm6, %v424_v23, %v471_v19  ;;  %6830 = vst [vmem:[#allocation55_spill] sm:$0xff] %v5340_v57  ;;  %v5364_v18 = vadd.f32 %v5102_v11, %v5219_v49  ;;  %v5370_v31 = vadd.f32 %v5098_v8, %v5221_v50 }
 0x135   :  { %6831 = vst [vmem:[#allocation56_spill] sm:$0xff] %v5346_v3  ;;  %6832 = vst [vmem:[#allocation57_spill] sm:$0xff] %v5352_v4  ;;  %v5376_v32 = vadd.f32 %v5102_v11, %v5228_v61  ;;  %v5382_v49 = vadd.f32 %v5098_v8, %v5230_v62  ;;  %v5388_v50 = vadd.f32 %v5102_v11, %v5237_v10  ;;  %v260_v10 = vld [vmem:[#allocation22] sm:$0xff] }
 0x136   :  { %v473_v27 = vsel %vm465_vm7, %v425_v24, %v472_v25  ;;  %3888 = vmatmul.mubr.msk.f32.gmra.mrb[14].mxu1 %vm264_vm0, %v5301_v55  ;;  %6833 = vst [vmem:[#allocation58_spill] sm:$0xff] %v5358_v17  ;;  %6834 = vst [vmem:[#allocation59_spill] sm:$0xff] %v5364_v18  ;;  %v5394_v61 = vadd.f32 %v5098_v8, %v5239_v12  ;;  %v5400_v62 = vadd.f32 %v5102_v11, %v5246_v26  ;;  %v262_v8 = vld [vmem:[#allocation22 + $0x10] sm:$0xff]  ;;  %v263_v12 = vld [vmem:[#allocation22 + $0x18] sm:$0xff] }
 0x137   :  { %3856 = vmatmul.mubr.msk.f32.vlgmr.msra.gmra.mrb[0].mxu0 %vm264_vm0, %v473_v27  ;;  %3890 = vmatprep.mubr.msk.f32.mxu1 %vm264_vm0, %v5307_v56  ;;  %6835 = vst [vmem:[#allocation60_spill] sm:$0xff] %v5370_v31  ;;  %6836 = vst [vmem:[#allocation61_spill] sm:$0xff] %v5376_v32  ;;  %v5406_v36 = vpack.c.bf16 %v261_v34, %v260_v10  ;;  %v5412_v11 = vpack.c.bf16 %v263_v12, %v262_v8  ;;  %v5419_v26 = vld [vmem:[#allocation14] ss:$0 sm:$0xff] }
 0x138   :  { %6837 = vst [vmem:[#allocation62_spill] sm:$0xff] %v5382_v49  ;;  %6838 = vst [vmem:[#allocation63_spill] sm:$0xff] %v5388_v50 }
 0x139   :  { %6839 = vst [vmem:[#allocation64_spill] sm:$0xff] %v5394_v61  ;;  %6840 = vst [vmem:[#allocation65_spill] sm:$0xff] %v5400_v62  ;;  %4342 = vmatprep.subr.bf16.mxu1 %v5406_v36  ;;  %4215 = vmatprep.subr.bf16.mxu0 %v5406_v36 }
 0x13a   :  { %3891 = vmatmul.mubr.msk.f32.gmra.mrb[16].mxu1 %vm264_vm0, %v5315_v33  ;;  %4217 = vmatpush3.bf16.msra.mxu0 %v5406_v36 }
 0x13b   :  { %3893 = vmatprep.mubr.msk.f32.mxu1 %vm264_vm0, %v5322_v1  ;;  %4344 = vmatpush3.bf16.msra.mxu1 %v5406_v36 }
 0x13c   :  { %4343 = vmatprep.subr.bf16.mxu1 %v5412_v11  ;;  %4219 = vmatprep.subr.bf16.mxu0 %v5412_v11 }
 0x13e   :  { %3894 = vmatmul.mubr.msk.f32.gmra.mrb[18].mxu1 %vm264_vm0, %v5328_v28  ;;  %4221 = vmatpush3.bf16.msra.mxu0 %v5412_v11 }
 0x13f   :  { %3896 = vmatprep.mubr.msk.f32.mxu1 %vm264_vm0, %v5334_v41  ;;  %4345 = vmatpush3.bf16.msra.mxu1 %v5412_v11 }
 0x140   :  { %4223 = vmatprep.subr.bf16.mxu0 %v5406_v36 }
 0x142   :  { %3897 = vmatmul.mubr.msk.f32.gmra.mrb[20].mxu1 %vm264_vm0, %v5340_v57 }
 0x143   :  { %3899 = vmatprep.mubr.msk.f32.mxu1 %vm264_vm0, %v5346_v3 }
 0x146   :  { %3900 = vmatmul.mubr.msk.f32.gmra.mrb[22].mxu1 %vm264_vm0, %v5352_v4 }
 0x147   :  { %3902 = vmatprep.mubr.msk.f32.mxu1 %vm264_vm0, %v5358_v17 }
 0x14a   :  { %3903 = vmatmul.mubr.msk.f32.gmra.mrb[24].mxu1 %vm264_vm0, %v5364_v18  ;;  %v5496_v18 = vld [vmem:[#allocation11] ss:$0 sm:$0xff] }
 0x14b   :  { %3905 = vmatprep.mubr.msk.f32.mxu1 %vm264_vm0, %v5370_v31 }
 0x14e   :  { %3906 = vmatmul.mubr.msk.f32.gmra.mrb[26].mxu1 %vm264_vm0, %v5376_v32 }
 0x14f   :  { %3908 = vmatprep.mubr.msk.f32.mxu1 %vm264_vm0, %v5382_v49 }
 0x152   :  { %3909 = vmatmul.mubr.msk.f32.gmra.mrb[28].mxu1 %vm264_vm0, %v5388_v50 }
 0x153   :  { %3911 = vmatprep.mubr.msk.f32.mxu1 %vm264_vm0, %v5394_v61 }
 0x156   :  { %3912 = vmatmul.mubr.msk.f32.gmra.mrb[30].mxu1 %vm264_vm0, %v5400_v62 }
 0x1dc   :  { %v3868_v37 = vpop.f32.mrb[0].mxu1 }
 0x1dd   :  { %v5422_v38 = vadd.f32 %v3868_v37, %v5419_v26  ;;  %v758_v40 = vpop.f32.mrb[1].mxu1 }
 0x1de   :  { %v5425_v42 = vadd.f32 %v5419_v26, %v758_v40 }
 0x1df   :  { %v918_v51 = vsel %vm264_vm0, %v5422_v38, 0.0 }
 0x1e0   :  { %v917_v52 = vsel %vm264_vm0, %v5425_v42, 0.0  ;;  %v3871_v53 = vpop.f32.mrb[2].mxu1 }
 0x1e1   :  { %v919_v39 = vadd.f32 %v918_v51, %v917_v52  ;;  %v5432_v54 = vadd.f32 %v3871_v53, %v5419_v26  ;;  %v768_v58 = vpop.f32.mrb[3].mxu1 }
 0x1e2   :  { %v5435_v44 = vadd.f32 %v5419_v26, %v768_v58 }
 0x1e3   :  { %v920_v63 = vrot.slane %v919_v39, 4  ;;  %v927_v0 = vsel %vm264_vm0, %v5432_v54, 0.0 }
 0x1e4   :  { %v926_v2 = vsel %vm264_vm0, %v5435_v44, 0.0  ;;  %v3874_v5 = vpop.f32.mrb[4].mxu1 }
 0x1e5   :  { %v921_v7 = vadd.f32 %v920_v63, %v919_v39  ;;  %v928_v45 = vadd.f32 %v927_v0, %v926_v2  ;;  %v778_v9 = vpop.f32.mrb[5].mxu1  ;;  %v5442_v21 = vadd.f32 %v3874_v5, %v5419_v26 }
 0x1e6   :  { %v5445_v23 = vadd.f32 %v5419_v26, %v778_v9  ;;  %v5461_v9 = vld [vmem:[#allocation7] ss:$0 sm:$0xff] }
 0x1e7   :  { %v922_v13 = vrot.slane %v921_v7, 2  ;;  %v929_v19 = vrot.slane %v928_v45, 4  ;;  %v936_v12 = vsel %vm264_vm0, %v5442_v21, 0.0 }
 0x1e8   :  { %v3877_v24 = vpop.f32.mrb[6].mxu1  ;;  %v935_v37 = vsel %vm264_vm0, %v5445_v23, 0.0 }
 0x1e9   :  { %v923_v25 = vadd.f32 %v922_v13, %v921_v7  ;;  %v930_v27 = vadd.f32 %v929_v19, %v928_v45  ;;  %v788_v10 = vpop.f32.mrb[7].mxu1  ;;  %v5452_v51 = vadd.f32 %v3877_v24, %v5419_v26  ;;  %v937_v53 = vadd.f32 %v936_v12, %v935_v37 }
 0x1ea   :  { %v5455_v52 = vadd.f32 %v5419_v26, %v788_v10 }
 0x1eb   :  { %v924_v34 = vrot.slane %v923_v25, 1  ;;  %v931_v8 = vrot.slane %v930_v27, 2  ;;  %v945_v0 = vsel %vm264_vm0, %v5452_v51, 0.0  ;;  %v938_v5 = vrot.slane %v937_v53, 4 }
 0x1ec   :  { %v944_v2 = vsel %vm264_vm0, %v5455_v52, 0.0 }
 0x1ed   :  { %v932_v40 = vadd.f32 %v931_v8, %v930_v27  ;;  %v925_v39 = vadd.f32 %v924_v34, %v923_v25  ;;  %v946_v13 = vadd.f32 %v945_v0, %v944_v2  ;;  %v939_v24 = vadd.f32 %v938_v5, %v937_v53 }
 0x1ef   :  { %v933_v58 = vrot.slane %v932_v40, 1  ;;  %v1061_v7 = vmul.f32 0.0625, %v925_v39  ;;  %v947_v10 = vrot.slane %v946_v13, 4  ;;  %v940_v8 = vrot.slane %v939_v24, 2 }
 0x1f1   :  { %v934_v63 = vadd.f32 %v933_v58, %v932_v40  ;;  %v1084_v27 = vadd.f32 %v5461_v9, %v1061_v7  ;;  %v948_v12 = vadd.f32 %v947_v10, %v946_v13  ;;  %v941_v58 = vadd.f32 %v940_v8, %v939_v24 }
 0x1f2   :  { %v4800_v7 = vmov 1966171168   ;;  %v1235_v13 = vlaneseq }
 0x1f3   :  { %v1062_v45 = vmul.f32 0.0625, %v934_v63  ;;  %v949_v0 = vrot.slane %v948_v12, 2  ;;  %v942_v24 = vrot.slane %v941_v58, 1 }
 0x1f4   :  { %v1236_v50 = vshrl.u32 %v1235_v13, 7 }
 0x1f5   :  { %v1085_v19 = vadd.f32 %v5461_v9, %v1062_v45  ;;  %v1233_v45 = vunpack.c.l.s4 %v4800_v7  ;;  %v943_v49 = vadd.f32 %v942_v24, %v941_v58 }
 0x1f7   :  { %v1116_v25 = vrot.slane %v1085_v19, 7  ;;  %v1234_v7 = vunpack.c.0.s8 %v1233_v45 }
 0x1f9   :  { %v5466_v34 = vsel %vm453_vm1, %v1116_v25, %v1084_v27 }
 0x1fd   :  { %v3880_v37 = vpop.f32.mrb[8].mxu1 }
 0x1fe   :  { %v5469_v40 = vadd.f32 %v3880_v37, %v5419_v26  ;;  %v798_v39 = vpop.f32.mrb[9].mxu1 }
 0x1ff   :  { %v5472_v63 = vadd.f32 %v5419_v26, %v798_v39  ;;  %v950_v39 = vadd.f32 %v949_v0, %v948_v12 }
 0x200   :  { %v954_v53 = vsel %vm264_vm0, %v5469_v40, 0.0 }
 0x201   :  { %v953_v2 = vsel %vm264_vm0, %v5472_v63, 0.0  ;;  %v3883_v5 = vpop.f32.mrb[10].mxu1  ;;  %v951_v0 = vrot.slane %v950_v39, 1 }
 0x202   :  { %v955_v19 = vadd.f32 %v954_v53, %v953_v2  ;;  %v5479_v27 = vadd.f32 %v3883_v5, %v5419_v26  ;;  %v808_v25 = vpop.f32.mrb[11].mxu1 }
 0x203   :  { %v5482_v10 = vadd.f32 %v5419_v26, %v808_v25  ;;  %v952_v41 = vadd.f32 %v951_v0, %v950_v39 }
 0x204   :  { %v956_v8 = vrot.slane %v955_v19, 4  ;;  %v963_v37 = vsel %vm264_vm0, %v5479_v27, 0.0 }
 0x205   :  { %v962_v62 = vsel %vm264_vm0, %v5482_v10, 0.0  ;;  %v3886_v61 = vpop.f32.mrb[12].mxu1  ;;  %v1064_v56 = vmul.f32 0.0625, %v952_v41 }
 0x206   :  { %v964_v53 = vadd.f32 %v963_v37, %v962_v62  ;;  %v5489_v2 = vadd.f32 %v3886_v61, %v5419_v26  ;;  %v818_v5 = vpop.f32.mrb[13].mxu1  ;;  %v957_v32 = vadd.f32 %v956_v8, %v955_v19  ;;  %v5502_v61 = vsub.s32 %v1234_v7, %v1236_v50 }
 0x207   :  { %v5492_v25 = vadd.f32 %v5419_v26, %v818_v5  ;;  %v1063_v8 = vmul.f32 0.0625, %v943_v49 }
 0x208   :  { %v965_v31 = vrot.slane %v964_v53, 4  ;;  %v972_v12 = vsel %vm264_vm0, %v5489_v2, 0.0  ;;  %v958_v3 = vrot.slane %v957_v32, 2 }
 0x209   :  { %v971_v45 = vsel %vm264_vm0, %v5492_v25, 0.0  ;;  %v3889_v62 = vpop.f32.mrb[14].mxu1  ;;  %v1086_v39 = vadd.f32 %v5461_v9, %v1063_v8 }
 0x20a   :  { %v5500_v13 = vpop.f32.mrb[0].mxu0  ;;  %v966_v58 = vadd.f32 %v965_v31, %v964_v53  ;;  %v973_v24 = vadd.f32 %v972_v12, %v971_v45  ;;  %v5505_v37 = vadd.f32 %v3889_v62, %v5419_v26  ;;  %v828_v19 = vpop.f32.mrb[15].mxu1  ;;  %v5523_v45 = vsub.s32 0, %v1236_v50 }
 0x20b   :  { %v544_v5 = vpop.f32.mrb[1].mxu0  ;;  %v5508_v17 = vadd.f32 %v5419_v26, %v828_v19  ;;  %v959_v33 = vadd.f32 %v958_v3, %v957_v32  ;;  %v1087_v32 = vadd.f32 %v5461_v9, %v1064_v56 }
 0x20c   :  { %v5511_v4 = vadd.f32 %v5496_v18, %v544_v5  ;;  %v974_v57 = vrot.slane %v973_v24, 4  ;;  %v967_v28 = vrot.slane %v966_v58, 2  ;;  %v981_v31 = vsel %vm264_vm0, %v5505_v37, 0.0 }
 0x20d   :  { %v980_v7 = vsel %vm264_vm0, %v5508_v17, 0.0  ;;  %v3892_v53 = vpop.f32.mrb[16].mxu1 }
 0x20e   :  { %v1231_v49 = vcombine.high %v5511_v4, %v5511_v4  ;;  %v5521_v12 = vrot.slane %v5511_v4, %v5502_v61  ;;  %v838_v62 = vpop.f32.mrb[17].mxu1  ;;  %v975_v0 = vadd.f32 %v974_v57, %v973_v24  ;;  %v982_v19 = vadd.f32 %v981_v31, %v980_v7 }
 0x20f   :  { %v968_v55 = vadd.f32 %v967_v28, %v966_v58  ;;  %v1118_v24 = vrot.slane %v1086_v39, 6  ;;  %v960_v28 = vrot.slane %v959_v33, 1 }
 0x210   :  { %v1245_v5 = vrot.slane %v1231_v49, %v5502_v61  ;;  %v5529_v1 = vrot.slane %v5521_v12, %v5502_v61  ;;  %v976_v46 = vrot.slane %v975_v0, 2  ;;  %v983_v8 = vrot.slane %v982_v19, 4 }
 0x211   :  { %v3895_v6 = vpop.f32.mrb[18].mxu1  ;;  %v969_v59 = vrot.slane %v968_v55, 1  ;;  %v961_v48 = vadd.f32 %v960_v28, %v959_v33 }
 0x212   :  { %v5533_v50 = vrot.slane %v5529_v1, %v5523_v45  ;;  %v1261_v60 = vrot.slane %v1245_v5, %v5502_v61  ;;  %v848_v57 = vpop.f32.mrb[19].mxu1  ;;  %v1247_v31 = vcombine.high %v1245_v5, %v1245_v5  ;;  %v977_v7 = vadd.f32 %v976_v46, %v975_v0 }
 0x213   :  { %v984_v39 = vadd.f32 %v983_v8, %v982_v19  ;;  %v970_v8 = vadd.f32 %v969_v59, %v968_v55  ;;  %v5579_v55 = vadd.f32 %v3895_v6, %v5419_v26 }
 0x214   :  { %v5538_v49 = vmul.f32 %v5533_v50, %v5422_v38  ;;  %v1348_v41 = vrot.slane %v1261_v60, %v5523_v45  ;;  %v1277_v3 = vcombine.high %v1261_v60, %v1261_v60  ;;  %v1275_v58 = vrot.slane %v1247_v31, %v5502_v61 }
 0x215   :  { %v978_v47 = vrot.slane %v977_v7, 1  ;;  %v3898_v29 = vpop.f32.mrb[20].mxu1  ;;  %v1119_v60 = vsel %vm455_vm2, %v1118_v24, %v5466_v34  ;;  %v5554_v31 = vadd.f32 %v3892_v53, %v5419_v26  ;;  %6844 = vst [vmem:[#allocation69_spill] sm:$0xff] %v5579_v55  ;;  %v999_v6 = vsel %vm264_vm0, %v5579_v55, 0.0 }
 0x216   :  { %v5544_v16 = vmul.f32 %v1348_v41, %v5469_v40  ;;  %v5547_v46 = vmul.f32 %v1348_v41, %v5472_v63  ;;  %v1356_v38 = vrot.slane %v1277_v3, %v5523_v45  ;;  %v858_v0 = vpop.f32.mrb[21].mxu1  ;;  %v1352_v56 = vrot.slane %v1275_v58, %v5523_v45 }
 0x217   :  { %v1279_v5 = vcombine.high %v1275_v58, %v1275_v58  ;;  %6841 = vst [vmem:[#allocation66_spill] sm:$0xff] %v5554_v31  ;;  %v985_v41 = vrot.slane %v984_v39, 2  ;;  %v979_v24 = vadd.f32 %v978_v47, %v977_v7  ;;  %v1120_v58 = vrot.slane %v1087_v32, 5 }
 0x218   :  { %v5557_v40 = vmul.f32 %v1356_v38, %v5489_v2  ;;  %v5560_v63 = vmul.f32 %v1356_v38, %v5492_v25  ;;  %v5563_v19 = vmul.f32 %v1352_v56, %v5479_v27  ;;  %v5566_v34 = vmul.f32 %v1352_v56, %v5482_v10 }
 0x219   :  { %v3901_v3 = vpop.f32.mrb[22].mxu1  ;;  %v1360_v53 = vrot.slane %v1279_v5, %v5523_v45  ;;  %v986_v33 = vadd.f32 %v985_v41, %v984_v39  ;;  %v5570_v2 = vadd.f32 %v5419_v26, %v838_v62  ;;  %v5574_v25 = vadd.f32 %v5500_v13, %v5496_v18 }
 0x21a   :  { %6842 = vst [vmem:[#allocation67_spill] sm:$0xff] %v5557_v40  ;;  %v868_v28 = vpop.f32.mrb[23].mxu1  ;;  %v990_v59 = vsel %vm264_vm0, %v5554_v31, 0.0  ;;  %v5582_v47 = vadd.f32 %v5419_v26, %v848_v57  ;;  %v1065_v27 = vmul.f32 0.0625, %v961_v48  ;;  %v1066_v32 = vmul.f32 0.0625, %v970_v8 }
 0x21b   :  { %6843 = vst [vmem:[#allocation68_spill] sm:$0xff] %v5570_v2  ;;  %v5585_v10 = vmul.f32 %v1360_v53, %v5505_v37  ;;  %v987_v62 = vrot.slane %v986_v33, 1  ;;  %v5588_v7 = vmul.f32 %v1360_v53, %v5508_v17  ;;  %v1067_v18 = vmul.f32 0.0625, %v979_v24 }
 0x21c   :  { %6845 = vst [vmem:[#allocation70_spill] sm:$0xff] %v5582_v47  ;;  %v989_v13 = vsel %vm264_vm0, %v5570_v2, 0.0  ;;  %v5595_v57 = vsel %vm457_vm3, %v1120_v58, %v1119_v60  ;;  %v1280_v56 = vcombine.high %v5574_v25, %v5574_v25  ;;  %v1246_v17 = vcombine.high %v5521_v12, %v5521_v12 }
 0x21d   :  { %6846 = vst [vmem:[#allocation71_spill] sm:$0xff] %v5585_v10  ;;  %6847 = vst [vmem:[#allocation72_spill] sm:$0xff] %v5588_v7  ;;  %v3904_v38 = vpop.f32.mrb[24].mxu1  ;;  %v988_v48 = vadd.f32 %v987_v62, %v986_v33  ;;  %v991_v39 = vadd.f32 %v990_v59, %v989_v13  ;;  %v998_v5 = vsel %vm264_vm0, %v5582_v47, 0.0  ;;  %v5604_v41 = vadd.f32 %v3898_v29, %v5419_v26 }
 0x21e   :  { %v878_v37 = vpop.f32.mrb[25].mxu1  ;;  %v5607_v8 = vadd.f32 %v5461_v9, %v1065_v27  ;;  %v1000_v58 = vadd.f32 %v999_v6, %v998_v5  ;;  %v5610_v53 = vadd.f32 %v5461_v9, %v1066_v32  ;;  %v5613_v33 = vadd.f32 %v5461_v9, %v1067_v18 }
 0x21f   :  { %6848 = vst [vmem:[#allocation73_spill] sm:$0xff] %v5604_v41  ;;  %v1068_v60 = vmul.f32 0.0625, %v988_v48  ;;  %v992_v24 = vrot.slane %v991_v39, 4  ;;  %v5616_v12 = vadd.f32 %v5419_v26, %v858_v0  ;;  %v5619_v59 = vadd.f32 %v3901_v3, %v5419_v26 }
 0x220   :  { %v1001_v13 = vrot.slane %v1000_v58, 4  ;;  %v1008_v6 = vsel %vm264_vm0, %v5604_v41, 0.0  ;;  %v1294_v48 = vrot.slane %v1280_v56, %v5502_v61  ;;  %v5632_v3 = vadd.f32 %v5419_v26, %v868_v28 }
 0x221   :  { %6849 = vst [vmem:[#allocation74_spill] sm:$0xff] %v5616_v12  ;;  %6850 = vst [vmem:[#allocation75_spill] sm:$0xff] %v5619_v59  ;;  %v3907_v29 = vpop.f32.mrb[26].mxu1  ;;  %v5622_v62 = vadd.f32 %v5461_v9, %v1068_v60  ;;  %v993_v27 = vadd.f32 %v992_v24, %v991_v39  ;;  %v1007_v18 = vsel %vm264_vm0, %v5616_v12, 0.0  ;;  %v1017_v0 = vsel %vm264_vm0, %v5619_v59, 0.0 }
 0x222   :  { %v888_v32 = vpop.f32.mrb[27].mxu1  ;;  %6851 = vst [vmem:[#allocation76_spill] sm:$0xff] %v5632_v3  ;;  %v5635_v5 = vrot.slane %v1246_v17, %v5502_v61  ;;  %v1122_v39 = vrot.slane %v5607_v8, 4  ;;  %v1002_v24 = vadd.f32 %v1001_v13, %v1000_v58  ;;  %v1009_v35 = vadd.f32 %v1008_v6, %v1007_v18 }
 0x223   :  { %v994_v60 = vrot.slane %v993_v27, 2  ;;  %v1016_v30 = vsel %vm264_vm0, %v5632_v3, 0.0  ;;  %v884_v8 = vadd.f32 %v3904_v38, %v5419_v26  ;;  %v1310_v58 = vrot.slane %v1294_v48, %v5502_v61 }
 0x224   :  { %v1003_v15 = vrot.slane %v1002_v24, 2  ;;  %v1018_v59 = vadd.f32 %v1017_v0, %v1016_v30  ;;  %v1010_v41 = vrot.slane %v1009_v35, 4  ;;  %v879_v13 = vadd.f32 %v5419_v26, %v878_v37 }
 0x225   :  { %v3910_v22 = vpop.f32.mrb[28].mxu1  ;;  %v995_v28 = vadd.f32 %v994_v60, %v993_v27  ;;  %v894_v43 = vadd.f32 %v3907_v29, %v5419_v26  ;;  %v1026_v20 = vsel %vm264_vm0, %v884_v8, 0.0  ;;  %v1380_v27 = vrot.slane %v1310_v58, %v5523_v45 }
 0x226   :  { %v5643_v17 = vpop.f32.mrb[29].mxu1  ;;  %v1004_v6 = vadd.f32 %v1003_v15, %v1002_v24  ;;  %v1019_v18 = vrot.slane %v1018_v59, 4  ;;  %v1011_v3 = vadd.f32 %v1010_v41, %v1009_v35  ;;  %v1025_v30 = vsel %vm264_vm0, %v879_v13, 0.0 }
 0x227   :  { %v996_v56 = vrot.slane %v995_v28, 1  ;;  %v1027_v55 = vadd.f32 %v1026_v20, %v1025_v30  ;;  %v1434_v15 = vmul.f32 %v1380_v27, %v884_v8  ;;  %v1433_v24 = vmul.f32 %v1380_v27, %v879_v13 }
 0x228   :  { %v1005_v38 = vrot.slane %v1004_v6, 1  ;;  %v1020_v12 = vadd.f32 %v1019_v18, %v1018_v59  ;;  %v1012_v37 = vrot.slane %v1011_v3, 2  ;;  %v1035_v29 = vsel %vm264_vm0, %v894_v43, 0.0 }
 0x229   :  { %v5652_v0 = vpop.f32.mrb[30].mxu1  ;;  %v997_v60 = vadd.f32 %v996_v56, %v995_v28  ;;  %v1028_v10 = vrot.slane %v1027_v55, 4  ;;  %v1296_v7 = vcombine.high %v1294_v48, %v1294_v48  ;;  %v889_v40 = vadd.f32 %v5419_v26, %v888_v32  ;;  %3969 = vmatprep.mubr.msk.f32.mxu1 %vm264_vm0, %v1433_v24 }
 0x22a   :  { %v5654_v47 = vpop.f32.mrb[31].mxu1  ;;  %v1006_v41 = vadd.f32 %v1005_v38, %v1004_v6  ;;  %v1021_v31 = vrot.slane %v1020_v12, 2  ;;  %v1013_v2 = vadd.f32 %v1012_v37, %v1011_v3  ;;  %v904_v59 = vadd.f32 %v3910_v22, %v5419_v26  ;;  %3970 = vmatmul.mubr.msk.f32.vlgmr.msra.gmra.mrb[32].mxu1 %vm264_vm0, %v1434_v15 }
 0x22b   :  { %v1069_v35 = vmul.f32 0.0625, %v997_v60  ;;  %v1029_v8 = vadd.f32 %v1028_v10, %v1027_v55  ;;  %v1324_v6 = vrot.slane %v1296_v7, %v5502_v61  ;;  %v1034_v18 = vsel %vm264_vm0, %v889_v40, 0.0 }
 0x22c   :  { %v1070_v56 = vmul.f32 0.0625, %v1006_v41  ;;  %v1022_v28 = vadd.f32 %v1021_v31, %v1020_v12  ;;  %v1014_v13 = vrot.slane %v1013_v2, 1  ;;  %v1044_v48 = vsel %vm264_vm0, %v904_v59, 0.0 }
 0x22d   :  { %v1092_v20 = vadd.f32 %v5461_v9, %v1069_v35  ;;  %v1030_v27 = vrot.slane %v1029_v8, 2  ;;  %v1036_v30 = vadd.f32 %v1035_v29, %v1034_v18  ;;  %v1384_v60 = vrot.slane %v1324_v6, %v5523_v45 }
 0x22e   :  { %v1093_v32 = vadd.f32 %v5461_v9, %v1070_v56  ;;  %v1023_v3 = vrot.slane %v1022_v28, 1  ;;  %v1015_v22 = vadd.f32 %v1014_v13, %v1013_v2  ;;  %v1326_v38 = vcombine.high %v1310_v58, %v1310_v58 }
 0x22f   :  { %v1123_v31 = vsel %vm459_vm4, %v1122_v39, %v5595_v57  ;;  %v1031_v12 = vadd.f32 %v1030_v27, %v1029_v8  ;;  %v1037_v7 = vrot.slane %v1036_v30, 4  ;;  %v1436_v15 = vmul.f32 %v1384_v60, %v894_v43 }
 0x230   :  { %v1130_v55 = vrot.slane %v1093_v32, 7  ;;  %v1024_v10 = vadd.f32 %v1023_v3, %v1022_v28  ;;  %v1071_v37 = vmul.f32 0.0625, %v1015_v22  ;;  %v1435_v24 = vmul.f32 %v1384_v60, %v889_v40 }
 0x231   :  { %v1388_v35 = vrot.slane %v1326_v38, %v5523_v45  ;;  %v1032_v29 = vrot.slane %v1031_v12, 1  ;;  %v1038_v2 = vadd.f32 %v1037_v7, %v1036_v30  ;;  %v6852_v18 = vrot.slane %v5610_v53, 3 }
 0x232   :  { %v1131_v41 = vsel %vm453_vm1, %v1130_v55, %v1092_v20  ;;  %v1072_v56 = vmul.f32 0.0625, %v1024_v10  ;;  %v1094_v13 = vadd.f32 %v5461_v9, %v1071_v37  ;;  %v899_v39 = vadd.f32 %v5419_v26, %v5643_v17  ;;  %3972 = vmatprep.mubr.msk.f32.mxu1 %vm264_vm0, %v1435_v24 }
 0x233   :  { %v1438_v58 = vmul.f32 %v1388_v35, %v904_v59  ;;  %v1125_v57 = vsel %vm461_vm5, %v6852_v18, %v1123_v31  ;;  %v1033_v40 = vadd.f32 %v1032_v29, %v1031_v12  ;;  %v1039_v28 = vrot.slane %v1038_v2, 2  ;;  %3973 = vmatmul.mubr.msk.f32.gmra.mrb[34].mxu1 %vm264_vm0, %v1436_v15 }
 0x234   :  { %v1095_v43 = vadd.f32 %v5461_v9, %v1072_v56  ;;  %v6853_v20 = vrot.slane %v5613_v33, 2  ;;  %v1132_v59 = vrot.slane %v1094_v13, 6  ;;  %v6854_v53 = vrot.slane %v5622_v62, 1 }
 0x235   :  { %v1043_v3 = vsel %vm264_vm0, %v899_v39, 0.0  ;;  %v1437_v17 = vmul.f32 %v1388_v35, %v899_v39  ;;  %v1073_v30 = vmul.f32 0.0625, %v1033_v40  ;;  %v1040_v22 = vadd.f32 %v1039_v28, %v1038_v2 }
 0x236   :  { %v1127_v8 = vsel %vm463_vm6, %v6853_v20, %v1125_v57  ;;  %v1134_v27 = vrot.slane %v1095_v43, 5  ;;  %v1133_v38 = vsel %vm455_vm2, %v1132_v59, %v1131_v41  ;;  %v1045_v33 = vadd.f32 %v1044_v48, %v1043_v3 }
 0x237   :  { %v1129_v32 = vsel %vm465_vm7, %v6854_v53, %v1127_v8  ;;  %v914_v31 = vadd.f32 %v5652_v0, %v5419_v26  ;;  %v1328_v55 = vcombine.high %v1324_v6, %v1324_v6  ;;  %3975 = vmatprep.mubr.msk.f32.mxu1 %vm264_vm0, %v1437_v17  ;;  %v1096_v10 = vadd.f32 %v5461_v9, %v1073_v30 }
 0x238   :  { %v1146_v60 = vmul.f32 %v1129_v32, %v5511_v4  ;;  %v1135_v62 = vsel %vm457_vm3, %v1134_v27, %v1133_v38  ;;  %v1041_v12 = vrot.slane %v1040_v22, 1  ;;  %v909_v7 = vadd.f32 %v5419_v26, %v5654_v47  ;;  %3976 = vmatmul.mubr.msk.f32.gmra.mrb[36].mxu1 %vm264_vm0, %v1438_v58 }
 0x239   :  { %v1046_v4 = vrot.slane %v1045_v33, 4  ;;  %v1053_v48 = vsel %vm264_vm0, %v914_v31, 0.0  ;;  %v1392_v0 = vrot.slane %v1328_v55, %v5523_v45  ;;  %v1409_v6 = vmul.f32 %v5533_v50, %v5425_v42 }
 0x23a   :  { %3922 = vmatprep.mubr.msk.f32.mxu0 %vm264_vm0, %v1146_v60  ;;  %v1136_v37 = vrot.slane %v1096_v10, 4  ;;  %v1042_v15 = vadd.f32 %v1041_v12, %v1040_v22  ;;  %v1052_v24 = vsel %vm264_vm0, %v909_v7, 0.0  ;;  %v1336_v35 = vrot.slane %v5635_v5, %v5523_v45  ;;  %v6858_v10 = vld [vmem:[#allocation71_spill] sm:$0xff]  ;;  %v6860_v12 = vld [vmem:[#allocation70_spill] sm:$0xff] }
 0x23b   :  { %v1047_v41 = vadd.f32 %v1046_v4, %v1045_v33  ;;  %v1054_v56 = vadd.f32 %v1053_v48, %v1052_v24  ;;  %v1439_v26 = vmul.f32 %v1392_v0, %v909_v7  ;;  %v1440_v2 = vmul.f32 %v1392_v0, %v914_v31  ;;  %v6861_v0 = vld [vmem:[#allocation69_spill] sm:$0xff] }
 0x23c   :  { %v1137_v47 = vsel %vm459_vm4, %v1136_v37, %v1135_v62  ;;  %v1074_v29 = vmul.f32 0.0625, %v1042_v15  ;;  %v1411_v13 = vmul.f32 %v1336_v35, %v5435_v44  ;;  %v1276_v38 = vcombine.high %v5529_v1, %v5529_v1  ;;  %v6862_v37 = vld [vmem:[#allocation74_spill] sm:$0xff] }
 0x23d   :  { %v1048_v58 = vrot.slane %v1047_v41, 2  ;;  %v1055_v18 = vrot.slane %v1054_v56, 4  ;;  %3978 = vmatprep.mubr.msk.f32.mxu1 %vm264_vm0, %v1439_v26 }
 0x23e   :  { %v1097_v42 = vadd.f32 %v5461_v9, %v1074_v29  ;;  %3979 = vmatmul.mubr.msk.f32.gmra.mrb[38].mxu1 %vm264_vm0, %v1440_v2  ;;  %v1340_v33 = vrot.slane %v1276_v38, %v5523_v45  ;;  %v2336_v2 = vld [vmem:[#allocation16] sm:$0xff] }
 0x23f   :  { %v1049_v50 = vadd.f32 %v1048_v58, %v1047_v41  ;;  %v1056_v57 = vadd.f32 %v1055_v18, %v1054_v56  ;;  %3989 = vmatprep.mubr.msk.f32.mxu1 %vm264_vm0, %v5105_v14  ;;  %v6864_v56 = vld [vmem:[#allocation76_spill] sm:$0xff]  ;;  %v2338_v18 = vld [vmem:[#allocation16 + $0x10] sm:$0xff]  ;;  %v6884_v38 = vld [vmem:[#allocation53_spill] sm:$0xff] }
 0x240   :  { %v1138_v39 = vrot.slane %v1097_v42, 3  ;;  %v1413_v31 = vmul.f32 %v1340_v33, %v5445_v23  ;;  %v1414_v1 = vmul.f32 %v1340_v33, %v5442_v21  ;;  %v2339_v42 = vld [vmem:[#allocation16 + $0x18] sm:$0xff] }
 0x241   :  { %v1050_v43 = vrot.slane %v1049_v50, 1  ;;  %v1057_v40 = vrot.slane %v1056_v57, 2  ;;  %v6886_v33 = vld [vmem:[#allocation55_spill] sm:$0xff] }
 0x242   :  { %v1139_v28 = vsel %vm461_vm5, %v1138_v39, %v1137_v47  ;;  %v6865_v47 = vld [vmem:[#allocation75_spill] sm:$0xff]  ;;  %v6867_v39 = vld [vmem:[#allocation36_spill] sm:$0xff] }
 0x243   :  { %v1051_v20 = vadd.f32 %v1050_v43, %v1049_v50  ;;  %v1058_v44 = vadd.f32 %v1057_v40, %v1056_v57  ;;  %v4234_v50 = vpack.c.bf16 %v2339_v42, %v2338_v18  ;;  %v6866_v57 = vld [vmem:[#allocation35_spill] sm:$0xff]  ;;  %v6868_v43 = vld [vmem:[#allocation37_spill] sm:$0xff]  ;;  %v6869_v40 = vld [vmem:[#allocation38_spill] sm:$0xff] }
 0x244   :  { %v2766_v18 = vld [vmem:[#allocation23 + $0x58] sm:$0xff] }
 0x245   :  { %v1075_v8 = vmul.f32 0.0625, %v1051_v20  ;;  %v1059_v59 = vrot.slane %v1058_v44, 1  ;;  %v6871_v20 = vld [vmem:[#allocation40_spill] sm:$0xff] }
 0x247   :  { %v1098_v53 = vadd.f32 %v5461_v9, %v1075_v8  ;;  %v1060_v32 = vadd.f32 %v1059_v59, %v1058_v44  ;;  %v6872_v44 = vld [vmem:[#allocation41_spill] sm:$0xff]  ;;  %v6873_v8 = vld [vmem:[#allocation42_spill] sm:$0xff]  ;;  %v6874_v59 = vld [vmem:[#allocation43_spill] sm:$0xff] }
 0x249   :  { %v1140_v3 = vrot.slane %v1098_v53, 2  ;;  %v1076_v17 = vmul.f32 0.0625, %v1060_v32  ;;  %v6875_v53 = vld [vmem:[#allocation44_spill] sm:$0xff]  ;;  %v6876_v32 = vld [vmem:[#allocation45_spill] sm:$0xff] }
 0x24b   :  { %v1099_v27 = vadd.f32 %v5461_v9, %v1076_v17  ;;  %v1141_v30 = vsel %vm463_vm6, %v1140_v3, %v1139_v28  ;;  %v1278_v9 = vcombine.high %v5635_v5, %v5635_v5  ;;  %v6870_v28 = vld [vmem:[#allocation39_spill] sm:$0xff]  ;;  %v6877_v3 = vld [vmem:[#allocation46_spill] sm:$0xff] }
 0x24c   :  { %v6878_v17 = vld [vmem:[#allocation47_spill] sm:$0xff] }
 0x24d   :  { %v1142_v22 = vrot.slane %v1099_v27, 1  ;;  %v1344_v55 = vrot.slane %v1278_v9, %v5523_v45  ;;  %v6879_v27 = vld [vmem:[#allocation48_spill] sm:$0xff]  ;;  %v6885_v9 = vld [vmem:[#allocation54_spill] sm:$0xff] }
 0x24f   :  { %v1143_v14 = vsel %vm465_vm7, %v1142_v22, %v1141_v30  ;;  %v6880_v30 = vld [vmem:[#allocation49_spill] sm:$0xff]  ;;  %v6881_v22 = vld [vmem:[#allocation50_spill] sm:$0xff] }
 0x250   :  { %v1147_v60 = vmul.f32 %v1143_v14, %v5574_v25  ;;  %v6882_v14 = vld [vmem:[#allocation51_spill] sm:$0xff] }
 0x252   :  { %3923 = vmatmul.mubr.msk.f32.vlgmr.msra.gmra.mrb[2].mxu0 %vm264_vm0, %v1147_v60  ;;  %v6883_v60 = vld [vmem:[#allocation52_spill] sm:$0xff] }
 0x253   :  { %4225 = vmatpush3.bf16.msra.mxu0 %v5406_v36  ;;  %3933 = vmatprep.mubr.msk.f32.mxu0 %vm264_vm0, %v1409_v6  ;;  %v1412_v36 = vmul.f32 %v1336_v35, %v5432_v54  ;;  %v1287_v54 = vrot.slane %v5574_v25, %v5502_v61  ;;  %v6863_v35 = vld [vmem:[#allocation73_spill] sm:$0xff] }
 0x254   :  { %4227 = vmatprep.subr.bf16.mxu0 %v5412_v11 }
 0x255   :  { %v1295_v21 = vcombine.high %v1287_v54, %v1287_v54  ;;  %v1303_v23 = vrot.slane %v1287_v54, %v5502_v61  ;;  %v6893_v54 = vld [vmem:[#allocation62_spill] sm:$0xff] }
 0x257   :  { %4229 = vmatpush3.bf16.msra.mxu0 %v5412_v11  ;;  %v1415_v11 = vmul.f32 %v1344_v55, %v5455_v52  ;;  %v1317_v52 = vrot.slane %v1295_v21, %v5502_v61  ;;  %v1325_v62 = vcombine.high %v1303_v23, %v1303_v23  ;;  %v6894_v21 = vld [vmem:[#allocation63_spill] sm:$0xff] }
 0x259   :  { %v1368_v5 = vrot.slane %v1317_v52, %v5523_v45  ;;  %v1372_v4 = vrot.slane %v1325_v62, %v5523_v45  ;;  %v1327_v48 = vcombine.high %v1317_v52, %v1317_v52 }
 0x25a   :  { %3934 = vmatmul.mubr.msk.f32.vlgmr.msra.gmra.mrb[4].mxu0 %vm264_vm0, %v5538_v49  ;;  %v1416_v49 = vmul.f32 %v1344_v55, %v5452_v51  ;;  %v1364_v51 = vrot.slane %v1303_v23, %v5523_v45  ;;  %v6889_v55 = vld [vmem:[#allocation58_spill] sm:$0xff]  ;;  %v6895_v23 = vld [vmem:[#allocation64_spill] sm:$0xff] }
 0x25b   :  { %3936 = vmatprep.mubr.msk.f32.mxu0 %vm264_vm0, %v1411_v13  ;;  %v1427_v7 = vmul.f32 %v1368_v5, %v6860_v12  ;;  %v1428_v6 = vmul.f32 %v1368_v5, %v6861_v0  ;;  %v1429_v15 = vmul.f32 %v1372_v4, %v6862_v37  ;;  %v1376_v24 = vrot.slane %v1327_v48, %v5523_v45  ;;  %v2337_v13 = vld [vmem:[#allocation16 + $0x8] sm:$0xff] }
 0x25c   :  { %v1430_v41 = vmul.f32 %v1372_v4, %v6863_v35  ;;  %v4230_v58 = vpack.c.bf16 %v2337_v13, %v2336_v2  ;;  %v2759_v0 = vld [vmem:[#allocation23 + $0x20] sm:$0xff]  ;;  %v2762_v35 = vld [vmem:[#allocation23 + $0x38] sm:$0xff]  ;;  %v2764_v2 = vld [vmem:[#allocation23 + $0x48] sm:$0xff] }
 0x25d   :  { %v1431_v26 = vmul.f32 %v1376_v24, %v6864_v56  ;;  %v1432_v29 = vmul.f32 %v1376_v24, %v6865_v47  ;;  %v2761_v24 = vld [vmem:[#allocation23 + $0x30] sm:$0xff] }
 0x25e   :  { %3937 = vmatmul.mubr.msk.f32.gmra.mrb[6].mxu0 %vm264_vm0, %v1412_v36  ;;  %4231 = vmatprep.subr.bf16.mxu1 %v4230_v58  ;;  %v6887_v36 = vld [vmem:[#allocation56_spill] sm:$0xff]  ;;  %v5888_v56 = vpack.c.bf16 %v2762_v35, %v2761_v24 }
 0x25f   :  { %3939 = vmatprep.mubr.msk.f32.mxu0 %vm264_vm0, %v1413_v31  ;;  %4233 = vmatpush3.bf16.msra.mxu1 %v4230_v58  ;;  %v6888_v31 = vld [vmem:[#allocation57_spill] sm:$0xff]  ;;  %v2765_v58 = vld [vmem:[#allocation23 + $0x50] sm:$0xff] }
 0x260   :  { %4235 = vmatprep.subr.bf16.mxu1 %v4234_v50  ;;  %v5906_v42 = vpack.c.bf16 %v2766_v18, %v2765_v58 }
 0x262   :  { %3940 = vmatmul.mubr.msk.f32.gmra.mrb[8].mxu0 %vm264_vm0, %v1414_v1  ;;  %v6890_v1 = vld [vmem:[#allocation59_spill] sm:$0xff]  ;;  %6902 = vst [vmem:[#allocation70_spill] sm:$0xff] %v5906_v42 }
 0x263   :  { %3942 = vmatprep.mubr.msk.f32.mxu0 %vm264_vm0, %v1415_v11  ;;  %4237 = vmatpush3.bf16.msra.mxu1 %v4234_v50  ;;  %v6891_v11 = vld [vmem:[#allocation60_spill] sm:$0xff]  ;;  %v2767_v50 = vld [vmem:[#allocation23 + $0x60] sm:$0xff] }
 0x266   :  { %3943 = vmatmul.mubr.msk.f32.gmra.mrb[10].mxu0 %vm264_vm0, %v1416_v49  ;;  %3990 = vmatmul.mubr.msk.f32.vlgmr.msra.gmra.mrb[40].mxu1 %vm264_vm0, %v6866_v57  ;;  %v6892_v49 = vld [vmem:[#allocation61_spill] sm:$0xff]  ;;  %v2768_v57 = vld [vmem:[#allocation23 + $0x68] sm:$0xff] }
 0x267   :  { %3945 = vmatprep.mubr.msk.f32.mxu0 %vm264_vm0, %v5547_v46  ;;  %v6855_v46 = vld [vmem:[#allocation67_spill] sm:$0xff]  ;;  %3992 = vmatprep.mubr.msk.f32.mxu1 %vm264_vm0, %v6867_v39  ;;  %v5912_v39 = vpack.c.bf16 %v2768_v57, %v2767_v50 }
 0x269   :  { %6903 = vst [vmem:[#allocation69_spill] sm:$0xff] %v5912_v39 }
 0x26a   :  { %3946 = vmatmul.mubr.msk.f32.gmra.mrb[12].mxu0 %vm264_vm0, %v5544_v16  ;;  %v6856_v16 = vld [vmem:[#allocation72_spill] sm:$0xff]  ;;  %3993 = vmatmul.mubr.msk.f32.gmra.mrb[42].mxu1 %vm264_vm0, %v6868_v43  ;;  %v2769_v43 = vld [vmem:[#allocation23 + $0x70] sm:$0xff] }
 0x26b   :  { %3948 = vmatprep.mubr.msk.f32.mxu0 %vm264_vm0, %v5566_v34  ;;  %v6857_v34 = vld [vmem:[#allocation68_spill] sm:$0xff]  ;;  %3995 = vmatprep.mubr.msk.f32.mxu1 %vm264_vm0, %v6869_v40 }
 0x26c   :  { %v1425_v25 = vmul.f32 %v1364_v51, %v6857_v34  ;;  %v2755_v34 = vld [vmem:[#allocation23] sm:$0xff]  ;;  %6899 = vst [vmem:[#allocation68_spill] sm:$0xff] %v5888_v56  ;;  %v2770_v40 = vld [vmem:[#allocation23 + $0x78] sm:$0xff] }
 0x26e   :  { %3949 = vmatmul.mubr.msk.f32.gmra.mrb[14].mxu0 %vm264_vm0, %v5563_v19  ;;  %3996 = vmatmul.mubr.msk.f32.gmra.mrb[44].mxu1 %vm264_vm0, %v6870_v28  ;;  %v5918_v28 = vpack.c.bf16 %v2770_v40, %v2769_v43 }
 0x26f   :  { %3951 = vmatprep.mubr.msk.f32.mxu0 %vm264_vm0, %v5560_v63  ;;  %v6859_v63 = vld [vmem:[#allocation66_spill] sm:$0xff]  ;;  %3998 = vmatprep.mubr.msk.f32.mxu1 %vm264_vm0, %v6871_v20 }
 0x270   :  { %v1426_v19 = vmul.f32 %v1364_v51, %v6859_v63  ;;  %v6896_v51 = vld [vmem:[#allocation65_spill] sm:$0xff]  ;;  %v2757_v63 = vld [vmem:[#allocation23 + $0x10] sm:$0xff]  ;;  %6904 = vst [vmem:[#allocation74_spill] sm:$0xff] %v5918_v28 }
 0x272   :  { %3952 = vmatmul.mubr.msk.f32.gmra.mrb[16].mxu0 %vm264_vm0, %v6855_v46  ;;  %3999 = vmatmul.mubr.msk.f32.gmra.mrb[46].mxu1 %vm264_vm0, %v6872_v44 }
 0x273   :  { %3954 = vmatprep.mubr.msk.f32.mxu0 %vm264_vm0, %v6856_v16  ;;  %4001 = vmatprep.mubr.msk.f32.mxu1 %vm264_vm0, %v6873_v8 }
 0x276   :  { %3955 = vmatmul.mubr.msk.f32.gmra.mrb[18].mxu0 %vm264_vm0, %v6858_v10  ;;  %4002 = vmatmul.mubr.msk.f32.gmra.mrb[48].mxu1 %vm264_vm0, %v6874_v59 }
 0x277   :  { %3957 = vmatprep.mubr.msk.f32.mxu0 %vm264_vm0, %v1425_v25  ;;  %4004 = vmatprep.mubr.msk.f32.mxu1 %vm264_vm0, %v6875_v53  ;;  %v2756_v25 = vld [vmem:[#allocation23 + $0x8] sm:$0xff] }
 0x278   :  { %v5852_v5 = vpack.c.bf16 %v2756_v25, %v2755_v34 }
 0x27a   :  { %3958 = vmatmul.mubr.msk.f32.gmra.mrb[20].mxu0 %vm264_vm0, %v1426_v19  ;;  %4005 = vmatmul.mubr.msk.f32.gmra.mrb[50].mxu1 %vm264_vm0, %v6876_v32  ;;  %v2758_v19 = vld [vmem:[#allocation23 + $0x18] sm:$0xff] }
 0x27b   :  { %3960 = vmatprep.mubr.msk.f32.mxu0 %vm264_vm0, %v1427_v7  ;;  %4007 = vmatprep.mubr.msk.f32.mxu1 %vm264_vm0, %v6877_v3  ;;  %v5866_v7 = vpack.c.bf16 %v2758_v19, %v2757_v63 }
 0x27c   :  { %4239 = vmatprep.subr.bf16.mxu0 %v5852_v5  ;;  %4303 = vmatprep.subr.bf16.mxu1 %v5852_v5 }
 0x27d   :  { %4241 = vmatpush3.bf16.msra.mxu0 %v5852_v5  ;;  %4305 = vmatpush3.bf16.msra.mxu1 %v5852_v5 }
 0x27e   :  { %3961 = vmatmul.mubr.msk.f32.gmra.mrb[22].mxu0 %vm264_vm0, %v1428_v6  ;;  %4008 = vmatmul.mubr.msk.f32.gmra.mrb[52].mxu1 %vm264_vm0, %v6878_v17  ;;  %v2760_v6 = vld [vmem:[#allocation23 + $0x28] sm:$0xff] }
 0x27f   :  { %3963 = vmatprep.mubr.msk.f32.mxu0 %vm264_vm0, %v1429_v15  ;;  %4010 = vmatprep.mubr.msk.f32.mxu1 %vm264_vm0, %v6879_v27  ;;  %v5880_v15 = vpack.c.bf16 %v2760_v6, %v2759_v0 }
 0x280   :  { %4243 = vmatprep.subr.bf16.mxu0 %v5866_v7  ;;  %4307 = vmatprep.subr.bf16.mxu1 %v5866_v7 }
 0x281   :  { %4245 = vmatpush3.bf16.msra.mxu0 %v5866_v7  ;;  %4309 = vmatpush3.bf16.msra.mxu1 %v5866_v7 }
 0x282   :  { %3964 = vmatmul.mubr.msk.f32.gmra.mrb[24].mxu0 %vm264_vm0, %v1430_v41  ;;  %4011 = vmatmul.mubr.msk.f32.gmra.mrb[54].mxu1 %vm264_vm0, %v6880_v30 }
 0x283   :  { %3966 = vmatprep.mubr.msk.f32.mxu0 %vm264_vm0, %v1431_v26  ;;  %4013 = vmatprep.mubr.msk.f32.mxu1 %vm264_vm0, %v6881_v22 }
 0x284   :  { %4247 = vmatprep.subr.bf16.mxu0 %v5880_v15  ;;  %4311 = vmatprep.subr.bf16.mxu1 %v5880_v15 }
 0x285   :  { %4249 = vmatpush3.bf16.msra.mxu0 %v5880_v15  ;;  %4313 = vmatpush3.bf16.msra.mxu1 %v5880_v15 }
 0x286   :  { %3967 = vmatmul.mubr.msk.f32.gmra.mrb[26].mxu0 %vm264_vm0, %v1432_v29  ;;  %4014 = vmatmul.mubr.msk.f32.gmra.mrb[56].mxu1 %vm264_vm0, %v6882_v14  ;;  %v2763_v29 = vld [vmem:[#allocation23 + $0x40] sm:$0xff] }
 0x287   :  { %4016 = vmatprep.mubr.msk.f32.mxu1 %vm264_vm0, %v6883_v60  ;;  %4251 = vmatprep.subr.bf16.mxu0 %v5888_v56  ;;  %v5900_v13 = vpack.c.bf16 %v2764_v2, %v2763_v29 }
 0x288   :  { %4315 = vmatprep.subr.bf16.mxu1 %v5888_v56 }
 0x289   :  { %4253 = vmatpush3.bf16.msra.mxu0 %v5888_v56  ;;  %4317 = vmatpush3.bf16.msra.mxu1 %v5888_v56  ;;  %6901 = vst [vmem:[#allocation66_spill] sm:$0xff] %v5900_v13 }
 0x28a   :  { %4017 = vmatmul.mubr.msk.f32.gmra.mrb[58].mxu1 %vm264_vm0, %v6884_v38  ;;  %4255 = vmatprep.subr.bf16.mxu0 %v5900_v13 }
 0x28b   :  { %4019 = vmatprep.mubr.msk.f32.mxu1 %vm264_vm0, %v6885_v9  ;;  %4319 = vmatprep.subr.bf16.mxu1 %v5900_v13 }
 0x28d   :  { %4257 = vmatpush3.bf16.msra.mxu0 %v5900_v13  ;;  %4321 = vmatpush3.bf16.msra.mxu1 %v5900_v13 }
 0x28e   :  { %4020 = vmatmul.mubr.msk.f32.gmra.mrb[60].mxu1 %vm264_vm0, %v6886_v33  ;;  %4259 = vmatprep.subr.bf16.mxu0 %v5906_v42 }
 0x28f   :  { %4022 = vmatprep.mubr.msk.f32.mxu1 %vm264_vm0, %v6887_v36  ;;  %4323 = vmatprep.subr.bf16.mxu1 %v5906_v42 }
 0x291   :  { %4261 = vmatpush3.bf16.msra.mxu0 %v5906_v42  ;;  %4325 = vmatpush3.bf16.msra.mxu1 %v5906_v42 }
 0x292   :  { %4023 = vmatmul.mubr.msk.f32.gmra.mrb[62].mxu1 %vm264_vm0, %v6888_v31  ;;  %4263 = vmatprep.subr.bf16.mxu0 %v5912_v39 }
 0x293   :  { %4025 = vmatprep.mubr.msk.f32.mxu1 %vm264_vm0, %v6889_v55  ;;  %4327 = vmatprep.subr.bf16.mxu1 %v5912_v39 }
 0x295   :  { %4265 = vmatpush3.bf16.msra.mxu0 %v5912_v39  ;;  %4329 = vmatpush3.bf16.msra.mxu1 %v5912_v39 }
 0x296   :  { %4026 = vmatmul.mubr.msk.f32.gmra.mrb[64].mxu1 %vm264_vm0, %v6890_v1  ;;  %4267 = vmatprep.subr.bf16.mxu0 %v5918_v28 }
 0x297   :  { %4028 = vmatprep.mubr.msk.f32.mxu1 %vm264_vm0, %v6891_v11  ;;  %4331 = vmatprep.subr.bf16.mxu1 %v5918_v28 }
 0x299   :  { %4269 = vmatpush3.bf16.msra.mxu0 %v5918_v28  ;;  %4333 = vmatpush3.bf16.msra.mxu1 %v5918_v28 }
 0x29a   :  { %4029 = vmatmul.mubr.msk.f32.gmra.mrb[66].mxu1 %vm264_vm0, %v6892_v49  ;;  %4271 = vmatprep.subr.bf16.mxu0 %v5852_v5 }
 0x29b   :  { %4031 = vmatprep.mubr.msk.f32.mxu1 %vm264_vm0, %v6893_v54 }
 0x29e   :  { %4032 = vmatmul.mubr.msk.f32.gmra.mrb[68].mxu1 %vm264_vm0, %v6894_v21 }
 0x29f   :  { %4034 = vmatprep.mubr.msk.f32.mxu1 %vm264_vm0, %v6895_v23 }
 0x2a2   :  { %4035 = vmatmul.mubr.msk.f32.gmra.mrb[70].mxu1 %vm264_vm0, %v6896_v51 }
 0x2fd   :  { %v5844_v52 = vpop.f32.mrb[32].mxu1 }
 0x2fe   :  { %v5846_v46 = vpop.f32.mrb[33].mxu1 }
 0x2ff   :  { %v5850_v16 = vmax.f32 %v5846_v46, %v5844_v52 }
 0x306   :  { %v5854_v62 = vpop.f32.mrb[34].mxu1 }
 0x307   :  { %v5858_v10 = vpop.f32.mrb[35].mxu1 }
 0x308   :  { %v5864_v12 = vmax.f32 %v5858_v10, %v5854_v62 }
 0x30b   :  { %v5868_v4 = vpop.f32.mrb[36].mxu1 }
 0x30c   :  { %6897 = vst [vmem:[#allocation67_spill] sm:$0xff] %v5868_v4  ;;  %v5872_v48 = vpop.f32.mrb[37].mxu1 }
 0x30d   :  { %v5878_v37 = vmax.f32 %v5872_v48, %v5868_v4 }
 0x311   :  { %v5886_v41 = vpop.f32.mrb[38].mxu1 }
 0x312   :  { %6898 = vst [vmem:[#allocation72_spill] sm:$0xff] %v5886_v41  ;;  %v5890_v26 = vpop.f32.mrb[39].mxu1 }
 0x313   :  { %6900 = vst [vmem:[#allocation71_spill] sm:$0xff] %v5890_v26  ;;  %v5894_v47 = vmax.f32 %v5890_v26, %v5886_v41 }
 0x325   :  { %v5924_v20 = vpop.f32.mrb[2].mxu0 }
 0x326   :  { %v5927_v44 = vpop.f32.mrb[3].mxu0 }
 0x32d   :  { %v5929_v8 = vpop.f32.mrb[4].mxu0 }
 0x32e   :  { %v5931_v59 = vpop.f32.mrb[5].mxu0 }
 0x32f   :  { %v1762_v53 = vmax.f32 %v5931_v59, %v5929_v8 }
 0x331   :  { %v1763_v32 = vrot.slane %v1762_v53, 4  ;;  %v5935_v3 = vpop.f32.mrb[6].mxu0 }
 0x332   :  { %v5937_v17 = vpop.f32.mrb[7].mxu0 }
 0x333   :  { %v1764_v27 = vmax.f32 %v1762_v53, %v1763_v32  ;;  %v1769_v30 = vmax.f32 %v5937_v17, %v5935_v3 }
 0x335   :  { %v1765_v22 = vrot.slane %v1764_v27, 2  ;;  %v1770_v14 = vrot.slane %v1769_v30, 4  ;;  %v5941_v60 = vpop.f32.mrb[8].mxu0 }
 0x336   :  { %v5943_v38 = vpop.f32.mrb[9].mxu0 }
 0x337   :  { %v1766_v9 = vmax.f32 %v1764_v27, %v1765_v22  ;;  %v1771_v33 = vmax.f32 %v1769_v30, %v1770_v14  ;;  %v1776_v36 = vmax.f32 %v5943_v38, %v5941_v60 }
 0x339   :  { %v1772_v31 = vrot.slane %v1771_v33, 2  ;;  %v1777_v55 = vrot.slane %v1776_v36, 4  ;;  %v5947_v1 = vpop.f32.mrb[10].mxu0  ;;  %v1767_v11 = vrot.slane %v1766_v9, 1 }
 0x33a   :  { %v5949_v49 = vpop.f32.mrb[11].mxu0 }
 0x33b   :  { %v1773_v54 = vmax.f32 %v1771_v33, %v1772_v31  ;;  %v1778_v21 = vmax.f32 %v1776_v36, %v1777_v55  ;;  %v1783_v23 = vmax.f32 %v5949_v49, %v5947_v1  ;;  %v1768_v19 = vmax.f32 %v1766_v9, %v1767_v11 }
 0x33d   :  { %v1774_v51 = vrot.slane %v1773_v54, 1  ;;  %v1779_v34 = vrot.slane %v1778_v21, 2  ;;  %v1784_v25 = vrot.slane %v1783_v23, 4  ;;  %v5953_v63 = vpop.f32.mrb[12].mxu0 }
 0x33e   :  { %v5955_v0 = vpop.f32.mrb[13].mxu0 }
 0x33f   :  { %v1775_v6 = vmax.f32 %v1773_v54, %v1774_v51  ;;  %v1780_v24 = vmax.f32 %v1778_v21, %v1779_v34  ;;  %v1785_v35 = vmax.f32 %v1783_v23, %v1784_v25  ;;  %v1790_v29 = vmax.f32 %v5955_v0, %v5953_v63 }
 0x341   :  { %v1890_v2 = vsel %vm453_vm1, %v1775_v6, %v1768_v19  ;;  %v1781_v58 = vrot.slane %v1780_v24, 1  ;;  %v1786_v18 = vrot.slane %v1785_v35, 2  ;;  %v1791_v50 = vrot.slane %v1790_v29, 4  ;;  %v5960_v57 = vpop.f32.mrb[14].mxu0 }
 0x342   :  { %v5962_v43 = vpop.f32.mrb[15].mxu0 }
 0x343   :  { %v1782_v40 = vmax.f32 %v1780_v24, %v1781_v58  ;;  %v1787_v53 = vmax.f32 %v1785_v35, %v1786_v18  ;;  %v1792_v32 = vmax.f32 %v1790_v29, %v1791_v50  ;;  %v1797_v27 = vmax.f32 %v5962_v43, %v5960_v57 }
 0x345   :  { %v1891_v30 = vsel %vm455_vm2, %v1782_v40, %v1890_v2  ;;  %v1788_v22 = vrot.slane %v1787_v53, 1  ;;  %v1793_v14 = vrot.slane %v1792_v32, 2  ;;  %v1798_v9 = vrot.slane %v1797_v27, 4  ;;  %v5967_v33 = vpop.f32.mrb[16].mxu0 }
 0x346   :  { %v5969_v36 = vpop.f32.mrb[17].mxu0 }
 0x347   :  { %v1789_v31 = vmax.f32 %v1787_v53, %v1788_v22  ;;  %v1794_v55 = vmax.f32 %v1792_v32, %v1793_v14  ;;  %v1799_v11 = vmax.f32 %v1797_v27, %v1798_v9  ;;  %v1804_v54 = vmax.f32 %v5969_v36, %v5967_v33 }
 0x349   :  { %v1892_v21 = vsel %vm457_vm3, %v1789_v31, %v1891_v30  ;;  %v1795_v23 = vrot.slane %v1794_v55, 1  ;;  %v1800_v51 = vrot.slane %v1799_v11, 2  ;;  %v1805_v34 = vrot.slane %v1804_v54, 4  ;;  %v5974_v25 = vpop.f32.mrb[18].mxu0 }
 0x34a   :  { %v5976_v19 = vpop.f32.mrb[19].mxu0 }
 0x34b   :  { %v1796_v6 = vmax.f32 %v1794_v55, %v1795_v23  ;;  %v1801_v24 = vmax.f32 %v1799_v11, %v1800_v51  ;;  %v1806_v35 = vmax.f32 %v1804_v54, %v1805_v34  ;;  %v1811_v29 = vmax.f32 %v5976_v19, %v5974_v25 }
 0x34c   :  { %v1847_v54 = vrot.slane %v5850_v16, 4 }
 0x34d   :  { %v1893_v2 = vsel %vm459_vm4, %v1796_v6, %v1892_v21  ;;  %v1802_v58 = vrot.slane %v1801_v24, 1  ;;  %v1807_v18 = vrot.slane %v1806_v35, 2  ;;  %v1812_v50 = vrot.slane %v1811_v29, 4  ;;  %v5981_v40 = vpop.f32.mrb[20].mxu0 }
 0x34e   :  { %v5983_v53 = vpop.f32.mrb[21].mxu0 }
 0x34f   :  { %v1803_v32 = vmax.f32 %v1801_v24, %v1802_v58  ;;  %v1808_v27 = vmax.f32 %v1806_v35, %v1807_v18  ;;  %v1813_v30 = vmax.f32 %v1811_v29, %v1812_v50  ;;  %v1818_v22 = vmax.f32 %v5983_v53, %v5981_v40 }
 0x350   :  { %v1854_v24 = vrot.slane %v5864_v12, 4  ;;  %v6000_v50 = vmax.f32 %v5850_v16, %v1847_v54 }
 0x351   :  { %v1894_v14 = vsel %vm461_vm5, %v1803_v32, %v1893_v2  ;;  %v1809_v9 = vrot.slane %v1808_v27, 1  ;;  %v1814_v31 = vrot.slane %v1813_v30, 2  ;;  %v1819_v55 = vrot.slane %v1818_v22, 4  ;;  %v5988_v11 = vpop.f32.mrb[22].mxu0 }
 0x352   :  { %v5991_v21 = vpop.f32.mrb[23].mxu0 }
 0x353   :  { %v1810_v23 = vmax.f32 %v1808_v27, %v1809_v9  ;;  %v1815_v51 = vmax.f32 %v1813_v30, %v1814_v31  ;;  %v1820_v34 = vmax.f32 %v1818_v22, %v1819_v55  ;;  %v1825_v6 = vmax.f32 %v5991_v21, %v5988_v11 }
 0x354   :  { %v6007_v31 = vmax.f32 %v5864_v12, %v1854_v24  ;;  %v1868_v55 = vrot.slane %v5894_v47, 4 }
 0x355   :  { %v1895_v35 = vsel %vm463_vm6, %v1810_v23, %v1894_v14  ;;  %v1816_v29 = vrot.slane %v1815_v51, 1  ;;  %v1821_v2 = vrot.slane %v1820_v34, 2  ;;  %v1826_v58 = vrot.slane %v1825_v6, 4  ;;  %v5997_v18 = vpop.f32.mrb[24].mxu0 }
 0x356   :  { %v6002_v32 = vpop.f32.mrb[25].mxu0  ;;  %v1861_v14 = vrot.slane %v5878_v37, 4 }
 0x357   :  { %v1817_v27 = vmax.f32 %v1815_v51, %v1816_v29  ;;  %v1822_v30 = vmax.f32 %v1820_v34, %v1821_v2  ;;  %v1827_v22 = vmax.f32 %v1825_v6, %v1826_v58  ;;  %v1832_v9 = vmax.f32 %v6002_v32, %v5997_v18 }
 0x358   :  { %v6024_v42 = vmax.f32 %v5878_v37, %v1861_v14 }
 0x359   :  { %v1896_v23 = vsel %vm465_vm7, %v1817_v27, %v1895_v35  ;;  %v1828_v28 = vrot.slane %v1827_v22, 2  ;;  %v1833_v16 = vrot.slane %v1832_v9, 4  ;;  %v6012_v54 = vpop.f32.mrb[26].mxu0  ;;  %v1823_v29 = vrot.slane %v1822_v30, 1 }
 0x35a   :  { %v1906_v34 = vmax.f32 %v5927_v44, %v1896_v23  ;;  %v6016_v6 = vpop.f32.mrb[27].mxu0  ;;  %v6027_v23 = vmax.f32 %v5894_v47, %v1868_v55 }
 0x35b   :  { %v1829_v2 = vmax.f32 %v1827_v22, %v1828_v28  ;;  %v1834_v12 = vmax.f32 %v1832_v9, %v1833_v16  ;;  %v1839_v24 = vmax.f32 %v6016_v6, %v6012_v54  ;;  %v1824_v58 = vmax.f32 %v1822_v30, %v1823_v29 }
 0x35c   :  { %v1908_v35 = vsub.f32 %v5927_v44, %v1906_v34  ;;  %v1916_v27 = vcombine.high %v1906_v34, %v1906_v34  ;;  %v1923_v39 = vrot.slane %v1906_v34, %v5502_v61 }
 0x35d   :  { %v1830_v51 = vrot.slane %v1829_v2, 1  ;;  %v1835_v13 = vrot.slane %v1834_v12, 2  ;;  %v1840_v41 = vrot.slane %v1839_v24, 4 }
 0x35e   :  { %v1910_v28 = vmul.f32 1.442695, %v1908_v35  ;;  %v1930_v22 = vrot.slane %v1916_v27, %v5502_v61  ;;  %v1931_v9 = vcombine.high %v1923_v39, %v1923_v39  ;;  %v1939_v16 = vrot.slane %v1923_v39, %v5502_v61 }
 0x35f   :  { %v1831_v56 = vmax.f32 %v1829_v2, %v1830_v51  ;;  %v1836_v44 = vmax.f32 %v1834_v12, %v1835_v13 }
 0x360   :  { %4364 = vpow2.f32 %v1910_v28  ;;  %v1932_v34 = vcombine.high %v1930_v22, %v1930_v22  ;;  %v1946_v37 = vrot.slane %v1930_v22, %v5502_v61  ;;  %v1953_v14 = vrot.slane %v1931_v9, %v5502_v61 }
 0x361   :  { %v1961_v47 = vcombine.high %v1939_v16, %v1939_v16  ;;  %v2017_v55 = vrot.slane %v1939_v16, %v5523_v45  ;;  %v1897_v35 = vsel %vm453_vm1, %v1831_v56, %v1824_v58  ;;  %v1837_v26 = vrot.slane %v1836_v44, 1 }
 0x362   :  { %v1960_v27 = vrot.slane %v1932_v34, %v5502_v61  ;;  %v1962_v4 = vcombine.high %v1946_v37, %v1946_v37  ;;  %v1963_v39 = vcombine.high %v1953_v14, %v1953_v14  ;;  %v2021_v30 = vrot.slane %v1953_v14, %v5523_v45 }
 0x363   :  { %v2025_v13 = vrot.slane %v1961_v47, %v5523_v45  ;;  %v2033_v51 = vrot.slane %v1946_v37, %v5523_v45  ;;  %v2094_v29 = vsub.f32 %v5931_v59, %v2017_v55  ;;  %v2095_v2 = vsub.f32 %v5929_v8, %v2017_v55 }
 0x364   :  { %v1964_v12 = vcombine.high %v1960_v27, %v1960_v27  ;;  %v2029_v28 = vrot.slane %v1963_v39, %v5523_v45  ;;  %v2037_v56 = vrot.slane %v1960_v27, %v5523_v45  ;;  %v2041_v58 = vrot.slane %v1962_v4, %v5523_v45 }
 0x365   :  { %v2096_v22 = vsub.f32 %v5937_v17, %v2021_v30  ;;  %v2097_v9 = vsub.f32 %v5935_v3, %v2021_v30  ;;  %v2098_v16 = vsub.f32 %v5943_v38, %v2025_v13  ;;  %v2099_v34 = vsub.f32 %v5941_v60, %v2025_v13 }
 0x366   :  { %v2045_v37 = vrot.slane %v1964_v12, %v5523_v45  ;;  %v2100_v59 = vsub.f32 %v5949_v49, %v2029_v28  ;;  %v2101_v8 = vsub.f32 %v5947_v1, %v2029_v28  ;;  %v2102_v14 = vsub.f32 %v5955_v0, %v2033_v51 }
 0x367   :  { %v2103_v47 = vsub.f32 %v5953_v63, %v2033_v51  ;;  %v2104_v4 = vsub.f32 %v5962_v43, %v2037_v56  ;;  %v2105_v17 = vsub.f32 %v5960_v57, %v2037_v56  ;;  %v2106_v3 = vsub.f32 %v5969_v36, %v2041_v58 }
 0x368   :  { %v2107_v38 = vsub.f32 %v5967_v33, %v2041_v58  ;;  %v2108_v60 = vsub.f32 %v5976_v19, %v2045_v37  ;;  %v2109_v55 = vsub.f32 %v5974_v25, %v2045_v37  ;;  %v2126_v27 = vmul.f32 1.442695, %v2094_v29 }
 0x369   :  { %v2128_v49 = vmul.f32 1.442695, %v2095_v2  ;;  %v2130_v39 = vmul.f32 1.442695, %v2096_v22  ;;  %v2132_v1 = vmul.f32 1.442695, %v2097_v9  ;;  %v1838_v0 = vmax.f32 %v1836_v44, %v1837_v26 }
 0x36a   :  { %v6059_v30 = vpop.eup %4364  ;;  %4366 = vpow2.f32 %v2126_v27  ;;  %v2134_v63 = vmul.f32 1.442695, %v2098_v16  ;;  %v1841_v43 = vmax.f32 %v1839_v24, %v1840_v41  ;;  %v1863_v57 = vrot.slane %v6024_v42, 2 }
 0x36b   :  { %v1870_v36 = vrot.slane %v6027_v23, 2  ;;  %4368 = vpow2.f32 %v2128_v49  ;;  %v2136_v33 = vmul.f32 1.442695, %v2099_v34  ;;  %4069 = vmatprep.mubr.f32.mxu0 %v6059_v30  ;;  %v2138_v25 = vmul.f32 1.442695, %v2100_v59 }
 0x36c   :  { %4370 = vpow2.f32 %v2130_v39  ;;  %v6905_v19 = vrot.slane %v6000_v50, 2  ;;  %v6906_v51 = vrot.slane %v6007_v31, 2  ;;  %v2140_v41 = vmul.f32 1.442695, %v2101_v8 }
 0x36d   :  { %4372 = vpow2.f32 %v2132_v1  ;;  %v2142_v26 = vmul.f32 1.442695, %v2102_v14  ;;  %v1898_v24 = vsel %vm455_vm2, %v1838_v0, %v1897_v35  ;;  %v1842_v44 = vrot.slane %v1841_v43, 2 }
 0x36e   :  { %v1850_v13 = vmax.f32 %v6000_v50, %v6905_v19  ;;  %v1857_v29 = vmax.f32 %v6007_v31, %v6906_v51  ;;  %4374 = vpow2.f32 %v2134_v63  ;;  %v1864_v2 = vmax.f32 %v6024_v42, %v1863_v57 }
 0x36f   :  { %v1871_v12 = vmax.f32 %v6027_v23, %v1870_v36  ;;  %4376 = vpow2.f32 %v2136_v33  ;;  %v2144_v28 = vmul.f32 1.442695, %v2103_v47  ;;  %v2146_v56 = vmul.f32 1.442695, %v2104_v4 }
 0x370   :  { %4378 = vpow2.f32 %v2138_v25  ;;  %v1843_v50 = vmax.f32 %v1841_v43, %v1842_v44  ;;  %v1851_v58 = vrot.slane %v1850_v13, 1  ;;  %v2148_v22 = vmul.f32 1.442695, %v2105_v17 }
 0x371   :  { %4380 = vpow2.f32 %v2140_v41  ;;  %v1858_v31 = vrot.slane %v1857_v29, 1  ;;  %v2150_v9 = vmul.f32 1.442695, %v2106_v3  ;;  %v1865_v34 = vrot.slane %v1864_v2, 1 }
 0x372   :  { %4382 = vpow2.f32 %v2142_v26  ;;  %v1844_v16 = vrot.slane %v1843_v50, 1  ;;  %v1872_v37 = vrot.slane %v1871_v12, 1  ;;  %v2152_v35 = vmul.f32 1.442695, %v2107_v38 }
 0x373   :  { %4384 = vpow2.f32 %v2144_v28  ;;  %v2154_v42 = vmul.f32 1.442695, %v2108_v60  ;;  %v1852_v14 = vmax.f32 %v1850_v13, %v1851_v58  ;;  %v2156_v47 = vmul.f32 1.442695, %v2109_v55 }
 0x374   :  { %v6073_v59 = vpop.eup %4366  ;;  %4386 = vpow2.f32 %v2146_v56  ;;  %v1845_v23 = vmax.f32 %v1843_v50, %v1844_v16  ;;  %v1859_v17 = vmax.f32 %v1857_v29, %v1858_v31  ;;  %v1866_v49 = vmax.f32 %v1864_v2, %v1865_v34 }
 0x375   :  { %v6075_v8 = vpop.eup %4368  ;;  %4388 = vpow2.f32 %v2148_v22  ;;  %v1873_v39 = vmax.f32 %v1871_v12, %v1872_v37 }
 0x376   :  { %v6077_v4 = vpop.eup %4370  ;;  %4390 = vpow2.f32 %v2150_v9  ;;  %v2190_v3 = vadd.f32 %v6075_v8, %v6073_v59  ;;  %v1899_v27 = vsel %vm457_vm3, %v1845_v23, %v1898_v24 }
 0x377   :  { %v6082_v38 = vpop.eup %4372  ;;  %4392 = vpow2.f32 %v2152_v35  ;;  %v1900_v60 = vsel %vm459_vm4, %v1852_v14, %v1899_v27  ;;  %v6116_v14 = vpop.f32.mrb[40].mxu1 }
 0x378   :  { %v6085_v1 = vpop.eup %4374  ;;  %4394 = vpow2.f32 %v2154_v42  ;;  %v2191_v55 = vrot.slane %v2190_v3, 4  ;;  %v2197_v63 = vadd.f32 %v6082_v38, %v6077_v4  ;;  %v1901_v0 = vsel %vm461_vm5, %v1859_v17, %v1900_v60 }
 0x379   :  { %v6090_v43 = vpop.eup %4376  ;;  %4396 = vpow2.f32 %v2156_v47  ;;  %v1902_v57 = vsel %vm463_vm6, %v1866_v49, %v1901_v0  ;;  %v6120_v49 = vpop.f32.mrb[41].mxu1 }
 0x37a   :  { %v6093_v36 = vpop.eup %4378  ;;  %v2192_v33 = vadd.f32 %v2191_v55, %v2190_v3  ;;  %v2198_v25 = vrot.slane %v2197_v63, 4  ;;  %v2204_v19 = vadd.f32 %v6090_v43, %v6085_v1  ;;  %v1903_v13 = vsel %vm465_vm7, %v1873_v39, %v1902_v57 }
 0x37b   :  { %v6098_v51 = vpop.eup %4380  ;;  %v1907_v29 = vmax.f32 %v5924_v20, %v1903_v13 }
 0x37c   :  { %v6101_v41 = vpop.eup %4382  ;;  %v2193_v26 = vrot.slane %v2192_v33, 2  ;;  %v2199_v24 = vadd.f32 %v2198_v25, %v2197_v63  ;;  %v2205_v44 = vrot.slane %v2204_v19, 4  ;;  %v2211_v2 = vadd.f32 %v6098_v51, %v6093_v36 }
 0x37d   :  { %v6105_v12 = vpop.eup %4384  ;;  %v1909_v28 = vsub.f32 %v5924_v20, %v1907_v29  ;;  %v1965_v56 = vcombine.high %v1907_v29, %v1907_v29  ;;  %v1972_v50 = vrot.slane %v1907_v29, %v5502_v61 }
 0x37e   :  { %v6109_v58 = vpop.eup %4386  ;;  %v2194_v22 = vadd.f32 %v2193_v26, %v2192_v33  ;;  %v2200_v31 = vrot.slane %v2199_v24, 2  ;;  %v2206_v9 = vadd.f32 %v2205_v44, %v2204_v19  ;;  %v2212_v16 = vrot.slane %v2211_v2, 4 }
 0x37f   :  { %6907 = vst [vmem:[#allocation73_spill] sm:$0xff] %v6109_v58  ;;  %v6111_v34 = vpop.eup %4388  ;;  %v2218_v37 = vadd.f32 %v6105_v12, %v6101_v41  ;;  %v1912_v35 = vmul.f32 1.442695, %v1909_v28  ;;  %v1979_v42 = vrot.slane %v1965_v56, %v5502_v61  ;;  %v1980_v23 = vcombine.high %v1972_v50, %v1972_v50 }
 0x380   :  { %6908 = vst [vmem:[#allocation76_spill] sm:$0xff] %v6111_v34  ;;  %v6118_v20 = vpop.eup %4390  ;;  %v2195_v47 = vrot.slane %v2194_v22, 1  ;;  %v2201_v17 = vadd.f32 %v2200_v31, %v2199_v24  ;;  %v2207_v3 = vrot.slane %v2206_v9, 2  ;;  %v2213_v27 = vadd.f32 %v2212_v16, %v2211_v2  ;;  %v6133_v2 = vpop.f32.mrb[42].mxu1 }
 0x381   :  { %6909 = vst [vmem:[#allocation75_spill] sm:$0xff] %v6118_v20  ;;  %v6122_v39 = vpop.eup %4392  ;;  %v2219_v60 = vrot.slane %v2218_v37, 4  ;;  %v2225_v55 = vadd.f32 %v6111_v34, %v6109_v58  ;;  %4398 = vpow2.f32 %v1912_v35  ;;  %v1981_v63 = vcombine.high %v1979_v42, %v1979_v42  ;;  %v6137_v16 = vpop.f32.mrb[43].mxu1 }
 0x382   :  { %6910 = vst [vmem:[#allocation35_spill] sm:$0xff] %v6122_v39  ;;  %v6126_v0 = vpop.eup %4394  ;;  %v2196_v57 = vadd.f32 %v2195_v47, %v2194_v22  ;;  %v2202_v33 = vrot.slane %v2201_v17, 1  ;;  %v2208_v25 = vadd.f32 %v2207_v3, %v2206_v9  ;;  %v2214_v19 = vrot.slane %v2213_v27, 2 }
 0x383   :  { %6911 = vst [vmem:[#allocation36_spill] sm:$0xff] %v6126_v0  ;;  %v6128_v13 = vpop.eup %4396  ;;  %v2220_v29 = vadd.f32 %v2219_v60, %v2218_v37  ;;  %v2226_v26 = vrot.slane %v2225_v55, 4  ;;  %v2232_v24 = vadd.f32 %v6122_v39, %v6118_v20  ;;  %v1988_v44 = vrot.slane %v1972_v50, %v5502_v61 }
 0x384   :  { %6912 = vst [vmem:[#allocation37_spill] sm:$0xff] %v6128_v13  ;;  %v2203_v28 = vadd.f32 %v2202_v33, %v2201_v17  ;;  %v2209_v56 = vrot.slane %v2208_v25, 1  ;;  %v2215_v31 = vadd.f32 %v2214_v19, %v2213_v27  ;;  %v2239_v22 = vadd.f32 %v6128_v13, %v6126_v0  ;;  %v6142_v33 = vpop.f32.mrb[44].mxu1 }
 0x385   :  { %v2221_v9 = vrot.slane %v2220_v29, 2  ;;  %v2227_v35 = vadd.f32 %v2226_v26, %v2225_v55  ;;  %v2233_v47 = vrot.slane %v2232_v24, 4  ;;  %v1995_v37 = vrot.slane %v1979_v42, %v5502_v61  ;;  %v6146_v26 = vpop.f32.mrb[45].mxu1 }
 0x386   :  { %v2210_v3 = vadd.f32 %v2209_v56, %v2208_v25  ;;  %v2216_v60 = vrot.slane %v2215_v31, 1  ;;  %v2240_v39 = vrot.slane %v2239_v22, 4  ;;  %v2318_v50 = vsel %vm453_vm1, %v2203_v28, %v2196_v57 }
 0x387   :  { %v2222_v20 = vadd.f32 %v2221_v9, %v2220_v29  ;;  %v2228_v34 = vrot.slane %v2227_v35, 2  ;;  %v2234_v17 = vadd.f32 %v2233_v47, %v2232_v24  ;;  %v2002_v27 = vrot.slane %v1980_v23, %v5502_v61  ;;  %v6151_v47 = vpop.f32.mrb[46].mxu1 }
 0x388   :  { %v2217_v19 = vadd.f32 %v2216_v60, %v2215_v31  ;;  %v2241_v13 = vadd.f32 %v2240_v39, %v2239_v22  ;;  %v2319_v0 = vsel %vm455_vm2, %v2210_v3, %v2318_v50  ;;  %v2009_v55 = vrot.slane %v1981_v63, %v5502_v61 }
 0x389   :  { %v2223_v42 = vrot.slane %v2222_v20, 1  ;;  %v2229_v25 = vadd.f32 %v2228_v34, %v2227_v35  ;;  %v2235_v56 = vrot.slane %v2234_v17, 2  ;;  %v2010_v58 = vcombine.high %v1988_v44, %v1988_v44 }
 0x38a   :  { %v2242_v57 = vrot.slane %v2241_v13, 2  ;;  %v2320_v29 = vsel %vm457_vm3, %v2217_v19, %v2319_v0  ;;  %v2011_v24 = vcombine.high %v1995_v37, %v1995_v37  ;;  %v2012_v28 = vcombine.high %v2002_v27, %v2002_v27  ;;  %v6157_v0 = vpop.f32.mrb[47].mxu1 }
 0x38b   :  { %v6149_v23 = vpop.eup %4398  ;;  %v2224_v9 = vadd.f32 %v2223_v42, %v2222_v20  ;;  %v2230_v31 = vrot.slane %v2229_v25, 1  ;;  %v2236_v39 = vadd.f32 %v2235_v56, %v2234_v17  ;;  %v2013_v22 = vcombine.high %v2009_v55, %v2009_v55 }
 0x38c   :  { %v2243_v61 = vadd.f32 %v2242_v57, %v2241_v13  ;;  %v2049_v63 = vrot.slane %v1988_v44, %v5523_v45  ;;  %v2053_v34 = vrot.slane %v2002_v27, %v5523_v45  ;;  %v2057_v35 = vrot.slane %v2010_v58, %v5523_v45  ;;  %4070 = vmatmul.mubr.f32.vlgmr.msra.gmra.mrb[28].mxu0 %v6149_v23 }
 0x38d   :  { %v2231_v3 = vadd.f32 %v2230_v31, %v2229_v25  ;;  %v2237_v60 = vrot.slane %v2236_v39, 1  ;;  %v2321_v20 = vsel %vm459_vm4, %v2224_v9, %v2320_v29  ;;  %v2061_v50 = vrot.slane %v2012_v28, %v5523_v45  ;;  %4273 = vmatpush3.bf16.msra.mxu0 %v5852_v5  ;;  %4104 = vmatprep.mubr.f32.mxu0 %v6073_v59  ;;  %v6172_v5 = vpop.f32.mrb[48].mxu1  ;;  %v6913_v31 = vld [vmem:[#allocation67_spill] sm:$0xff] }
 0x38e   :  { %v2244_v13 = vrot.slane %v2243_v61, 1  ;;  %v2065_v44 = vrot.slane %v1995_v37, %v5523_v45  ;;  %v2069_v17 = vrot.slane %v2009_v55, %v5523_v45  ;;  %v2073_v58 = vrot.slane %v2011_v24, %v5523_v45  ;;  %4275 = vmatprep.subr.bf16.mxu0 %v5866_v7  ;;  %v6177_v57 = vpop.f32.mrb[49].mxu1 }
 0x38f   :  { %v2238_v27 = vadd.f32 %v2237_v60, %v2236_v39  ;;  %v2322_v19 = vsel %vm461_vm5, %v2231_v3, %v2321_v20  ;;  %v6169_v42 = vrot.slane %v2013_v22, %v5523_v45  ;;  %v2110_v25 = vsub.f32 %v5983_v53, %v2049_v63  ;;  %v6193_v39 = vpop.f32.mrb[50].mxu1  ;;  %v6916_v20 = vld [vmem:[#allocation68_spill] sm:$0xff] }
 0x390   :  { %v2245_v59 = vadd.f32 %v2244_v13, %v2243_v61  ;;  %v2111_v56 = vsub.f32 %v5981_v40, %v2049_v63  ;;  %v2112_v37 = vsub.f32 %v5991_v21, %v2053_v34  ;;  %v2113_v55 = vsub.f32 %v5988_v11, %v2053_v34  ;;  %v6199_v63 = vpop.f32.mrb[51].mxu1 }
 0x391   :  { %v2323_v29 = vsel %vm463_vm6, %v2238_v27, %v2322_v19  ;;  %v2114_v24 = vsub.f32 %v6002_v32, %v2057_v35  ;;  %v2115_v45 = vsub.f32 %v5997_v18, %v2057_v35  ;;  %v2116_v28 = vsub.f32 %v6016_v6, %v2061_v50  ;;  %4277 = vmatpush3.bf16.msra.mxu0 %v5866_v7  ;;  %v6914_v7 = vld [vmem:[#allocation71_spill] sm:$0xff] }
 0x392   :  { %v2324_v53 = vsel %vm465_vm7, %v2245_v59, %v2323_v29  ;;  %v2117_v40 = vsub.f32 %v6012_v54, %v2061_v50  ;;  %v2118_v21 = vsub.f32 %v5846_v46, %v2065_v44  ;;  %v2119_v11 = vsub.f32 %v5844_v52, %v2065_v44  ;;  %4279 = vmatprep.subr.bf16.mxu0 %v5880_v15  ;;  %v6915_v54 = vld [vmem:[#allocation72_spill] sm:$0xff] }
 0x393   :  { %v2120_v9 = vsub.f32 %v5858_v10, %v2069_v17  ;;  %v2121_v32 = vsub.f32 %v5854_v62, %v2069_v17  ;;  %v2122_v18 = vsub.f32 %v5872_v48, %v2073_v58  ;;  %v2123_v6 = vsub.f32 %v6913_v31, %v2073_v58  ;;  %v6205_v48 = vld [vmem:[#allocation17] ss:$0 sm:$0xff] }
 0x394   :  { %v2124_v22 = vsub.f32 %v6914_v7, %v6169_v42  ;;  %v2125_v46 = vsub.f32 %v6915_v54, %v6169_v42  ;;  %v2158_v61 = vmul.f32 1.442695, %v2110_v25  ;;  %v2160_v52 = vmul.f32 1.442695, %v2111_v56  ;;  %v6213_v42 = vpop.f32.mrb[52].mxu1  ;;  %v6918_v25 = vld [vmem:[#allocation66_spill] sm:$0xff] }
 0x395   :  { %v2162_v34 = vmul.f32 1.442695, %v2112_v37  ;;  %v2164_v10 = vmul.f32 1.442695, %v2113_v55  ;;  %4281 = vmatpush3.bf16.msra.mxu0 %v5880_v15  ;;  %v6203_v62 = vadd.f32 %v6059_v30, %v2324_v53  ;;  %v2166_v35 = vmul.f32 1.442695, %v2114_v24 }
 0x396   :  { %4400 = vpow2.f32 %v2158_v61  ;;  %v2168_v3 = vmul.f32 1.442695, %v2115_v45  ;;  %v2170_v60 = vmul.f32 1.442695, %v2116_v28  ;;  %4283 = vmatprep.subr.bf16.mxu0 %v6916_v20  ;;  %v2172_v50 = vmul.f32 1.442695, %v2117_v40 }
 0x397   :  { %4402 = vpow2.f32 %v2160_v52  ;;  %v2174_v13 = vmul.f32 1.442695, %v2118_v21  ;;  %v2176_v44 = vmul.f32 1.442695, %v2119_v11  ;;  %v2178_v17 = vmul.f32 1.442695, %v2120_v9 }
 0x398   :  { %4404 = vpow2.f32 %v2162_v34  ;;  %v2180_v58 = vmul.f32 1.442695, %v2121_v32  ;;  %v2182_v27 = vmul.f32 1.442695, %v2122_v18  ;;  %v2184_v15 = vmul.f32 1.442695, %v2123_v6 }
 0x399   :  { %4406 = vpow2.f32 %v2164_v10  ;;  %v2186_v30 = vmul.f32 1.442695, %v2124_v22  ;;  %4285 = vmatpush3.bf16.msra.mxu0 %v6916_v20  ;;  %v6211_v19 = vadd.f32 %v6116_v14, %v6205_v48  ;;  %v6218_v59 = vadd.f32 %v6205_v48, %v6120_v49  ;;  %v6228_v55 = vpop.f32.mrb[53].mxu1  ;;  %v6924_v40 = vld [vmem:[#allocation70_spill] sm:$0xff] }
 0x39a   :  { %4408 = vpow2.f32 %v2166_v35  ;;  %4287 = vmatprep.subr.bf16.mxu0 %v6918_v25  ;;  %v6222_v56 = vadd.f32 %v6133_v2, %v6205_v48  ;;  %v6226_v37 = vadd.f32 %v6205_v48, %v6137_v16  ;;  %v6234_v29 = vadd.f32 %v6142_v33, %v6205_v48  ;;  %v6240_v2 = vpop.f32.mrb[54].mxu1 }
 0x39b   :  { %6917 = vst [vmem:[#allocation38_spill] sm:$0xff] %v6211_v19  ;;  %6919 = vst [vmem:[#allocation39_spill] sm:$0xff] %v6218_v59  ;;  %4410 = vpow2.f32 %v2168_v3  ;;  %v2573_v14 = vsel %vm264_vm0, %v6211_v19, 0.0  ;;  %v6238_v49 = vadd.f32 %v6205_v48, %v6146_v26  ;;  %v2572_v16 = vsel %vm264_vm0, %v6218_v59, 0.0  ;;  %v6248_v28 = vpop.f32.mrb[55].mxu1  ;;  %v6927_v3 = vld [vmem:[#allocation69_spill] sm:$0xff] }
 0x39c   :  { %6920 = vst [vmem:[#allocation40_spill] sm:$0xff] %v6222_v56  ;;  %6921 = vst [vmem:[#allocation41_spill] sm:$0xff] %v6226_v37  ;;  %4412 = vpow2.f32 %v2170_v60  ;;  %v2582_v24 = vsel %vm264_vm0, %v6222_v56, 0.0  ;;  %v2581_v45 = vsel %vm264_vm0, %v6226_v37, 0.0  ;;  %v2574_v33 = vadd.f32 %v2573_v14, %v2572_v16  ;;  %v6264_v6 = vpop.f32.mrb[56].mxu1 }
 0x39d   :  { %6922 = vst [vmem:[#allocation42_spill] sm:$0xff] %v6234_v29  ;;  %6923 = vst [vmem:[#allocation43_spill] sm:$0xff] %v6238_v49  ;;  %4414 = vpow2.f32 %v2172_v50  ;;  %4289 = vmatpush3.bf16.msra.mxu0 %v6918_v25  ;;  %v2583_v26 = vadd.f32 %v2582_v24, %v2581_v45  ;;  %v2591_v53 = vsel %vm264_vm0, %v6234_v29, 0.0  ;;  %v2590_v21 = vsel %vm264_vm0, %v6238_v49, 0.0  ;;  %v6272_v61 = vpop.f32.mrb[57].mxu1 }
 0x39e   :  { %4416 = vpow2.f32 %v2174_v13  ;;  %4291 = vmatprep.subr.bf16.mxu0 %v6924_v40  ;;  %v6258_v11 = vadd.f32 %v6151_v47, %v6205_v48  ;;  %v6262_v9 = vadd.f32 %v6205_v48, %v6157_v0  ;;  %v2575_v32 = vrot.slane %v2574_v33, 4 }
 0x39f   :  { %4418 = vpow2.f32 %v2176_v44  ;;  %v2584_v18 = vrot.slane %v2583_v26, 4  ;;  %v2592_v31 = vadd.f32 %v2591_v53, %v2590_v21  ;;  %v2188_v22 = vmul.f32 1.442695, %v2125_v46  ;;  %v6929_v21 = vld [vmem:[#allocation74_spill] sm:$0xff] }
 0x3a0   :  { %6925 = vst [vmem:[#allocation44_spill] sm:$0xff] %v6258_v11  ;;  %6926 = vst [vmem:[#allocation45_spill] sm:$0xff] %v6262_v9  ;;  %v6266_v7 = vpop.eup %4400  ;;  %4420 = vpow2.f32 %v2178_v17  ;;  %v2600_v54 = vsel %vm264_vm0, %v6258_v11, 0.0  ;;  %v2599_v47 = vsel %vm264_vm0, %v6262_v9, 0.0  ;;  %v2576_v52 = vadd.f32 %v2575_v32, %v2574_v33  ;;  %v6284_v17 = vpop.f32.mrb[58].mxu1 }
 0x3a1   :  { %v6274_v0 = vpop.eup %4402  ;;  %4422 = vpow2.f32 %v2180_v58  ;;  %4293 = vmatpush3.bf16.msra.mxu0 %v6924_v40  ;;  %v2585_v34 = vadd.f32 %v2584_v18, %v2583_v26  ;;  %v2593_v10 = vrot.slane %v2592_v31, 4  ;;  %v2601_v60 = vadd.f32 %v2600_v54, %v2599_v47  ;;  %v6290_v16 = vpop.f32.mrb[59].mxu1 }
 0x3a2   :  { %v6277_v35 = vpop.eup %4404  ;;  %4424 = vpow2.f32 %v2182_v27  ;;  %v2246_v46 = vadd.f32 %v6274_v0, %v6266_v7  ;;  %4295 = vmatprep.subr.bf16.mxu0 %v6927_v3  ;;  %v2577_v50 = vrot.slane %v2576_v52, 2 }
 0x3a3   :  { %v6282_v20 = vpop.eup %4406  ;;  %4426 = vpow2.f32 %v2184_v15  ;;  %v2586_v13 = vrot.slane %v2585_v34, 2  ;;  %v2594_v44 = vadd.f32 %v2593_v10, %v2592_v31  ;;  %v2602_v14 = vrot.slane %v2601_v60, 4 }
 0x3a4   :  { %v6286_v58 = vpop.eup %4408  ;;  %4428 = vpow2.f32 %v2186_v30  ;;  %v2247_v25 = vrot.slane %v2246_v46, 4  ;;  %v2253_v27 = vadd.f32 %v6282_v20, %v6277_v35  ;;  %v2578_v15 = vadd.f32 %v2577_v50, %v2576_v52 }
 0x3a5   :  { %v6292_v24 = vpop.eup %4410  ;;  %4430 = vpow2.f32 %v2188_v22  ;;  %4297 = vmatpush3.bf16.msra.mxu0 %v6927_v3  ;;  %v2587_v45 = vadd.f32 %v2586_v13, %v2585_v34  ;;  %v2595_v33 = vrot.slane %v2594_v44, 2  ;;  %v6305_v31 = vadd.f32 %v6172_v5, %v6205_v48  ;;  %v6307_v22 = vpop.f32.mrb[60].mxu1 }
 0x3a6   :  { %v6295_v26 = vpop.eup %4412  ;;  %v2248_v53 = vadd.f32 %v2247_v25, %v2246_v46  ;;  %v2254_v40 = vrot.slane %v2253_v27, 4  ;;  %v2260_v30 = vadd.f32 %v6292_v24, %v6286_v58  ;;  %4432 = vrcp.f32 %v6203_v62  ;;  %4299 = vmatprep.subr.bf16.mxu0 %v6929_v21  ;;  %v6313_v62 = vpop.f32.mrb[61].mxu1 }
 0x3a7   :  { %6928 = vst [vmem:[#allocation46_spill] sm:$0xff] %v6295_v26  ;;  %v6301_v32 = vpop.eup %4414  ;;  %v2579_v18 = vrot.slane %v2578_v15, 1  ;;  %6931 = vst [vmem:[#allocation48_spill] sm:$0xff] %v6305_v31  ;;  %v2588_v3 = vrot.slane %v2587_v45, 1  ;;  %v6318_v50 = vadd.f32 %v2595_v33, %v2594_v44  ;;  %v2603_v5 = vadd.f32 %v2602_v14, %v2601_v60 }
 0x3a8   :  { %6930 = vst [vmem:[#allocation47_spill] sm:$0xff] %v6301_v32  ;;  %v6309_v54 = vpop.eup %4416  ;;  %v2249_v47 = vrot.slane %v2248_v53, 2  ;;  %v2255_v52 = vadd.f32 %v2254_v40, %v2253_v27  ;;  %v2261_v34 = vrot.slane %v2260_v30, 4  ;;  %v2267_v10 = vadd.f32 %v6301_v32, %v6295_v26 }
 0x3a9   :  { %6932 = vst [vmem:[#allocation49_spill] sm:$0xff] %v6309_v54  ;;  %v6315_v46 = vpop.eup %4418  ;;  %4301 = vmatpush3.bf16.msra.mxu0 %v6929_v21  ;;  %v2580_v29 = vadd.f32 %v2579_v18, %v2578_v15  ;;  %v6328_v37 = vsel %vm264_vm0, %v6305_v31, 0.0  ;;  %v6330_v21 = vpop.f32.mrb[62].mxu1  ;;  %v2589_v18 = vadd.f32 %v2588_v3, %v2587_v45  ;;  %v2597_v31 = vrot.slane %v6318_v50, 1 }
 0x3aa   :  { %6933 = vst [vmem:[#allocation50_spill] sm:$0xff] %v6315_v46  ;;  %v6320_v13 = vpop.eup %4420  ;;  %v2250_v25 = vadd.f32 %v2249_v47, %v2248_v53  ;;  %v2256_v9 = vrot.slane %v2255_v52, 2  ;;  %v2262_v11 = vadd.f32 %v2261_v34, %v2260_v30  ;;  %v2268_v27 = vrot.slane %v2267_v10, 4  ;;  %v6335_v30 = vpop.f32.mrb[63].mxu1 }
 0x3ab   :  { %6934 = vst [vmem:[#allocation51_spill] sm:$0xff] %v6320_v13  ;;  %v6322_v40 = vpop.eup %4422  ;;  %v2274_v49 = vadd.f32 %v6315_v46, %v6309_v54 }
 0x3ac   :  { %6935 = vst [vmem:[#allocation52_spill] sm:$0xff] %v6322_v40  ;;  %v6332_v44 = vpop.eup %4424  ;;  %v2251_v60 = vrot.slane %v2250_v25, 1  ;;  %v2257_v14 = vadd.f32 %v2256_v9, %v2255_v52  ;;  %v2263_v33 = vrot.slane %v2262_v11, 2  ;;  %v2269_v53 = vadd.f32 %v2268_v27, %v2267_v10  ;;  %4105 = vmatmul.mubr.f32.vlgmr.msra.gmra.mrb[30].mxu0 %v6075_v8 }
 0x3ad   :  { %6936 = vst [vmem:[#allocation53_spill] sm:$0xff] %v6332_v44  ;;  %v6337_v47 = vpop.eup %4426  ;;  %v2275_v34 = vrot.slane %v2274_v49, 4  ;;  %v2281_v15 = vadd.f32 %v6322_v40, %v6320_v13  ;;  %4107 = vmatprep.mubr.f32.mxu0 %v6077_v4  ;;  %v2604_v27 = vrot.slane %v2603_v5, 2  ;;  %v6349_v40 = vpop.f32.mrb[64].mxu1 }
 0x3ae   :  { %6937 = vst [vmem:[#allocation54_spill] sm:$0xff] %v6337_v47  ;;  %v6343_v56 = vpop.eup %4428  ;;  %v2258_v9 = vrot.slane %v2257_v14, 1  ;;  %v2264_v52 = vadd.f32 %v2263_v33, %v2262_v11  ;;  %v2270_v10 = vrot.slane %v2269_v53, 2  ;;  %v2252_v59 = vadd.f32 %v2251_v60, %v2250_v25  ;;  %v6354_v11 = vpop.f32.mrb[65].mxu1 }
 0x3af   :  { %6938 = vst [vmem:[#allocation55_spill] sm:$0xff] %v6343_v56  ;;  %v6345_v8 = vpop.eup %4430  ;;  %v2276_v19 = vadd.f32 %v2275_v34, %v2274_v49  ;;  %v2282_v46 = vrot.slane %v2281_v15, 4  ;;  %v2288_v54 = vadd.f32 %v6337_v47, %v6332_v44  ;;  %v6357_v60 = vmul.f32 0.0625, %v2580_v29 }
 0x3b0   :  { %6939 = vst [vmem:[#allocation56_spill] sm:$0xff] %v6345_v8  ;;  %v4433_v4 = vpop.eup %4432  ;;  %v2259_v45 = vadd.f32 %v2258_v9, %v2257_v14  ;;  %v2265_v3 = vrot.slane %v2264_v52, 1  ;;  %v2271_v13 = vadd.f32 %v2270_v10, %v2269_v53  ;;  %v2295_v32 = vadd.f32 %v6345_v8, %v6343_v56  ;;  %4108 = vmatmul.mubr.f32.gmra.mrb[32].mxu0 %v6082_v38  ;;  %v6360_v38 = vpop.f32.mrb[66].mxu1 }
 0x3b1   :  { %v2277_v33 = vrot.slane %v2276_v19, 2  ;;  %v2283_v25 = vadd.f32 %v2282_v46, %v2281_v15  ;;  %v2289_v49 = vrot.slane %v2288_v54, 4  ;;  %4184 = vmatprep.mubr.f32.mxu1 %v4433_v4  ;;  %4110 = vmatprep.mubr.f32.mxu0 %v6085_v1  ;;  %v2717_v56 = vmul.f32 0.0625, %v2589_v18  ;;  %v6364_v29 = vpop.f32.mrb[67].mxu1 }
 0x3b2   :  { %v2266_v34 = vadd.f32 %v2265_v3, %v2264_v52  ;;  %v2272_v47 = vrot.slane %v2271_v13, 1  ;;  %v2296_v14 = vrot.slane %v2295_v32, 4  ;;  %v2325_v53 = vsel %vm453_vm1, %v2259_v45, %v2252_v59 }
 0x3b3   :  { %v2278_v9 = vadd.f32 %v2277_v33, %v2276_v19  ;;  %v2284_v10 = vrot.slane %v2283_v25, 2  ;;  %v2290_v8 = vadd.f32 %v2289_v49, %v2288_v54  ;;  %v2605_v1 = vadd.f32 %v2604_v27, %v2603_v5  ;;  %v6367_v19 = vld [vmem:[#allocation8] ss:$0 sm:$0xff] }
 0x3b4   :  { %v2273_v44 = vadd.f32 %v2272_v47, %v2271_v13  ;;  %v2297_v26 = vadd.f32 %v2296_v14, %v2295_v32  ;;  %v2326_v46 = vsel %vm455_vm2, %v2266_v34, %v2325_v53  ;;  %4111 = vmatmul.mubr.f32.gmra.mrb[34].mxu0 %v6090_v43  ;;  %v2598_v59 = vadd.f32 %v2597_v31, %v6318_v50 }
 0x3b5   :  { %v2279_v15 = vrot.slane %v2278_v9, 1  ;;  %v2285_v52 = vadd.f32 %v2284_v10, %v2283_v25  ;;  %v2291_v4 = vrot.slane %v2290_v8, 2  ;;  %4113 = vmatprep.mubr.f32.mxu0 %v6093_v36  ;;  %v2606_v32 = vrot.slane %v2605_v1, 1  ;;  %v6379_v36 = vpop.f32.mrb[68].mxu1 }
 0x3b6   :  { %v2298_v54 = vrot.slane %v2297_v26, 2  ;;  %v2327_v13 = vsel %vm457_vm3, %v2273_v44, %v2326_v46  ;;  %v6373_v47 = vadd.f32 %v6205_v48, %v6177_v57  ;;  %v6377_v27 = vadd.f32 %v6193_v39, %v6205_v48  ;;  %v6391_v44 = vpop.f32.mrb[69].mxu1 }
 0x3b7   :  { %v2280_v43 = vadd.f32 %v2279_v15, %v2278_v9  ;;  %v2286_v5 = vrot.slane %v2285_v52, 1  ;;  %v2292_v18 = vadd.f32 %v2291_v4, %v2290_v8  ;;  %v6383_v31 = vadd.f32 %v6367_v19, %v2717_v56  ;;  %v6401_v53 = vpop.f32.mrb[70].mxu1  ;;  %v6940_v15 = vld [vmem:[#allocation73_spill] sm:$0xff] }
 0x3b8   :  { %v2299_v45 = vadd.f32 %v2298_v54, %v2297_v26  ;;  %4114 = vmatmul.mubr.f32.gmra.mrb[36].mxu0 %v6098_v51  ;;  %v2608_v50 = vsel %vm264_vm0, %v6373_v47, 0.0  ;;  %v6389_v57 = vadd.f32 %v6205_v48, %v6199_v63  ;;  %v2607_v56 = vadd.f32 %v2606_v32, %v2605_v1  ;;  %v6412_v46 = vpop.f32.mrb[71].mxu1 }
 0x3b9   :  { %v2287_v8 = vadd.f32 %v2286_v5, %v2285_v52  ;;  %v2293_v39 = vrot.slane %v2292_v18, 1  ;;  %v2328_v3 = vsel %vm459_vm4, %v2280_v43, %v2327_v13  ;;  %4116 = vmatprep.mubr.f32.mxu0 %v6101_v41  ;;  %v2610_v51 = vadd.f32 %v6328_v37, %v2608_v50 }
 0x3ba   :  { %v2300_v26 = vrot.slane %v2299_v45, 1  ;;  %v2618_v33 = vsel %vm264_vm0, %v6377_v27, 0.0  ;;  %v2617_v25 = vsel %vm264_vm0, %v6389_v57, 0.0  ;;  %v2718_v41 = vmul.f32 0.0625, %v2598_v59 }
 0x3bb   :  { %v2294_v63 = vadd.f32 %v2293_v39, %v2292_v18  ;;  %v2329_v49 = vsel %vm461_vm5, %v2287_v8, %v2328_v3  ;;  %v2611_v34 = vrot.slane %v2610_v51, 4  ;;  %v2619_v14 = vadd.f32 %v2618_v33, %v2617_v25  ;;  %v6941_v18 = vld [vmem:[#allocation76_spill] sm:$0xff] }
 0x3bc   :  { %v2301_v9 = vadd.f32 %v2300_v26, %v2299_v45  ;;  %4117 = vmatmul.mubr.f32.gmra.mrb[38].mxu0 %v6105_v12  ;;  %v6406_v37 = vadd.f32 %v6213_v42, %v6205_v48  ;;  %v6410_v10 = vadd.f32 %v6205_v48, %v6228_v55  ;;  %v6418_v12 = vadd.f32 %v6240_v2, %v6205_v48 }
 0x3bd   :  { %v2330_v1 = vsel %vm463_vm6, %v2294_v63, %v2329_v49  ;;  %4119 = vmatprep.mubr.f32.mxu0 %v6940_v15  ;;  %v2612_v52 = vadd.f32 %v2611_v34, %v2610_v51  ;;  %v2620_v4 = vrot.slane %v2619_v14, 4  ;;  %v2719_v42 = vmul.f32 0.0625, %v2607_v56  ;;  %v6943_v49 = vld [vmem:[#allocation35_spill] sm:$0xff] }
 0x3be   :  { %v2331_v59 = vsel %vm465_vm7, %v2301_v9, %v2330_v1  ;;  %v2627_v54 = vsel %vm264_vm0, %v6406_v37, 0.0  ;;  %v2626_v55 = vsel %vm264_vm0, %v6410_v10, 0.0  ;;  %v2636_v2 = vsel %vm264_vm0, %v6418_v12, 0.0 }
 0x3bf   :  { %v2335_v13 = vadd.f32 %v6149_v23, %v2331_v59  ;;  %v2613_v32 = vrot.slane %v2612_v52, 2  ;;  %v2621_v43 = vadd.f32 %v2620_v4, %v2619_v14  ;;  %v2628_v5 = vadd.f32 %v2627_v54, %v2626_v55  ;;  %v6942_v23 = vld [vmem:[#allocation75_spill] sm:$0xff] }
 0x3c0   :  { %4120 = vmatmul.mubr.f32.gmra.mrb[40].mxu0 %v6941_v18  ;;  %v6431_v45 = vadd.f32 %v6205_v48, %v6248_v28  ;;  %v6435_v50 = vadd.f32 %v6264_v6, %v6205_v48  ;;  %v6439_v8 = vadd.f32 %v6205_v48, %v6272_v61  ;;  %v6450_v56 = vadd.f32 %v6284_v17, %v6205_v48  ;;  %v6944_v17 = vld [vmem:[#allocation36_spill] sm:$0xff] }
 0x3c1   :  { %4434 = vrcp.f32 %v2335_v13  ;;  %4122 = vmatprep.mubr.f32.mxu0 %v6942_v23  ;;  %v2614_v39 = vadd.f32 %v2613_v32, %v2612_v52  ;;  %v2622_v3 = vrot.slane %v2621_v43, 2  ;;  %v2629_v51 = vrot.slane %v2628_v5, 4 }
 0x3c2   :  { %v2635_v26 = vsel %vm264_vm0, %v6431_v45, 0.0  ;;  %v2645_v28 = vsel %vm264_vm0, %v6435_v50, 0.0  ;;  %v2644_v6 = vsel %vm264_vm0, %v6439_v8, 0.0  ;;  %v6454_v34 = vadd.f32 %v6367_v19, %v2718_v41 }
 0x3c3   :  { %v2615_v61 = vrot.slane %v2614_v39, 1  ;;  %v2623_v33 = vadd.f32 %v2622_v3, %v2621_v43  ;;  %v2630_v25 = vadd.f32 %v2629_v51, %v2628_v5  ;;  %v2637_v63 = vadd.f32 %v2636_v2, %v2635_v26  ;;  %v6945_v5 = vld [vmem:[#allocation37_spill] sm:$0xff] }
 0x3c4   :  { %4123 = vmatmul.mubr.f32.gmra.mrb[42].mxu0 %v6943_v49  ;;  %v2646_v14 = vadd.f32 %v2645_v28, %v2644_v6  ;;  %v6458_v9 = vadd.f32 %v6205_v48, %v6290_v16  ;;  %v6462_v1 = vadd.f32 %v6307_v22, %v6205_v48  ;;  %v2654_v59 = vsel %vm264_vm0, %v6450_v56, 0.0 }
 0x3c5   :  { %4125 = vmatprep.mubr.f32.mxu0 %v6944_v17  ;;  %v2616_v15 = vadd.f32 %v2615_v61, %v2614_v39  ;;  %v2631_v52 = vrot.slane %v2630_v25, 2  ;;  %v2638_v4 = vrot.slane %v2637_v63, 4  ;;  %v6468_v41 = vadd.f32 %v6367_v19, %v2719_v42 }
 0x3c6   :  { %v2647_v54 = vrot.slane %v2646_v14, 4  ;;  %v2653_v16 = vsel %vm264_vm0, %v6458_v9, 0.0  ;;  %v6474_v55 = vadd.f32 %v6205_v48, %v6313_v62  ;;  %v6478_v22 = vadd.f32 %v6367_v19, %v6357_v60 }
 0x3c7   :  { %v2720_v13 = vmul.f32 0.0625, %v2616_v15  ;;  %v2624_v32 = vrot.slane %v2623_v33, 1  ;;  %v2663_v43 = vsel %vm264_vm0, %v6462_v1, 0.0  ;;  %v2655_v18 = vadd.f32 %v2654_v59, %v2653_v16 }
 0x3c8   :  { %4126 = vmatmul.mubr.f32.gmra.mrb[44].mxu0 %v6945_v5  ;;  %v2648_v42 = vadd.f32 %v2647_v54, %v2646_v14  ;;  %v2662_v2 = vsel %vm264_vm0, %v6474_v55, 0.0  ;;  %v6487_v62 = vadd.f32 %v6330_v21, %v6205_v48  ;;  %v3166_v60 = vrot.slane %v6383_v31, 7 }
 0x3c9   :  { %4128 = vmatprep.mubr.f32.mxu0 %v6266_v7  ;;  %v3168_v23 = vrot.slane %v6454_v34, 6  ;;  %v6492_v39 = vadd.f32 %v2631_v52, %v2630_v25  ;;  %v2639_v3 = vadd.f32 %v2638_v4, %v2637_v63  ;;  %v3170_v51 = vrot.slane %v6468_v41, 5 }
 0x3ca   :  { %v2649_v26 = vrot.slane %v2648_v42, 2  ;;  %v2656_v28 = vrot.slane %v2655_v18, 4  ;;  %v2664_v6 = vadd.f32 %v2663_v43, %v2662_v2  ;;  %v6496_v49 = vadd.f32 %v6367_v19, %v2720_v13 }
 0x3cb   :  { %v4435_v61 = vpop.eup %4434  ;;  %v6498_v21 = vadd.f32 %v2624_v32, %v2623_v33  ;;  %v2672_v7 = vsel %vm264_vm0, %v6487_v62, 0.0  ;;  %v6504_v14 = vadd.f32 %v6205_v48, %v6335_v30  ;;  %v6509_v15 = vadd.f32 %v6349_v40, %v6205_v48 }
 0x3cc   :  { %4185 = vmatmul.mubr.f32.vlgmr.msra.gmra.mrb[72].mxu1 %v4435_v61  ;;  %4129 = vmatmul.mubr.f32.gmra.mrb[46].mxu0 %v6274_v0  ;;  %v2650_v25 = vadd.f32 %v2649_v26, %v2648_v42  ;;  %v2657_v63 = vadd.f32 %v2656_v28, %v2655_v18  ;;  %v2665_v17 = vrot.slane %v2664_v6, 4  ;;  %v2633_v33 = vrot.slane %v6492_v39, 1 }
 0x3cd   :  { %4131 = vmatprep.mubr.f32.mxu0 %v6277_v35  ;;  %v2640_v52 = vrot.slane %v2639_v3, 2  ;;  %v2671_v4 = vsel %vm264_vm0, %v6504_v14, 0.0  ;;  %v6517_v30 = vadd.f32 %v6205_v48, %v6354_v11  ;;  %v2681_v40 = vsel %vm264_vm0, %v6509_v15, 0.0 }
 0x3ce   :  { %v2651_v0 = vrot.slane %v2650_v25, 1  ;;  %v2658_v59 = vrot.slane %v2657_v63, 2  ;;  %v2666_v54 = vadd.f32 %v2665_v17, %v2664_v6  ;;  %v2673_v16 = vadd.f32 %v2672_v7, %v2671_v4 }
 0x3cf   :  { %v2680_v35 = vsel %vm264_vm0, %v6517_v30, 0.0  ;;  %v6525_v13 = vadd.f32 %v6360_v38, %v6205_v48  ;;  %v6529_v32 = vadd.f32 %v6205_v48, %v6364_v29  ;;  %v6539_v26 = vadd.f32 %v6379_v36, %v6205_v48 }
 0x3d0   :  { %4132 = vmatmul.mubr.f32.gmra.mrb[48].mxu0 %v6282_v20  ;;  %v2652_v11 = vadd.f32 %v2651_v0, %v2650_v25  ;;  %v2659_v43 = vadd.f32 %v2658_v59, %v2657_v63  ;;  %v2667_v5 = vrot.slane %v2666_v54, 2  ;;  %v2674_v42 = vrot.slane %v2673_v16, 4 }
 0x3d1   :  { %4134 = vmatprep.mubr.f32.mxu0 %v6286_v58  ;;  %v2682_v18 = vadd.f32 %v2681_v40, %v2680_v35  ;;  %v2690_v2 = vsel %vm264_vm0, %v6525_v13, 0.0  ;;  %v2689_v38 = vsel %vm264_vm0, %v6529_v32, 0.0  ;;  %v6541_v29 = vadd.f32 %v2640_v52, %v2639_v3  ;;  %v6946_v3 = vld [vmem:[#allocation46_spill] sm:$0xff] }
 0x3d2   :  { %v2660_v20 = vrot.slane %v2659_v43, 1  ;;  %v2668_v28 = vadd.f32 %v2667_v5, %v2666_v54  ;;  %v2675_v6 = vadd.f32 %v2674_v42, %v2673_v16  ;;  %v2691_v7 = vadd.f32 %v2690_v2, %v2689_v38  ;;  %v6947_v42 = vld [vmem:[#allocation47_spill] sm:$0xff] }
 0x3d3   :  { %v2683_v61 = vrot.slane %v2682_v18, 4  ;;  %v2699_v58 = vsel %vm264_vm0, %v6539_v26, 0.0  ;;  %v6547_v25 = vadd.f32 %v6205_v48, %v6391_v44  ;;  %v2724_v63 = vmul.f32 0.0625, %v2652_v11 }
 0x3d4   :  { %4135 = vmatmul.mubr.f32.gmra.mrb[50].mxu0 %v6292_v24  ;;  %v2661_v17 = vadd.f32 %v2660_v20, %v2659_v43  ;;  %v2669_v36 = vrot.slane %v2668_v28, 1  ;;  %v2676_v4 = vrot.slane %v2675_v6, 2  ;;  %v2692_v0 = vrot.slane %v2691_v7, 4  ;;  %v6948_v20 = vld [vmem:[#allocation49_spill] sm:$0xff] }
 0x3d5   :  { %4137 = vmatprep.mubr.f32.mxu0 %v6946_v3  ;;  %v2684_v52 = vadd.f32 %v2683_v61, %v2682_v18  ;;  %v2698_v59 = vsel %vm264_vm0, %v6547_v25, 0.0  ;;  %v6555_v54 = vadd.f32 %v6401_v53, %v6205_v48  ;;  %v6561_v5 = vadd.f32 %v6205_v48, %v6412_v46 }
 0x3d6   :  { %v2725_v16 = vmul.f32 0.0625, %v2661_v17  ;;  %v2670_v44 = vadd.f32 %v2669_v36, %v2668_v28  ;;  %v2677_v40 = vadd.f32 %v2676_v4, %v2675_v6  ;;  %v2700_v35 = vadd.f32 %v2699_v58, %v2698_v59  ;;  %v6949_v59 = vld [vmem:[#allocation50_spill] sm:$0xff] }
 0x3d7   :  { %v2685_v24 = vrot.slane %v2684_v52, 2  ;;  %v2693_v11 = vadd.f32 %v2692_v0, %v2691_v7  ;;  %v2708_v43 = vsel %vm264_vm0, %v6555_v54, 0.0  ;;  %v2634_v28 = vadd.f32 %v2633_v33, %v6492_v39 }
 0x3d8   :  { %4138 = vmatmul.mubr.f32.gmra.mrb[52].mxu0 %v6947_v42  ;;  %v2748_v18 = vadd.f32 %v6367_v19, %v2725_v16  ;;  %v2726_v2 = vmul.f32 0.0625, %v2670_v44  ;;  %v2678_v53 = vrot.slane %v2677_v40, 1  ;;  %v2701_v38 = vrot.slane %v2700_v35, 4  ;;  %v6950_v44 = vld [vmem:[#allocation51_spill] sm:$0xff] }
 0x3d9   :  { %4140 = vmatprep.mubr.f32.mxu0 %v6948_v20  ;;  %v2686_v6 = vadd.f32 %v2685_v24, %v2684_v52  ;;  %v2694_v61 = vrot.slane %v2693_v11, 2  ;;  %v2707_v7 = vsel %vm264_vm0, %v6561_v5, 0.0  ;;  %v2747_v58 = vadd.f32 %v6367_v19, %v2724_v63 }
 0x3da   :  { %v2749_v48 = vadd.f32 %v6367_v19, %v2726_v2  ;;  %v2679_v46 = vadd.f32 %v2678_v53, %v2677_v40  ;;  %v2702_v17 = vadd.f32 %v2701_v38, %v2700_v35  ;;  %v3180_v36 = vrot.slane %v2748_v18, 7 }
 0x3db   :  { %v2687_v4 = vrot.slane %v2686_v6, 1  ;;  %v2695_v3 = vadd.f32 %v2694_v61, %v2693_v11  ;;  %v2709_v0 = vadd.f32 %v2708_v43, %v2707_v7  ;;  %v2642_v16 = vrot.slane %v6541_v29, 1  ;;  %v6951_v61 = vld [vmem:[#allocation52_spill] sm:$0xff] }
 0x3dc   :  { %4141 = vmatmul.mubr.f32.gmra.mrb[54].mxu0 %v6949_v59  ;;  %v3182_v39 = vrot.slane %v2749_v48, 6  ;;  %v2727_v33 = vmul.f32 0.0625, %v2679_v46  ;;  %v2703_v52 = vrot.slane %v2702_v17, 2  ;;  %v2721_v24 = vmul.f32 0.0625, %v6498_v21  ;;  %v6952_v46 = vld [vmem:[#allocation53_spill] sm:$0xff] }
 0x3dd   :  { %4143 = vmatprep.mubr.f32.mxu0 %v6950_v44  ;;  %v2688_v63 = vadd.f32 %v2687_v4, %v2686_v6  ;;  %v2696_v42 = vrot.slane %v2695_v3, 1  ;;  %v2710_v2 = vrot.slane %v2709_v0, 4  ;;  %v3172_v40 = vrot.slane %v6496_v49, 4 }
 0x3de   :  { %v2722_v35 = vmul.f32 0.0625, %v2634_v28  ;;  %v2750_v11 = vadd.f32 %v6367_v19, %v2727_v33  ;;  %v2704_v43 = vadd.f32 %v2703_v52, %v2702_v17  ;;  %v3181_v20 = vsel %vm453_vm1, %v3180_v36, %v2747_v58 }
 0x3df   :  { %v2728_v18 = vmul.f32 0.0625, %v2688_v63  ;;  %v2697_v53 = vadd.f32 %v2696_v42, %v2695_v3  ;;  %v2711_v38 = vadd.f32 %v2710_v2, %v2709_v0  ;;  %v3183_v21 = vsel %vm455_vm2, %v3182_v39, %v3181_v20  ;;  %v6954_v42 = vld [vmem:[#allocation55_spill] sm:$0xff] }
 0x3e0   :  { %4144 = vmatmul.mubr.f32.gmra.mrb[56].mxu0 %v6951_v61  ;;  %v3184_v7 = vrot.slane %v2750_v11, 5  ;;  %v2705_v48 = vrot.slane %v2704_v43, 1  ;;  %v2643_v6 = vadd.f32 %v2642_v16, %v6541_v29  ;;  %v2744_v17 = vadd.f32 %v6367_v19, %v2721_v24  ;;  %v6953_v16 = vld [vmem:[#allocation54_spill] sm:$0xff] }
 0x3e1   :  { %4146 = vmatprep.mubr.f32.mxu0 %v6952_v46  ;;  %v2751_v49 = vadd.f32 %v6367_v19, %v2728_v18  ;;  %v2729_v28 = vmul.f32 0.0625, %v2697_v53  ;;  %v2712_v4 = vrot.slane %v2711_v38, 2  ;;  %v2745_v36 = vadd.f32 %v6367_v19, %v2722_v35  ;;  %v3411_v46 = vld [vmem:[#allocation19 + $0x8] sm:$0xff] }
 0x3e2   :  { %v2706_v3 = vadd.f32 %v2705_v48, %v2704_v43  ;;  %v3185_v0 = vsel %vm457_vm3, %v3184_v7, %v3183_v21  ;;  %v2723_v58 = vmul.f32 0.0625, %v2643_v6  ;;  %v3167_v29 = vsel %vm453_vm1, %v3166_v60, %v6478_v22  ;;  %v3410_v6 = vld [vmem:[#allocation19] sm:$0xff] }
 0x3e3   :  { %v3186_v59 = vrot.slane %v2751_v49, 4  ;;  %v2713_v33 = vadd.f32 %v2712_v4, %v2711_v38  ;;  %v2752_v39 = vadd.f32 %v6367_v19, %v2729_v28  ;;  %v3169_v24 = vsel %vm455_vm2, %v3168_v23, %v3167_v29  ;;  %v6955_v38 = vld [vmem:[#allocation56_spill] sm:$0xff]  ;;  %v3412_v49 = vld [vmem:[#allocation19 + $0x10] sm:$0xff] }
 0x3e4   :  { %4147 = vmatmul.mubr.f32.gmra.mrb[58].mxu0 %v6953_v16  ;;  %v2730_v52 = vmul.f32 0.0625, %v2706_v3  ;;  %v2746_v44 = vadd.f32 %v6367_v19, %v2723_v58  ;;  %v3174_v63 = vrot.slane %v2744_v17, 3  ;;  %v3171_v31 = vsel %vm457_vm3, %v3170_v51, %v3169_v24  ;;  %v3413_v4 = vld [vmem:[#allocation19 + $0x18] sm:$0xff] }
 0x3e5   :  { %4149 = vmatprep.mubr.f32.mxu0 %v6954_v42  ;;  %v2714_v2 = vrot.slane %v2713_v33, 1  ;;  %v3187_v35 = vsel %vm459_vm4, %v3186_v59, %v3185_v0  ;;  %v3188_v11 = vrot.slane %v2752_v39, 3  ;;  %v3173_v60 = vsel %vm459_vm4, %v3172_v40, %v3171_v31  ;;  %v6956_v59 = vld [vmem:[#allocation38_spill] sm:$0xff]  ;;  %v6957_v29 = vld [vmem:[#allocation39_spill] sm:$0xff]  ;;  %v6958_v42 = vld [vmem:[#allocation40_spill] sm:$0xff] }
 0x3e6   :  { %v2753_v22 = vadd.f32 %v6367_v19, %v2730_v52  ;;  %v3176_v43 = vrot.slane %v2745_v36, 2  ;;  %v3178_v18 = vrot.slane %v2746_v44, 1  ;;  %v3175_v53 = vsel %vm461_vm5, %v3174_v63, %v3173_v60 }
 0x3e7   :  { %v2715_v34 = vadd.f32 %v2714_v2, %v2713_v33  ;;  %v3189_v23 = vsel %vm461_vm5, %v3188_v11, %v3187_v35  ;;  %v4334_v28 = vpack.c.bf16 %v3411_v46, %v3410_v6  ;;  %v4338_v17 = vpack.c.bf16 %v3413_v4, %v3412_v49  ;;  %v6959_v11 = vld [vmem:[#allocation41_spill] sm:$0xff] }
 0x3e8   :  { %4150 = vmatmul.mubr.f32.gmra.mrb[60].mxu0 %v6955_v38  ;;  %v3190_v20 = vrot.slane %v2753_v22, 2  ;;  %v3177_v61 = vsel %vm463_vm6, %v3176_v43, %v3175_v53  ;;  %v6960_v53 = vld [vmem:[#allocation42_spill] sm:$0xff] }
 0x3e9   :  { %v2731_v7 = vmul.f32 0.0625, %v2715_v34  ;;  %v3179_v41 = vsel %vm465_vm7, %v3178_v18, %v3177_v61  ;;  %4335 = vmatprep.subr.bf16.mxu1 %v4334_v28  ;;  %v6961_v61 = vld [vmem:[#allocation43_spill] sm:$0xff] }
 0x3ea   :  { %v3191_v51 = vsel %vm463_vm6, %v3190_v20, %v3189_v23  ;;  %4337 = vmatpush3.bf16.msra.mxu1 %v4334_v28  ;;  %v6962_v28 = vld [vmem:[#allocation44_spill] sm:$0xff] }
 0x3eb   :  { %v2754_v48 = vadd.f32 %v6367_v19, %v2731_v7  ;;  %4339 = vmatprep.subr.bf16.mxu1 %v4338_v17 }
 0x3ed   :  { %v3192_v40 = vrot.slane %v2754_v48, 1 }
 0x3ee   :  { %4341 = vmatpush3.bf16.msra.mxu1 %v4338_v17 }
 0x3ef   :  { %v3193_v21 = vsel %vm465_vm7, %v3192_v40, %v3191_v51 }
 0x45f   :  { %v4071_v3 = vpop.f32.mrb[28].mxu0 }
 0x460   :  { %v6611_v0 = vmul.f32 %v4071_v3, %v3193_v21  ;;  %v2837_v58 = vpop.f32.mrb[29].mxu0  ;;  %v6963_v3 = vld [vmem:[#allocation45_spill] sm:$0xff] }
 0x461   :  { %v6613_v36 = vmul.f32 %v3179_v41, %v2837_v58 }
 0x47f   :  { %v4106_v19 = vpop.f32.mrb[30].mxu0 }
 0x480   :  { %v3199_v33 = vmul.f32 %v4106_v19, %v6956_v59  ;;  %v2912_v39 = vpop.f32.mrb[31].mxu0 }
 0x481   :  { %v3198_v16 = vmul.f32 %v2912_v39, %v6957_v29 }
 0x482   :  { %v3231_v52 = vsel %vm264_vm0, %v3199_v33, 0.0 }
 0x483   :  { %v3230_v44 = vsel %vm264_vm0, %v3198_v16, 0.0  ;;  %v4109_v24 = vpop.f32.mrb[32].mxu0 }
 0x484   :  { %v3232_v63 = vadd.f32 %v3231_v52, %v3230_v44  ;;  %v3201_v2 = vmul.f32 %v4109_v24, %v6958_v42  ;;  %v2922_v35 = vpop.f32.mrb[33].mxu0  ;;  %v6964_v42 = vld [vmem:[#allocation48_spill] sm:$0xff] }
 0x485   :  { %v3200_v31 = vmul.f32 %v2922_v35, %v6959_v11 }
 0x486   :  { %v3233_v22 = vrot.slane %v3232_v63, 4  ;;  %v3240_v60 = vsel %vm264_vm0, %v3201_v2, 0.0 }
 0x487   :  { %v3239_v43 = vsel %vm264_vm0, %v3200_v31, 0.0  ;;  %v4112_v18 = vpop.f32.mrb[34].mxu0 }
 0x488   :  { %v3234_v34 = vadd.f32 %v3233_v22, %v3232_v63  ;;  %v3241_v23 = vadd.f32 %v3240_v60, %v3239_v43  ;;  %v3203_v38 = vmul.f32 %v4112_v18, %v6960_v53  ;;  %v2932_v20 = vpop.f32.mrb[35].mxu0 }
 0x489   :  { %v3202_v7 = vmul.f32 %v2932_v20, %v6961_v61 }
 0x48a   :  { %v3235_v41 = vrot.slane %v3234_v34, 2  ;;  %v3242_v51 = vrot.slane %v3241_v23, 4  ;;  %v3249_v48 = vsel %vm264_vm0, %v3203_v38, 0.0 }
 0x48b   :  { %v3248_v40 = vsel %vm264_vm0, %v3202_v7, 0.0  ;;  %v4115_v21 = vpop.f32.mrb[36].mxu0 }
 0x48c   :  { %v3236_v6 = vadd.f32 %v3235_v41, %v3234_v34  ;;  %v3243_v46 = vadd.f32 %v3242_v51, %v3241_v23  ;;  %v3250_v49 = vadd.f32 %v3249_v48, %v3248_v40  ;;  %v3205_v4 = vmul.f32 %v4115_v21, %v6962_v28  ;;  %v2942_v17 = vpop.f32.mrb[37].mxu0 }
 0x48d   :  { %v3204_v58 = vmul.f32 %v2942_v17, %v6963_v3 }
 0x48e   :  { %v3244_v19 = vrot.slane %v3243_v46, 2  ;;  %v3251_v59 = vrot.slane %v3250_v49, 4  ;;  %v3258_v33 = vsel %vm264_vm0, %v3205_v4, 0.0  ;;  %v3237_v39 = vrot.slane %v3236_v6, 1 }
 0x48f   :  { %v3257_v29 = vsel %vm264_vm0, %v3204_v58, 0.0  ;;  %v4118_v16 = vpop.f32.mrb[38].mxu0 }
 0x490   :  { %v3245_v52 = vadd.f32 %v3244_v19, %v3243_v46  ;;  %v3252_v44 = vadd.f32 %v3251_v59, %v3250_v49  ;;  %v3259_v24 = vadd.f32 %v3258_v33, %v3257_v29  ;;  %v2952_v63 = vpop.f32.mrb[39].mxu0  ;;  %v3207_v2 = vmul.f32 %v4118_v16, %v6964_v42 }
 0x491   :  { %v3206_v35 = vmul.f32 %v2952_v63, %v6373_v47  ;;  %v3238_v60 = vadd.f32 %v3237_v39, %v3236_v6 }
 0x492   :  { %v3246_v11 = vrot.slane %v3245_v52, 1  ;;  %v3253_v31 = vrot.slane %v3252_v44, 2  ;;  %v3260_v22 = vrot.slane %v3259_v24, 4  ;;  %v3267_v43 = vsel %vm264_vm0, %v3207_v2, 0.0 }
 0x493   :  { %v3266_v18 = vsel %vm264_vm0, %v3206_v35, 0.0  ;;  %v4121_v34 = vpop.f32.mrb[40].mxu0 }
 0x494   :  { %v3247_v23 = vadd.f32 %v3246_v11, %v3245_v52  ;;  %v3254_v53 = vadd.f32 %v3253_v31, %v3252_v44  ;;  %v3261_v38 = vadd.f32 %v3260_v22, %v3259_v24  ;;  %v3268_v20 = vadd.f32 %v3267_v43, %v3266_v18  ;;  %v2962_v61 = vpop.f32.mrb[41].mxu0 }
 0x495   :  { %v3209_v7 = vmul.f32 %v4121_v34, %v6377_v27  ;;  %v3208_v41 = vmul.f32 %v2962_v61, %v6389_v57 }
 0x496   :  { %v3390_v47 = vsel %vm453_vm1, %v3247_v23, %v3238_v60  ;;  %v3255_v51 = vrot.slane %v3254_v53, 1  ;;  %v3262_v48 = vrot.slane %v3261_v38, 2  ;;  %v3269_v40 = vrot.slane %v3268_v20, 4 }
 0x497   :  { %v3276_v21 = vsel %vm264_vm0, %v3209_v7, 0.0  ;;  %v3275_v6 = vsel %vm264_vm0, %v3208_v41, 0.0  ;;  %v4124_v46 = vpop.f32.mrb[42].mxu0 }
 0x498   :  { %v3256_v49 = vadd.f32 %v3255_v51, %v3254_v53  ;;  %v3263_v28 = vadd.f32 %v3262_v48, %v3261_v38  ;;  %v3270_v4 = vadd.f32 %v3269_v40, %v3268_v20  ;;  %v3277_v17 = vadd.f32 %v3276_v21, %v3275_v6  ;;  %v2972_v3 = vpop.f32.mrb[43].mxu0 }
 0x499   :  { %v3211_v58 = vmul.f32 %v4124_v46, %v6406_v37  ;;  %v3210_v27 = vmul.f32 %v2972_v3, %v6410_v10 }
 0x49a   :  { %v3391_v57 = vsel %vm455_vm2, %v3256_v49, %v3390_v47  ;;  %v3264_v19 = vrot.slane %v3263_v28, 1  ;;  %v3271_v59 = vrot.slane %v3270_v4, 2  ;;  %v3278_v33 = vrot.slane %v3277_v17, 4 }
 0x49b   :  { %v3285_v39 = vsel %vm264_vm0, %v3211_v58, 0.0  ;;  %v3284_v29 = vsel %vm264_vm0, %v3210_v27, 0.0  ;;  %v4127_v16 = vpop.f32.mrb[44].mxu0 }
 0x49c   :  { %v3265_v52 = vadd.f32 %v3264_v19, %v3263_v28  ;;  %v3272_v44 = vadd.f32 %v3271_v59, %v3270_v4  ;;  %v3279_v24 = vadd.f32 %v3278_v33, %v3277_v17  ;;  %v3286_v63 = vadd.f32 %v3285_v39, %v3284_v29  ;;  %v2982_v42 = vpop.f32.mrb[45].mxu0 }
 0x49d   :  { %v3213_v2 = vmul.f32 %v4127_v16, %v6418_v12  ;;  %v3212_v37 = vmul.f32 %v2982_v42, %v6431_v45 }
 0x49e   :  { %v3392_v10 = vsel %vm457_vm3, %v3265_v52, %v3391_v57  ;;  %v3273_v35 = vrot.slane %v3272_v44, 1  ;;  %v3280_v11 = vrot.slane %v3279_v24, 2  ;;  %v3287_v31 = vrot.slane %v3286_v63, 4 }
 0x49f   :  { %v6648_v22 = vpop.f32.mrb[72].mxu1  ;;  %v3294_v60 = vsel %vm264_vm0, %v3213_v2, 0.0  ;;  %v3293_v43 = vsel %vm264_vm0, %v3212_v37, 0.0  ;;  %v4130_v18 = vpop.f32.mrb[46].mxu0 }
 0x4a0   :  { %v6652_v34 = vpop.f32.mrb[73].mxu1  ;;  %v3274_v23 = vadd.f32 %v3273_v35, %v3272_v44  ;;  %v3281_v53 = vadd.f32 %v3280_v11, %v3279_v24  ;;  %v3288_v38 = vadd.f32 %v3287_v31, %v3286_v63  ;;  %v3295_v12 = vadd.f32 %v3294_v60, %v3293_v43  ;;  %v2992_v20 = vpop.f32.mrb[47].mxu0 }
 0x4a1   :  { %v3215_v45 = vmul.f32 %v4130_v18, %v6435_v50  ;;  %v3214_v61 = vmul.f32 %v2992_v20, %v6439_v8 }
 0x4a2   :  { %v3393_v7 = vsel %vm459_vm4, %v3274_v23, %v3392_v10  ;;  %v3282_v41 = vrot.slane %v3281_v53, 1  ;;  %v3289_v47 = vrot.slane %v3288_v38, 2  ;;  %v3296_v51 = vrot.slane %v3295_v12, 4 }
 0x4a3   :  { %v3303_v48 = vsel %vm264_vm0, %v3215_v45, 0.0  ;;  %v3302_v40 = vsel %vm264_vm0, %v3214_v61, 0.0  ;;  %v4133_v21 = vpop.f32.mrb[48].mxu0 }
 0x4a4   :  { %v3283_v6 = vadd.f32 %v3282_v41, %v3281_v53  ;;  %v3290_v46 = vadd.f32 %v3289_v47, %v3288_v38  ;;  %v3297_v49 = vadd.f32 %v3296_v51, %v3295_v12  ;;  %v3304_v28 = vadd.f32 %v3303_v48, %v3302_v40  ;;  %v3002_v4 = vpop.f32.mrb[49].mxu0 }
 0x4a5   :  { %v3217_v17 = vmul.f32 %v4133_v21, %v6450_v56  ;;  %v3216_v50 = vmul.f32 %v3002_v4, %v6458_v9 }
 0x4a6   :  { %v3394_v8 = vsel %vm461_vm5, %v3283_v6, %v3393_v7  ;;  %v3291_v3 = vrot.slane %v3290_v46, 1  ;;  %v3298_v58 = vrot.slane %v3297_v49, 2  ;;  %v3305_v27 = vrot.slane %v3304_v28, 4 }
 0x4a7   :  { %v3312_v57 = vsel %vm264_vm0, %v3217_v17, 0.0  ;;  %v3311_v19 = vsel %vm264_vm0, %v3216_v50, 0.0  ;;  %v4136_v59 = vpop.f32.mrb[50].mxu0 }
 0x4a8   :  { %v3292_v33 = vadd.f32 %v3291_v3, %v3290_v46  ;;  %v3299_v39 = vadd.f32 %v3298_v58, %v3297_v49  ;;  %v3306_v29 = vadd.f32 %v3305_v27, %v3304_v28  ;;  %v3313_v16 = vadd.f32 %v3312_v57, %v3311_v19  ;;  %v3012_v52 = vpop.f32.mrb[51].mxu0 }
 0x4a9   :  { %v3219_v44 = vmul.f32 %v4136_v59, %v6462_v1  ;;  %v3218_v56 = vmul.f32 %v3012_v52, %v6474_v55 }
 0x4aa   :  { %v3300_v9 = vrot.slane %v3299_v39, 1  ;;  %v3307_v24 = vrot.slane %v3306_v29, 2  ;;  %v3314_v63 = vrot.slane %v3313_v16, 4  ;;  %v3395_v42 = vsel %vm463_vm6, %v3292_v33, %v3394_v8 }
 0x4ab   :  { %v3321_v2 = vsel %vm264_vm0, %v3219_v44, 0.0  ;;  %v3320_v37 = vsel %vm264_vm0, %v3218_v56, 0.0  ;;  %v4139_v10 = vpop.f32.mrb[52].mxu0 }
 0x4ac   :  { %v3301_v35 = vadd.f32 %v3300_v9, %v3299_v39  ;;  %v3308_v11 = vadd.f32 %v3307_v24, %v3306_v29  ;;  %v3315_v31 = vadd.f32 %v3314_v63, %v3313_v16  ;;  %v3322_v60 = vadd.f32 %v3321_v2, %v3320_v37  ;;  %v3022_v43 = vpop.f32.mrb[53].mxu0 }
 0x4ad   :  { %v3221_v18 = vmul.f32 %v4139_v10, %v6487_v62  ;;  %v3220_v1 = vmul.f32 %v3022_v43, %v6504_v14 }
 0x4ae   :  { %v3316_v55 = vrot.slane %v3315_v31, 2  ;;  %v3323_v23 = vrot.slane %v3322_v60, 4  ;;  %v3396_v53 = vsel %vm465_vm7, %v3301_v35, %v3395_v42  ;;  %v3309_v38 = vrot.slane %v3308_v11, 1 }
 0x4af   :  { %v3330_v12 = vsel %vm264_vm0, %v3221_v18, 0.0  ;;  %v3329_v20 = vsel %vm264_vm0, %v3220_v1, 0.0  ;;  %v4142_v45 = vpop.f32.mrb[54].mxu0  ;;  %v3406_v61 = vadd.f32 %v3396_v53, %v6613_v36 }
 0x4b0   :  { %v3317_v7 = vadd.f32 %v3316_v55, %v3315_v31  ;;  %v3324_v41 = vadd.f32 %v3323_v23, %v3322_v60  ;;  %v3331_v47 = vadd.f32 %v3330_v12, %v3329_v20  ;;  %v3032_v51 = vpop.f32.mrb[55].mxu0  ;;  %v3223_v62 = vmul.f32 %v4142_v45, %v6509_v15 }
 0x4b1   :  { %v3222_v14 = vmul.f32 %v3032_v51, %v6517_v30  ;;  %v3408_v48 = vmul.f32 %v3406_v61, %v6652_v34  ;;  %v3310_v46 = vadd.f32 %v3309_v38, %v3308_v11 }
 0x4b2   :  { %v3318_v40 = vrot.slane %v3317_v7, 1  ;;  %v3325_v21 = vrot.slane %v3324_v41, 2  ;;  %v3332_v6 = vrot.slane %v3331_v47, 4  ;;  %v3339_v49 = vsel %vm264_vm0, %v3223_v62, 0.0 }
 0x4b3   :  { %v3338_v28 = vsel %vm264_vm0, %v3222_v14, 0.0  ;;  %v4145_v4 = vpop.f32.mrb[56].mxu0  ;;  %4195 = vmatprep.mubr.msk.f32.mxu1 %vm264_vm0, %v3408_v48 }
 0x4b4   :  { %v3319_v36 = vadd.f32 %v3318_v40, %v3317_v7  ;;  %v3326_v17 = vadd.f32 %v3325_v21, %v3324_v41  ;;  %v3333_v50 = vadd.f32 %v3332_v6, %v3331_v47  ;;  %v3340_v8 = vadd.f32 %v3339_v49, %v3338_v28  ;;  %v3042_v15 = vpop.f32.mrb[57].mxu0 }
 0x4b5   :  { %v3225_v30 = vmul.f32 %v4145_v4, %v6525_v13  ;;  %v3224_v34 = vmul.f32 %v3042_v15, %v6529_v32 }
 0x4b6   :  { %v3397_v3 = vsel %vm453_vm1, %v3319_v36, %v3310_v46  ;;  %v3327_v58 = vrot.slane %v3326_v17, 1  ;;  %v3334_v27 = vrot.slane %v3333_v50, 2  ;;  %v3341_v57 = vrot.slane %v3340_v8, 4 }
 0x4b7   :  { %v3348_v19 = vsel %vm264_vm0, %v3225_v30, 0.0  ;;  %v3347_v59 = vsel %vm264_vm0, %v3224_v34, 0.0  ;;  %v4148_v33 = vpop.f32.mrb[58].mxu0 }
 0x4b8   :  { %v3328_v39 = vadd.f32 %v3327_v58, %v3326_v17  ;;  %v3335_v29 = vadd.f32 %v3334_v27, %v3333_v50  ;;  %v3342_v16 = vadd.f32 %v3341_v57, %v3340_v8  ;;  %v3349_v52 = vadd.f32 %v3348_v19, %v3347_v59  ;;  %v3052_v44 = vpop.f32.mrb[59].mxu0  ;;  %v3634_v17 = vld [vmem:[#allocation20] ss:$0 sm:$0xff] }
 0x4b9   :  { %v3227_v56 = vmul.f32 %v4148_v33, %v6539_v26  ;;  %v3226_v13 = vmul.f32 %v3052_v44, %v6547_v25 }
 0x4ba   :  { %v3398_v32 = vsel %vm455_vm2, %v3328_v39, %v3397_v3  ;;  %v3336_v9 = vrot.slane %v3335_v29, 1  ;;  %v3343_v24 = vrot.slane %v3342_v16, 2  ;;  %v3350_v63 = vrot.slane %v3349_v52, 4 }
 0x4bb   :  { %v3357_v42 = vsel %vm264_vm0, %v3227_v56, 0.0  ;;  %v3356_v2 = vsel %vm264_vm0, %v3226_v13, 0.0  ;;  %v4151_v37 = vpop.f32.mrb[60].mxu0 }
 0x4bc   :  { %v3337_v10 = vadd.f32 %v3336_v9, %v3335_v29  ;;  %v3344_v35 = vadd.f32 %v3343_v24, %v3342_v16  ;;  %v3351_v11 = vadd.f32 %v3350_v63, %v3349_v52  ;;  %v3358_v31 = vadd.f32 %v3357_v42, %v3356_v2  ;;  %v3062_v60 = vpop.f32.mrb[61].mxu0 }
 0x4bd   :  { %v3229_v43 = vmul.f32 %v4151_v37, %v6555_v54  ;;  %v3228_v26 = vmul.f32 %v3062_v60, %v6561_v5 }
 0x4be   :  { %v3399_v25 = vsel %vm457_vm3, %v3337_v10, %v3398_v32  ;;  %v3345_v18 = vrot.slane %v3344_v35, 1  ;;  %v3352_v1 = vrot.slane %v3351_v11, 2  ;;  %v3359_v55 = vrot.slane %v3358_v31, 4 }
 0x4bf   :  { %v3366_v23 = vsel %vm264_vm0, %v3229_v43, 0.0  ;;  %v3365_v53 = vsel %vm264_vm0, %v3228_v26, 0.0 }
 0x4c0   :  { %v3346_v38 = vadd.f32 %v3345_v18, %v3344_v35  ;;  %v3353_v12 = vadd.f32 %v3352_v1, %v3351_v11  ;;  %v3360_v20 = vadd.f32 %v3359_v55, %v3358_v31  ;;  %v3367_v45 = vadd.f32 %v3366_v23, %v3365_v53 }
 0x4c2   :  { %v3400_v61 = vsel %vm459_vm4, %v3346_v38, %v3399_v25  ;;  %v3354_v7 = vrot.slane %v3353_v12, 1  ;;  %v3361_v41 = vrot.slane %v3360_v20, 2  ;;  %v3368_v54 = vrot.slane %v3367_v45, 4 }
 0x4c4   :  { %v3355_v47 = vadd.f32 %v3354_v7, %v3353_v12  ;;  %v3362_v5 = vadd.f32 %v3361_v41, %v3360_v20  ;;  %v3369_v51 = vadd.f32 %v3368_v54, %v3367_v45 }
 0x4c6   :  { %v3401_v62 = vsel %vm461_vm5, %v3355_v47, %v3400_v61  ;;  %v3363_v14 = vrot.slane %v3362_v5, 1  ;;  %v3370_v48 = vrot.slane %v3369_v51, 2 }
 0x4c8   :  { %v3364_v40 = vadd.f32 %v3363_v14, %v3362_v5  ;;  %v3371_v21 = vadd.f32 %v3370_v48, %v3369_v51 }
 0x4ca   :  { %v3402_v6 = vsel %vm463_vm6, %v3364_v40, %v3401_v62  ;;  %v3372_v46 = vrot.slane %v3371_v21, 1 }
 0x4cc   :  { %v3373_v49 = vadd.f32 %v3372_v46, %v3371_v21 }
 0x4ce   :  { %v3403_v28 = vsel %vm465_vm7, %v3373_v49, %v3402_v6 }
 0x4cf   :  { %v3407_v4 = vadd.f32 %v3403_v28, %v6611_v0 }
 0x4d1   :  { %v3409_v36 = vmul.f32 %v6648_v22, %v3407_v4 }
 0x4d3   :  { %4196 = vmatmul.mubr.msk.f32.vlgmr.msra.gmra.mrb[74].mxu1 %vm264_vm0, %v3409_v36 }
 0x5a6   :  { %v4197_v50 = vpop.f32.mrb[74].mxu1 }
 0x5a7   :  { %v3499_v8 = vadd.f32 %v4197_v50, %v3634_v17  ;;  %v3493_v15 = vpop.f32.mrb[75].mxu1 }
 0x5a8   :  { %v3494_v30 = vadd.f32 %v3634_v17, %v3493_v15 }
 0x5a9   :  { %3504 = vst.msk [vmem:[#allocation25 + $0x8] sm:$0xff] %vm3502_vm8, %v3499_v8 }
 0x5aa   :  { %3503 = vst.msk [vmem:[#allocation25] sm:$0xff] %vm3502_vm8, %v3494_v30 }
 0x5ab   :  { %4755 = shalt.err (!%p4752_p4)
}
 0x5ac   :  { %s4756_s20 = scalar_lea.hbm %s6732_s14, 256 }
 0x5ad   :  { %p4757_p5 = scmp.ne.s32.totalorder %s6732_s14, %s4756_s20  ;;  %p4760_p6 = scmp.lt.u32.totalorder %s4756_s20, %s6732_s14 }
 0x5af   :  { %p4762_p7 = pnand %p4760_p6, %p4757_p5 }
 0x5b1   :  { %4765 = shalt.err (!%p4762_p7)
}
 0x5b2   :  { %3516 = dma.vmem_to_hbm [thread:$0]  %s3511_s17, 256, %s6732_s14, [#allocation4], %s4786_s25, %s4786_s25, %s4787_s26  }
 0x5b3   :  { %4782 = dma.done.wait [#allocation4], 256  }
 0x5b4   :  { %4783 = vsyncadd [#allocation4], 4294967040 }
 0x5b5   :  { %3520 = vsyncpa [#allocation3], 1 }
 0x5b6   :  { %3521 = vsyncpa [#allocation6], 1 }
 0x5b7   :  { %3522 = vsyncpa [#allocation9], 1 }
 0x5b8   :  { %3523 = vsyncpa [#allocation12], 1 }
 0x5b9   :  { %3524 = vsyncpa [#allocation15], 1 }
 0x5ba   :  { %3525 = vsyncpa [#allocation18], 1 }
 0x5bb   :  { %3526 = vsyncpa [#allocation21], 1 }
 0x5bc   :  { %3527 = vsyncpa [#allocation24], 1 }
 0x5bd   :  { %3528 = vsyncpa [#allocation4], 1 }

</bundles_post_ra>
